<compile_context>
chip_gen: v6e
topology: v6e:2x2x1
jax: 0.10.0
libtpu: 0.0.40
codegen_flags: <defaults>
</compile_context>

<pallas_src>
import numpy as np
import jax
import jax.numpy as jnp
from jax.experimental import pallas as pl
from jax.experimental.pallas import tpu as pltpu

H_IN, W_IN = 32, 128          # input spatial dims (width must be 128 for conv0)
C0, C1, C2 = 128, 128, 256    # channels after conv0 / conv1 / conv2
H1, H2 = 16, 8                # heights after the two stride-2 convs
FLAT = C2 * H2                # 2048 == fc input dim

# Host-side row permutation (per batch): groups h%4==0 | h%4==2 | h%4==1 | h%4==3.
# With this ordering, conv1's four kh-taps (in the kernel's chosen conv1 output
# row order) and conv2's four kh-taps are all contiguous per-batch slices.
_PERM = np.concatenate([np.arange(0, H_IN, 4), np.arange(2, H_IN, 4),
                        np.arange(1, H_IN, 4), np.arange(3, H_IN, 4)])


# ----------------------------------------------------------------------------
# Kernel: one batch tile (TB elements) per grid step.
# ----------------------------------------------------------------------------
def sound_encoder_kernel(x_ref, w0_ref, s0_ref, t0_ref,
                         w1_ref, s1_ref, t1_ref,
                         w2_ref, s2_ref, t2_ref,
                         wfc_ref, bfc_ref, out_ref):
    f32, bf16 = jnp.float32, jnp.bfloat16
    tb = out_ref.shape[0]

    def shift_down1(blk):        # per-batch rows -> [0, blk[0..n-2]]
        z = jnp.zeros_like(blk[:, :1, :])
        return jnp.concatenate([z, blk[:, :-1, :]], axis=1)

    def shift_up1(blk):          # per-batch rows -> [blk[1..n-1], 0]
        z = jnp.zeros_like(blk[:, :1, :])
        return jnp.concatenate([blk[:, 1:, :], z], axis=1)

    # ---- conv_layer_0: Conv2d(1,128,(1,128)) + BN + ReLU == per-row matmul ----
    h0 = jnp.dot(x_ref[...], w0_ref[...], preferred_element_type=f32)   # (tb*32,128)
    h0 = jnp.maximum(h0 * s0_ref[...] + t0_ref[...], 0.0).astype(bf16)
    h0 = h0.reshape(tb, H_IN, C0)
    blk_a = h0[:, 0:8, :]      # input rows h % 4 == 0
    blk_b = h0[:, 8:16, :]     # h % 4 == 2
    blk_c = h0[:, 16:24, :]    # h % 4 == 1
    blk_d = h0[:, 24:32, :]    # h % 4 == 3

    # ---- conv_layer_1: Conv2d(128,128,(4,1),stride 2,pad 1) + BN + ReLU ----
    # Conv1 output rows are ordered (ho1 even first, then ho1 odd) so that
    # conv2's taps become contiguous slices as well.  Per-kh accumulation.
    tap0 = jnp.concatenate([shift_down1(blk_d), blk_c], axis=1).reshape(tb * H1, C0)
    tap1 = h0[:, 0:16, :].reshape(tb * H1, C0)
    tap2 = h0[:, 16:32, :].reshape(tb * H1, C0)
    tap3 = jnp.concatenate([blk_b, shift_up1(blk_a)], axis=1).reshape(tb * H1, C0)
    pre1 = (jnp.dot(tap0, w1_ref[0], preferred_element_type=f32)
            + jnp.dot(tap1, w1_ref[1], preferred_element_type=f32)
            + jnp.dot(tap2, w1_ref[2], preferred_element_type=f32)
            + jnp.dot(tap3, w1_ref[3], preferred_element_type=f32))     # (tb*16,128)
    h1 = jnp.maximum(pre1 * s1_ref[...] + t1_ref[...], 0.0).astype(bf16)
    h1 = h1.reshape(tb, H1, C1)
    e1 = h1[:, 0:8, :]         # conv1 outputs at even ho1
    o1 = h1[:, 8:16, :]        # conv1 outputs at odd  ho1

    # ---- conv_layer_2: Conv2d(128,256,(4,1),stride 2,pad 1) + BN + ReLU ----
    u0 = shift_down1(o1).reshape(tb * H2, C1)
    u1 = e1.reshape(tb * H2, C1)
    u2 = o1.reshape(tb * H2, C1)
    u3 = shift_up1(e1).reshape(tb * H2, C1)
    pre2 = (jnp.dot(u0, w2_ref[0], preferred_element_type=f32)
            + jnp.dot(u1, w2_ref[1], preferred_element_type=f32)
            + jnp.dot(u2, w2_ref[2], preferred_element_type=f32)
            + jnp.dot(u3, w2_ref[3], preferred_element_type=f32))       # (tb*8,256)
    h2 = jnp.maximum(pre2 * s2_ref[...] + t2_ref[...], 0.0).astype(bf16)
    h2 = h2.reshape(tb, H2, C2)

    # ---- fc_mu / fc_logvar fused: out = sum_h h2[:,h,:] @ Wfc[h] + b ----
    out = jnp.dot(h2[:, 0, :], wfc_ref[0], preferred_element_type=f32)
    for hh in range(1, H2):
        out = out + jnp.dot(h2[:, hh, :], wfc_ref[hh], preferred_element_type=f32)
    out_ref[...] = out + bfc_ref[...]                                   # (tb, n_pad)


# ----------------------------------------------------------------------------
# Wrapper: input permutation, weight re-layout, BN folding, pallas_call.
# ----------------------------------------------------------------------------
def sound_encoder_forward(x_nchw, p, tb=16):
    """x_nchw: (B, 1, 32, 128) float32 -> (mu, logvar), each (B, out_dim)."""
    assert tb % 8 == 0, "tb must be a multiple of 8"
    f32, bf16 = jnp.float32, jnp.bfloat16
    B = x_nchw.shape[0]
    out_dim = p["fc_mu_w"].shape[0]
    n_out = 2 * out_dim
    n_pad = max(128, -(-n_out // 128) * 128)     # keep the output lane-dense

    grid = -(-B // tb)                           # ceil(B / tb); keep even on v7x
    b_pad = grid * tb

    # Input: drop channel dim, apply the parity-cascade row permutation, pad the
    # batch, cast to bf16 (halves input DMA), fold batch into the sublane axis.
    x = x_nchw[:, 0, :, :][:, _PERM, :]
    if b_pad != B:
        x = jnp.pad(x, ((0, b_pad - B), (0, 0), (0, 0)))
    x = x.astype(bf16).reshape(b_pad * H_IN, W_IN)

    def bn_fold(gamma, beta, mean, var, eps=1e-5):
        scale = gamma / jnp.sqrt(var + eps)
        shift = beta - mean * scale
        return scale[None, :].astype(f32), shift[None, :].astype(f32)

    # Conv weights: conv0 as (w, co); conv1/conv2 as per-kh (kh, ci, co) stacks.
    w0 = jnp.transpose(p["conv0_w"][:, 0, 0, :], (1, 0)).astype(bf16)    # (128w,128co)
    w1 = jnp.transpose(p["conv1_w"][:, :, :, 0], (2, 1, 0)).astype(bf16)  # (4,128,128)
    w2 = jnp.transpose(p["conv2_w"][:, :, :, 0], (2, 1, 0)).astype(bf16)  # (4,128,256)
    s0, t0 = bn_fold(p["bn0_gamma"], p["bn0_beta"], p["bn0_mean"], p["bn0_var"])
    s1, t1 = bn_fold(p["bn1_gamma"], p["bn1_beta"], p["bn1_mean"], p["bn1_var"])
    s2, t2 = bn_fold(p["bn2_gamma"], p["bn2_beta"], p["bn2_mean"], p["bn2_var"])

    # torch's view(B,-1) flattens (C=256, H=8) with H fastest (flat = c*8 + h);
    # the kernel contracts per height slice, so restack as (h, c, out) and fuse
    # the two heads along N (padded to a multiple of 128 lanes).
    def fc_stack(w):
        return jnp.transpose(w.reshape(out_dim, C2, H2), (2, 1, 0))      # (8,256,out)
    wfc = jnp.concatenate([fc_stack(p["fc_mu_w"]), fc_stack(p["fc_logvar_w"])], axis=2)
    bfc = jnp.concatenate([p["fc_mu_b"], p["fc_logvar_b"]])
    if n_pad != n_out:
        wfc = jnp.pad(wfc, ((0, 0), (0, 0), (0, n_pad - n_out)))
        bfc = jnp.pad(bfc, (0, n_pad - n_out))
    wfc = wfc.astype(bf16)
    bfc = bfc[None, :].astype(f32)

    def const_spec(a):
        n = a.ndim
        return pl.BlockSpec(a.shape, lambda b, n=n: (0,) * n)

    grid_spec = pltpu.PrefetchScalarGridSpec(
        num_scalar_prefetch=0,
        grid=(grid,),
        in_specs=[
            pl.BlockSpec((tb * H_IN, W_IN), lambda b: (b, 0)),           # x tile
            const_spec(w0), const_spec(s0), const_spec(t0),
            const_spec(w1), const_spec(s1), const_spec(t1),
            const_spec(w2), const_spec(s2), const_spec(t2),
            const_spec(wfc), const_spec(bfc),
        ],
        out_specs=pl.BlockSpec((tb, n_pad), lambda b: (b, 0)),
    )

    out = pl.pallas_call(
        sound_encoder_kernel,
        out_shape=jax.ShapeDtypeStruct((b_pad, n_pad), f32),
        grid_spec=grid_spec,
        compiler_params=pltpu.CompilerParams(dimension_semantics=("parallel",)),
    )(x, w0, s0, t0, w1, s1, t1, w2, s2, t2, wfc, bfc)

    return out[:B, :out_dim], out[:B, out_dim:n_out]


# ----------------------------------------------------------------------------
# Parameter init + pure-JAX reference.
# ----------------------------------------------------------------------------
def init_params(key, out_dim):
    f32 = jnp.float32
    ks = jax.random.split(key, 19)
    p = {}
    p["conv0_w"] = jax.random.normal(ks[0], (C0, 1, 1, W_IN), f32) / np.sqrt(W_IN)
    p["conv1_w"] = jax.random.normal(ks[1], (C1, C0, 4, 1), f32) / np.sqrt(4 * C0)
    p["conv2_w"] = jax.random.normal(ks[2], (C2, C1, 4, 1), f32) / np.sqrt(4 * C1)
    for i, c in enumerate((C0, C1, C2)):
        p[f"bn{i}_gamma"] = 1.0 + 0.1 * jax.random.normal(ks[3 + 4 * i], (c,), f32)
        p[f"bn{i}_beta"] = 0.1 * jax.random.normal(ks[4 + 4 * i], (c,), f32)
        p[f"bn{i}_mean"] = 0.05 * jax.random.normal(ks[5 + 4 * i], (c,), f32)
        p[f"bn{i}_var"] = 1.0 + 0.1 * jnp.abs(jax.random.normal(ks[6 + 4 * i], (c,), f32))
    p["fc_mu_w"] = jax.random.normal(ks[15], (out_dim, FLAT), f32) / np.sqrt(FLAT)
    p["fc_mu_b"] = 0.1 * jax.random.normal(ks[16], (out_dim,), f32)
    p["fc_logvar_w"] = jax.random.normal(ks[17], (out_dim, FLAT), f32) / np.sqrt(FLAT)
    p["fc_logvar_b"] = 0.1 * jax.random.normal(ks[18], (out_dim,), f32)
    return p


def reference_forward(x_nchw, p, eps=1e-5):
    """Pure-JAX/XLA reference (eval-mode BN, f32 HIGHEST precision)."""
    def bn(y, gamma, beta, mean, var):
        scale = gamma / jnp.sqrt(var + eps)
        shift = beta - mean * scale
        return y * scale[None, :, None, None] + shift[None, :, None, None]

    dn = ("NCHW", "OIHW", "NCHW")
    hp = jax.lax.Precision.HIGHEST
    y = jax.lax.conv_general_dilated(x_nchw, p["conv0_w"], (1, 1),
                                     [(0, 0), (0, 0)], dimension_numbers=dn,
                                     precision=hp)
    y = jax.nn.relu(bn(y, p["bn0_gamma"], p["bn0_beta"], p["bn0_mean"], p["bn0_var"]))
    y = jax.lax.conv_general_dilated(y, p["conv1_w"], (2, 1),
                                     [(1, 1), (0, 0)], dimension_numbers=dn,
                                     precision=hp)
    y = jax.nn.relu(bn(y, p["bn1_gamma"], p["bn1_beta"], p["bn1_mean"], p["bn1_var"]))
    y = jax.lax.conv_general_dilated(y, p["conv2_w"], (2, 1),
                                     [(1, 1), (0, 0)], dimension_numbers=dn,
                                     precision=hp)
    y = jax.nn.relu(bn(y, p["bn2_gamma"], p["bn2_beta"], p["bn2_mean"], p["bn2_var"]))
    h = y.reshape(y.shape[0], -1)                                        # (B, 2048)
    mu = h @ p["fc_mu_w"].T + p["fc_mu_b"]
    lv = h @ p["fc_logvar_w"].T + p["fc_logvar_b"]
    return mu, lv


if __name__ == "__main__":
    key = jax.random.PRNGKey(0)
    kx, kp = jax.random.split(key)
    out_dim = 64
    params = init_params(kp, out_dim)
    B = 20                                     # not a multiple of TB=16 -> exercises padding; grid=2
    x = jax.random.normal(kx, (B, 1, H_IN, W_IN), jnp.float32)           # NCHW input

    mu, lv = sound_encoder_forward(x, params, tb=16)
    jax.block_until_ready((mu, lv))

    mu_ref, lv_ref = reference_forward(x, params)
    # bf16 MXU operands (f32 accumulation) vs f32 HIGHEST reference: looser tol.
    np.testing.assert_allclose(np.asarray(mu), np.asarray(mu_ref), rtol=5e-2, atol=5e-2)
    np.testing.assert_allclose(np.asarray(lv), np.asarray(lv_ref), rtol=5e-2, atol=5e-2)
    assert mu.shape == (B, out_dim) and lv.shape == (B, out_dim)
    print("KERNEL_OK")
</pallas_src>

<mosaic_0001>
module attributes {stable_mosaic.version = 11 : i64} {
  func.func @sound_encoder_kernel(%arg0: i32, %arg1: memref<512x128xbf16, #tpu.memory_space<vmem>>, %arg2: memref<128x128xbf16, #tpu.memory_space<vmem>>, %arg3: memref<1x128xf32, #tpu.memory_space<vmem>>, %arg4: memref<1x128xf32, #tpu.memory_space<vmem>>, %arg5: memref<4x128x128xbf16, #tpu.memory_space<vmem>>, %arg6: memref<1x128xf32, #tpu.memory_space<vmem>>, %arg7: memref<1x128xf32, #tpu.memory_space<vmem>>, %arg8: memref<4x128x256xbf16, #tpu.memory_space<vmem>>, %arg9: memref<1x256xf32, #tpu.memory_space<vmem>>, %arg10: memref<1x256xf32, #tpu.memory_space<vmem>>, %arg11: memref<8x256x128xbf16, #tpu.memory_space<vmem>>, %arg12: memref<1x128xf32, #tpu.memory_space<vmem>>, %arg13: memref<16x128xf32, #tpu.memory_space<vmem>>) attributes {dimension_semantics = [#tpu.dimension_semantics<parallel>], iteration_bounds = array<i64: 2>, scalar_prefetch = 0 : i64, scratch_operands = 0 : i64, tpu.core_type = #tpu.core_type<tc>, window_params = [{transform_indices = @transform_0, window_bounds = array<i64: 512, 128>}, {pipeline_mode = #tpu.pipeline_mode<synchronous>, transform_indices = @transform_1, window_bounds = array<i64: 128, 128>}, {pipeline_mode = #tpu.pipeline_mode<synchronous>, transform_indices = @transform_2, window_bounds = array<i64: 1, 128>}, {pipeline_mode = #tpu.pipeline_mode<synchronous>, transform_indices = @transform_3, window_bounds = array<i64: 1, 128>}, {pipeline_mode = #tpu.pipeline_mode<synchronous>, transform_indices = @transform_4, window_bounds = array<i64: 4, 128, 128>}, {pipeline_mode = #tpu.pipeline_mode<synchronous>, transform_indices = @transform_5, window_bounds = array<i64: 1, 128>}, {pipeline_mode = #tpu.pipeline_mode<synchronous>, transform_indices = @transform_6, window_bounds = array<i64: 1, 128>}, {pipeline_mode = #tpu.pipeline_mode<synchronous>, transform_indices = @transform_7, window_bounds = array<i64: 4, 128, 256>}, {pipeline_mode = #tpu.pipeline_mode<synchronous>, transform_indices = @transform_8, window_bounds = array<i64: 1, 256>}, {pipeline_mode = #tpu.pipeline_mode<synchronous>, transform_indices = @transform_9, window_bounds = array<i64: 1, 256>}, {pipeline_mode = #tpu.pipeline_mode<synchronous>, transform_indices = @transform_10, window_bounds = array<i64: 8, 256, 128>}, {pipeline_mode = #tpu.pipeline_mode<synchronous>, transform_indices = @transform_11, window_bounds = array<i64: 1, 128>}, {transform_indices = @transform_12, window_bounds = array<i64: 16, 128>}]} {
    %c0 = arith.constant 0 : index
    %c0_0 = arith.constant 0 : index
    %0 = vector.load %arg1[%c0, %c0_0] : memref<512x128xbf16, #tpu.memory_space<vmem>>, vector<512x128xbf16>
    %c0_1 = arith.constant 0 : index
    %c0_2 = arith.constant 0 : index
    %1 = vector.load %arg2[%c0_1, %c0_2] : memref<128x128xbf16, #tpu.memory_space<vmem>>, vector<128x128xbf16>
    %cst = arith.constant dense<0.000000e+00> : vector<512x128xf32>
    %2 = tpu.matmul %0, %1, %cst {dimension_numbers = #tpu.dot_dimension_numbers<[1], [0], [0], [1], [0, 0, 1, 1], [], []>} : vector<512x128xbf16>, vector<128x128xbf16>, vector<512x128xf32> -> vector<512x128xf32>
    %c0_3 = arith.constant 0 : index
    %c0_4 = arith.constant 0 : index
    %3 = vector.load %arg3[%c0_3, %c0_4] : memref<1x128xf32, #tpu.memory_space<vmem>>, vector<1x128xf32>
    %4 = vector.broadcast %3 : vector<1x128xf32> to vector<512x128xf32>
    %5 = arith.mulf %2, %4 : vector<512x128xf32>
    %c0_5 = arith.constant 0 : index
    %c0_6 = arith.constant 0 : index
    %6 = vector.load %arg4[%c0_5, %c0_6] : memref<1x128xf32, #tpu.memory_space<vmem>>, vector<1x128xf32>
    %7 = vector.broadcast %6 : vector<1x128xf32> to vector<512x128xf32>
    %8 = arith.addf %5, %7 : vector<512x128xf32>
    %cst_7 = arith.constant 0.000000e+00 : f32
    %9 = vector.broadcast %cst_7 : f32 to vector<512x128xf32>
    %10 = arith.maximumf %8, %9 : vector<512x128xf32>
    %11 = arith.truncf %10 : vector<512x128xf32> to vector<512x128xbf16>
    %12 = vector.shape_cast %11 : vector<512x128xbf16> to vector<16x32x128xbf16>
    %13 = vector.extract_strided_slice %12 {offsets = [0, 0, 0], sizes = [16, 8, 128], strides = [1, 1, 1]} : vector<16x32x128xbf16> to vector<16x8x128xbf16>
    %14 = vector.extract_strided_slice %12 {offsets = [0, 8, 0], sizes = [16, 8, 128], strides = [1, 1, 1]} : vector<16x32x128xbf16> to vector<16x8x128xbf16>
    %15 = vector.extract_strided_slice %12 {offsets = [0, 16, 0], sizes = [16, 8, 128], strides = [1, 1, 1]} : vector<16x32x128xbf16> to vector<16x8x128xbf16>
    %16 = vector.extract_strided_slice %12 {offsets = [0, 24, 0], sizes = [16, 8, 128], strides = [1, 1, 1]} : vector<16x32x128xbf16> to vector<16x8x128xbf16>
    %cst_8 = arith.constant 0.000000e+00 : bf16
    %17 = vector.broadcast %cst_8 : bf16 to vector<16x1x128xbf16>
    %18 = vector.extract_strided_slice %16 {offsets = [0, 0, 0], sizes = [16, 7, 128], strides = [1, 1, 1]} : vector<16x8x128xbf16> to vector<16x7x128xbf16>
    %19 = tpu.concatenate %17, %18 in 1 : vector<16x1x128xbf16>, vector<16x7x128xbf16> -> vector<16x8x128xbf16>
    %20 = tpu.concatenate %19, %15 in 1 : vector<16x8x128xbf16>, vector<16x8x128xbf16> -> vector<16x16x128xbf16>
    %21 = vector.shape_cast %20 : vector<16x16x128xbf16> to vector<256x128xbf16>
    %22 = vector.extract_strided_slice %12 {offsets = [0, 0, 0], sizes = [16, 16, 128], strides = [1, 1, 1]} : vector<16x32x128xbf16> to vector<16x16x128xbf16>
    %23 = vector.shape_cast %22 : vector<16x16x128xbf16> to vector<256x128xbf16>
    %24 = vector.extract_strided_slice %12 {offsets = [0, 16, 0], sizes = [16, 16, 128], strides = [1, 1, 1]} : vector<16x32x128xbf16> to vector<16x16x128xbf16>
    %25 = vector.shape_cast %24 : vector<16x16x128xbf16> to vector<256x128xbf16>
    %cst_9 = arith.constant 0.000000e+00 : bf16
    %26 = vector.broadcast %cst_9 : bf16 to vector<16x1x128xbf16>
    %27 = vector.extract_strided_slice %13 {offsets = [0, 1, 0], sizes = [16, 7, 128], strides = [1, 1, 1]} : vector<16x8x128xbf16> to vector<16x7x128xbf16>
    %28 = tpu.concatenate %27, %26 in 1 : vector<16x7x128xbf16>, vector<16x1x128xbf16> -> vector<16x8x128xbf16>
    %29 = tpu.concatenate %14, %28 in 1 : vector<16x8x128xbf16>, vector<16x8x128xbf16> -> vector<16x16x128xbf16>
    %30 = vector.shape_cast %29 : vector<16x16x128xbf16> to vector<256x128xbf16>
    %c0_10 = arith.constant 0 : index
    %c0_11 = arith.constant 0 : index
    %c0_12 = arith.constant 0 : index
    %31 = vector.load %arg5[%c0_10, %c0_11, %c0_12] : memref<4x128x128xbf16, #tpu.memory_space<vmem>>, vector<1x128x128xbf16>
    %32 = vector.shape_cast %31 : vector<1x128x128xbf16> to vector<128x128xbf16>
    %cst_13 = arith.constant dense<0.000000e+00> : vector<256x128xf32>
    %33 = tpu.matmul %21, %32, %cst_13 {dimension_numbers = #tpu.dot_dimension_numbers<[1], [0], [0], [1], [0, 0, 1, 1], [], []>} : vector<256x128xbf16>, vector<128x128xbf16>, vector<256x128xf32> -> vector<256x128xf32>
    %c1 = arith.constant 1 : index
    %c0_14 = arith.constant 0 : index
    %c0_15 = arith.constant 0 : index
    %34 = vector.load %arg5[%c1, %c0_14, %c0_15] : memref<4x128x128xbf16, #tpu.memory_space<vmem>>, vector<1x128x128xbf16>
    %35 = vector.shape_cast %34 : vector<1x128x128xbf16> to vector<128x128xbf16>
    %cst_16 = arith.constant dense<0.000000e+00> : vector<256x128xf32>
    %36 = tpu.matmul %23, %35, %cst_16 {dimension_numbers = #tpu.dot_dimension_numbers<[1], [0], [0], [1], [0, 0, 1, 1], [], []>} : vector<256x128xbf16>, vector<128x128xbf16>, vector<256x128xf32> -> vector<256x128xf32>
    %37 = arith.addf %33, %36 : vector<256x128xf32>
    %c2 = arith.constant 2 : index
    %c0_17 = arith.constant 0 : index
    %c0_18 = arith.constant 0 : index
    %38 = vector.load %arg5[%c2, %c0_17, %c0_18] : memref<4x128x128xbf16, #tpu.memory_space<vmem>>, vector<1x128x128xbf16>
    %39 = vector.shape_cast %38 : vector<1x128x128xbf16> to vector<128x128xbf16>
    %cst_19 = arith.constant dense<0.000000e+00> : vector<256x128xf32>
    %40 = tpu.matmul %25, %39, %cst_19 {dimension_numbers = #tpu.dot_dimension_numbers<[1], [0], [0], [1], [0, 0, 1, 1], [], []>} : vector<256x128xbf16>, vector<128x128xbf16>, vector<256x128xf32> -> vector<256x128xf32>
    %41 = arith.addf %37, %40 : vector<256x128xf32>
    %c3 = arith.constant 3 : index
    %c0_20 = arith.constant 0 : index
    %c0_21 = arith.constant 0 : index
    %42 = vector.load %arg5[%c3, %c0_20, %c0_21] : memref<4x128x128xbf16, #tpu.memory_space<vmem>>, vector<1x128x128xbf16>
    %43 = vector.shape_cast %42 : vector<1x128x128xbf16> to vector<128x128xbf16>
    %cst_22 = arith.constant dense<0.000000e+00> : vector<256x128xf32>
    %44 = tpu.matmul %30, %43, %cst_22 {dimension_numbers = #tpu.dot_dimension_numbers<[1], [0], [0], [1], [0, 0, 1, 1], [], []>} : vector<256x128xbf16>, vector<128x128xbf16>, vector<256x128xf32> -> vector<256x128xf32>
    %45 = arith.addf %41, %44 : vector<256x128xf32>
    %c0_23 = arith.constant 0 : index
    %c0_24 = arith.constant 0 : index
    %46 = vector.load %arg6[%c0_23, %c0_24] : memref<1x128xf32, #tpu.memory_space<vmem>>, vector<1x128xf32>
    %47 = vector.broadcast %46 : vector<1x128xf32> to vector<256x128xf32>
    %48 = arith.mulf %45, %47 : vector<256x128xf32>
    %c0_25 = arith.constant 0 : index
    %c0_26 = arith.constant 0 : index
    %49 = vector.load %arg7[%c0_25, %c0_26] : memref<1x128xf32, #tpu.memory_space<vmem>>, vector<1x128xf32>
    %50 = vector.broadcast %49 : vector<1x128xf32> to vector<256x128xf32>
    %51 = arith.addf %48, %50 : vector<256x128xf32>
    %cst_27 = arith.constant 0.000000e+00 : f32
    %52 = vector.broadcast %cst_27 : f32 to vector<256x128xf32>
    %53 = arith.maximumf %51, %52 : vector<256x128xf32>
    %54 = arith.truncf %53 : vector<256x128xf32> to vector<256x128xbf16>
    %55 = vector.shape_cast %54 : vector<256x128xbf16> to vector<16x16x128xbf16>
    %56 = vector.extract_strided_slice %55 {offsets = [0, 0, 0], sizes = [16, 8, 128], strides = [1, 1, 1]} : vector<16x16x128xbf16> to vector<16x8x128xbf16>
    %57 = vector.extract_strided_slice %55 {offsets = [0, 8, 0], sizes = [16, 8, 128], strides = [1, 1, 1]} : vector<16x16x128xbf16> to vector<16x8x128xbf16>
    %cst_28 = arith.constant 0.000000e+00 : bf16
    %58 = vector.broadcast %cst_28 : bf16 to vector<16x1x128xbf16>
    %59 = vector.extract_strided_slice %57 {offsets = [0, 0, 0], sizes = [16, 7, 128], strides = [1, 1, 1]} : vector<16x8x128xbf16> to vector<16x7x128xbf16>
    %60 = tpu.concatenate %58, %59 in 1 : vector<16x1x128xbf16>, vector<16x7x128xbf16> -> vector<16x8x128xbf16>
    %61 = vector.shape_cast %60 : vector<16x8x128xbf16> to vector<128x128xbf16>
    %62 = vector.shape_cast %56 : vector<16x8x128xbf16> to vector<128x128xbf16>
    %63 = vector.shape_cast %57 : vector<16x8x128xbf16> to vector<128x128xbf16>
    %cst_29 = arith.constant 0.000000e+00 : bf16
    %64 = vector.broadcast %cst_29 : bf16 to vector<16x1x128xbf16>
    %65 = vector.extract_strided_slice %56 {offsets = [0, 1, 0], sizes = [16, 7, 128], strides = [1, 1, 1]} : vector<16x8x128xbf16> to vector<16x7x128xbf16>
    %66 = tpu.concatenate %65, %64 in 1 : vector<16x7x128xbf16>, vector<16x1x128xbf16> -> vector<16x8x128xbf16>
    %67 = vector.shape_cast %66 : vector<16x8x128xbf16> to vector<128x128xbf16>
    %c0_30 = arith.constant 0 : index
    %c0_31 = arith.constant 0 : index
    %c0_32 = arith.constant 0 : index
    %68 = vector.load %arg8[%c0_30, %c0_31, %c0_32] : memref<4x128x256xbf16, #tpu.memory_space<vmem>>, vector<1x128x256xbf16>
    %69 = vector.shape_cast %68 : vector<1x128x256xbf16> to vector<128x256xbf16>
    %cst_33 = arith.constant dense<0.000000e+00> : vector<128x256xf32>
    %70 = tpu.matmul %61, %69, %cst_33 {dimension_numbers = #tpu.dot_dimension_numbers<[1], [0], [0], [1], [0, 0, 1, 1], [], []>} : vector<128x128xbf16>, vector<128x256xbf16>, vector<128x256xf32> -> vector<128x256xf32>
    %c1_34 = arith.constant 1 : index
    %c0_35 = arith.constant 0 : index
    %c0_36 = arith.constant 0 : index
    %71 = vector.load %arg8[%c1_34, %c0_35, %c0_36] : memref<4x128x256xbf16, #tpu.memory_space<vmem>>, vector<1x128x256xbf16>
    %72 = vector.shape_cast %71 : vector<1x128x256xbf16> to vector<128x256xbf16>
    %cst_37 = arith.constant dense<0.000000e+00> : vector<128x256xf32>
    %73 = tpu.matmul %62, %72, %cst_37 {dimension_numbers = #tpu.dot_dimension_numbers<[1], [0], [0], [1], [0, 0, 1, 1], [], []>} : vector<128x128xbf16>, vector<128x256xbf16>, vector<128x256xf32> -> vector<128x256xf32>
    %74 = arith.addf %70, %73 : vector<128x256xf32>
    %c2_38 = arith.constant 2 : index
    %c0_39 = arith.constant 0 : index
    %c0_40 = arith.constant 0 : index
    %75 = vector.load %arg8[%c2_38, %c0_39, %c0_40] : memref<4x128x256xbf16, #tpu.memory_space<vmem>>, vector<1x128x256xbf16>
    %76 = vector.shape_cast %75 : vector<1x128x256xbf16> to vector<128x256xbf16>
    %cst_41 = arith.constant dense<0.000000e+00> : vector<128x256xf32>
    %77 = tpu.matmul %63, %76, %cst_41 {dimension_numbers = #tpu.dot_dimension_numbers<[1], [0], [0], [1], [0, 0, 1, 1], [], []>} : vector<128x128xbf16>, vector<128x256xbf16>, vector<128x256xf32> -> vector<128x256xf32>
    %78 = arith.addf %74, %77 : vector<128x256xf32>
    %c3_42 = arith.constant 3 : index
    %c0_43 = arith.constant 0 : index
    %c0_44 = arith.constant 0 : index
    %79 = vector.load %arg8[%c3_42, %c0_43, %c0_44] : memref<4x128x256xbf16, #tpu.memory_space<vmem>>, vector<1x128x256xbf16>
    %80 = vector.shape_cast %79 : vector<1x128x256xbf16> to vector<128x256xbf16>
    %cst_45 = arith.constant dense<0.000000e+00> : vector<128x256xf32>
    %81 = tpu.matmul %67, %80, %cst_45 {dimension_numbers = #tpu.dot_dimension_numbers<[1], [0], [0], [1], [0, 0, 1, 1], [], []>} : vector<128x128xbf16>, vector<128x256xbf16>, vector<128x256xf32> -> vector<128x256xf32>
    %82 = arith.addf %78, %81 : vector<128x256xf32>
    %c0_46 = arith.constant 0 : index
    %c0_47 = arith.constant 0 : index
    %83 = vector.load %arg9[%c0_46, %c0_47] : memref<1x256xf32, #tpu.memory_space<vmem>>, vector<1x256xf32>
    %84 = vector.broadcast %83 : vector<1x256xf32> to vector<128x256xf32>
    %85 = arith.mulf %82, %84 : vector<128x256xf32>
    %c0_48 = arith.constant 0 : index
    %c0_49 = arith.constant 0 : index
    %86 = vector.load %arg10[%c0_48, %c0_49] : memref<1x256xf32, #tpu.memory_space<vmem>>, vector<1x256xf32>
    %87 = vector.broadcast %86 : vector<1x256xf32> to vector<128x256xf32>
    %88 = arith.addf %85, %87 : vector<128x256xf32>
    %cst_50 = arith.constant 0.000000e+00 : f32
    %89 = vector.broadcast %cst_50 : f32 to vector<128x256xf32>
    %90 = arith.maximumf %88, %89 : vector<128x256xf32>
    %91 = arith.truncf %90 : vector<128x256xf32> to vector<128x256xbf16>
    %92 = vector.shape_cast %91 : vector<128x256xbf16> to vector<16x8x256xbf16>
    %93 = vector.extract_strided_slice %92 {offsets = [0, 0, 0], sizes = [16, 1, 256], strides = [1, 1, 1]} : vector<16x8x256xbf16> to vector<16x1x256xbf16>
    %94 = vector.shape_cast %93 : vector<16x1x256xbf16> to vector<16x256xbf16>
    %c0_51 = arith.constant 0 : index
    %c0_52 = arith.constant 0 : index
    %c0_53 = arith.constant 0 : index
    %95 = vector.load %arg11[%c0_51, %c0_52, %c0_53] : memref<8x256x128xbf16, #tpu.memory_space<vmem>>, vector<1x256x128xbf16>
    %96 = vector.shape_cast %95 : vector<1x256x128xbf16> to vector<256x128xbf16>
    %cst_54 = arith.constant dense<0.000000e+00> : vector<16x128xf32>
    %97 = tpu.matmul %94, %96, %cst_54 {dimension_numbers = #tpu.dot_dimension_numbers<[1], [0], [0], [1], [0, 0, 1, 1], [], []>} : vector<16x256xbf16>, vector<256x128xbf16>, vector<16x128xf32> -> vector<16x128xf32>
    %98 = vector.extract_strided_slice %92 {offsets = [0, 1, 0], sizes = [16, 1, 256], strides = [1, 1, 1]} : vector<16x8x256xbf16> to vector<16x1x256xbf16>
    %99 = vector.shape_cast %98 : vector<16x1x256xbf16> to vector<16x256xbf16>
    %c1_55 = arith.constant 1 : index
    %c0_56 = arith.constant 0 : index
    %c0_57 = arith.constant 0 : index
    %100 = vector.load %arg11[%c1_55, %c0_56, %c0_57] : memref<8x256x128xbf16, #tpu.memory_space<vmem>>, vector<1x256x128xbf16>
    %101 = vector.shape_cast %100 : vector<1x256x128xbf16> to vector<256x128xbf16>
    %cst_58 = arith.constant dense<0.000000e+00> : vector<16x128xf32>
    %102 = tpu.matmul %99, %101, %cst_58 {dimension_numbers = #tpu.dot_dimension_numbers<[1], [0], [0], [1], [0, 0, 1, 1], [], []>} : vector<16x256xbf16>, vector<256x128xbf16>, vector<16x128xf32> -> vector<16x128xf32>
    %103 = arith.addf %97, %102 : vector<16x128xf32>
    %104 = vector.extract_strided_slice %92 {offsets = [0, 2, 0], sizes = [16, 1, 256], strides = [1, 1, 1]} : vector<16x8x256xbf16> to vector<16x1x256xbf16>
    %105 = vector.shape_cast %104 : vector<16x1x256xbf16> to vector<16x256xbf16>
    %c2_59 = arith.constant 2 : index
    %c0_60 = arith.constant 0 : index
    %c0_61 = arith.constant 0 : index
    %106 = vector.load %arg11[%c2_59, %c0_60, %c0_61] : memref<8x256x128xbf16, #tpu.memory_space<vmem>>, vector<1x256x128xbf16>
    %107 = vector.shape_cast %106 : vector<1x256x128xbf16> to vector<256x128xbf16>
    %cst_62 = arith.constant dense<0.000000e+00> : vector<16x128xf32>
    %108 = tpu.matmul %105, %107, %cst_62 {dimension_numbers = #tpu.dot_dimension_numbers<[1], [0], [0], [1], [0, 0, 1, 1], [], []>} : vector<16x256xbf16>, vector<256x128xbf16>, vector<16x128xf32> -> vector<16x128xf32>
    %109 = arith.addf %103, %108 : vector<16x128xf32>
    %110 = vector.extract_strided_slice %92 {offsets = [0, 3, 0], sizes = [16, 1, 256], strides = [1, 1, 1]} : vector<16x8x256xbf16> to vector<16x1x256xbf16>
    %111 = vector.shape_cast %110 : vector<16x1x256xbf16> to vector<16x256xbf16>
    %c3_63 = arith.constant 3 : index
    %c0_64 = arith.constant 0 : index
    %c0_65 = arith.constant 0 : index
    %112 = vector.load %arg11[%c3_63, %c0_64, %c0_65] : memref<8x256x128xbf16, #tpu.memory_space<vmem>>, vector<1x256x128xbf16>
    %113 = vector.shape_cast %112 : vector<1x256x128xbf16> to vector<256x128xbf16>
    %cst_66 = arith.constant dense<0.000000e+00> : vector<16x128xf32>
    %114 = tpu.matmul %111, %113, %cst_66 {dimension_numbers = #tpu.dot_dimension_numbers<[1], [0], [0], [1], [0, 0, 1, 1], [], []>} : vector<16x256xbf16>, vector<256x128xbf16>, vector<16x128xf32> -> vector<16x128xf32>
    %115 = arith.addf %109, %114 : vector<16x128xf32>
    %116 = vector.extract_strided_slice %92 {offsets = [0, 4, 0], sizes = [16, 1, 256], strides = [1, 1, 1]} : vector<16x8x256xbf16> to vector<16x1x256xbf16>
    %117 = vector.shape_cast %116 : vector<16x1x256xbf16> to vector<16x256xbf16>
    %c4 = arith.constant 4 : index
    %c0_67 = arith.constant 0 : index
    %c0_68 = arith.constant 0 : index
    %118 = vector.load %arg11[%c4, %c0_67, %c0_68] : memref<8x256x128xbf16, #tpu.memory_space<vmem>>, vector<1x256x128xbf16>
    %119 = vector.shape_cast %118 : vector<1x256x128xbf16> to vector<256x128xbf16>
    %cst_69 = arith.constant dense<0.000000e+00> : vector<16x128xf32>
    %120 = tpu.matmul %117, %119, %cst_69 {dimension_numbers = #tpu.dot_dimension_numbers<[1], [0], [0], [1], [0, 0, 1, 1], [], []>} : vector<16x256xbf16>, vector<256x128xbf16>, vector<16x128xf32> -> vector<16x128xf32>
    %121 = arith.addf %115, %120 : vector<16x128xf32>
    %122 = vector.extract_strided_slice %92 {offsets = [0, 5, 0], sizes = [16, 1, 256], strides = [1, 1, 1]} : vector<16x8x256xbf16> to vector<16x1x256xbf16>
    %123 = vector.shape_cast %122 : vector<16x1x256xbf16> to vector<16x256xbf16>
    %c5 = arith.constant 5 : index
    %c0_70 = arith.constant 0 : index
    %c0_71 = arith.constant 0 : index
    %124 = vector.load %arg11[%c5, %c0_70, %c0_71] : memref<8x256x128xbf16, #tpu.memory_space<vmem>>, vector<1x256x128xbf16>
    %125 = vector.shape_cast %124 : vector<1x256x128xbf16> to vector<256x128xbf16>
    %cst_72 = arith.constant dense<0.000000e+00> : vector<16x128xf32>
    %126 = tpu.matmul %123, %125, %cst_72 {dimension_numbers = #tpu.dot_dimension_numbers<[1], [0], [0], [1], [0, 0, 1, 1], [], []>} : vector<16x256xbf16>, vector<256x128xbf16>, vector<16x128xf32> -> vector<16x128xf32>
    %127 = arith.addf %121, %126 : vector<16x128xf32>
    %128 = vector.extract_strided_slice %92 {offsets = [0, 6, 0], sizes = [16, 1, 256], strides = [1, 1, 1]} : vector<16x8x256xbf16> to vector<16x1x256xbf16>
    %129 = vector.shape_cast %128 : vector<16x1x256xbf16> to vector<16x256xbf16>
    %c6 = arith.constant 6 : index
    %c0_73 = arith.constant 0 : index
    %c0_74 = arith.constant 0 : index
    %130 = vector.load %arg11[%c6, %c0_73, %c0_74] : memref<8x256x128xbf16, #tpu.memory_space<vmem>>, vector<1x256x128xbf16>
    %131 = vector.shape_cast %130 : vector<1x256x128xbf16> to vector<256x128xbf16>
    %cst_75 = arith.constant dense<0.000000e+00> : vector<16x128xf32>
    %132 = tpu.matmul %129, %131, %cst_75 {dimension_numbers = #tpu.dot_dimension_numbers<[1], [0], [0], [1], [0, 0, 1, 1], [], []>} : vector<16x256xbf16>, vector<256x128xbf16>, vector<16x128xf32> -> vector<16x128xf32>
    %133 = arith.addf %127, %132 : vector<16x128xf32>
    %134 = vector.extract_strided_slice %92 {offsets = [0, 7, 0], sizes = [16, 1, 256], strides = [1, 1, 1]} : vector<16x8x256xbf16> to vector<16x1x256xbf16>
    %135 = vector.shape_cast %134 : vector<16x1x256xbf16> to vector<16x256xbf16>
    %c7 = arith.constant 7 : index
    %c0_76 = arith.constant 0 : index
    %c0_77 = arith.constant 0 : index
    %136 = vector.load %arg11[%c7, %c0_76, %c0_77] : memref<8x256x128xbf16, #tpu.memory_space<vmem>>, vector<1x256x128xbf16>
    %137 = vector.shape_cast %136 : vector<1x256x128xbf16> to vector<256x128xbf16>
    %cst_78 = arith.constant dense<0.000000e+00> : vector<16x128xf32>
    %138 = tpu.matmul %135, %137, %cst_78 {dimension_numbers = #tpu.dot_dimension_numbers<[1], [0], [0], [1], [0, 0, 1, 1], [], []>} : vector<16x256xbf16>, vector<256x128xbf16>, vector<16x128xf32> -> vector<16x128xf32>
    %139 = arith.addf %133, %138 : vector<16x128xf32>
    %c0_79 = arith.constant 0 : index
    %c0_80 = arith.constant 0 : index
    %140 = vector.load %arg12[%c0_79, %c0_80] : memref<1x128xf32, #tpu.memory_space<vmem>>, vector<1x128xf32>
    %141 = vector.broadcast %140 : vector<1x128xf32> to vector<16x128xf32>
    %142 = arith.addf %139, %141 : vector<16x128xf32>
    %c0_81 = arith.constant 0 : index
    %c0_82 = arith.constant 0 : index
    %143 = vector.load %arg13[%c0_81, %c0_82] : memref<16x128xf32, #tpu.memory_space<vmem>>, vector<16x128xf32>
    tpu.vector_store %arg13[%c0_81, %c0_82], %142 {strides = array<i32>} : memref<16x128xf32, #tpu.memory_space<vmem>>, vector<16x128xf32>,
    return
  }
  func.func @transform_0(%arg0: i32) -> (i32, i32) {
    %c0_i32 = arith.constant 0 : i32
    %c0_i32_0 = arith.constant 0 : i32
    return %arg0, %c0_i32 : i32, i32
  }
  func.func @transform_1(%arg0: i32) -> (i32, i32) {
    %c0_i32 = arith.constant 0 : i32
    %c0_i32_0 = arith.constant 0 : i32
    %c0_i32_1 = arith.constant 0 : i32
    return %c0_i32, %c0_i32_0 : i32, i32
  }
  func.func @transform_2(%arg0: i32) -> (i32, i32) {
    %c0_i32 = arith.constant 0 : i32
    %c0_i32_0 = arith.constant 0 : i32
    %c0_i32_1 = arith.constant 0 : i32
    return %c0_i32, %c0_i32_0 : i32, i32
  }
  func.func @transform_3(%arg0: i32) -> (i32, i32) {
    %c0_i32 = arith.constant 0 : i32
    %c0_i32_0 = arith.constant 0 : i32
    %c0_i32_1 = arith.constant 0 : i32
    return %c0_i32, %c0_i32_0 : i32, i32
  }
  func.func @transform_4(%arg0: i32) -> (i32, i32, i32) {
    %c0_i32 = arith.constant 0 : i32
    %c0_i32_0 = arith.constant 0 : i32
    %c0_i32_1 = arith.constant 0 : i32
    %c0_i32_2 = arith.constant 0 : i32
    return %c0_i32, %c0_i32_0, %c0_i32_1 : i32, i32, i32
  }
  func.func @transform_5(%arg0: i32) -> (i32, i32) {
    %c0_i32 = arith.constant 0 : i32
    %c0_i32_0 = arith.constant 0 : i32
    %c0_i32_1 = arith.constant 0 : i32
    return %c0_i32, %c0_i32_0 : i32, i32
  }
  func.func @transform_6(%arg0: i32) -> (i32, i32) {
    %c0_i32 = arith.constant 0 : i32
    %c0_i32_0 = arith.constant 0 : i32
    %c0_i32_1 = arith.constant 0 : i32
    return %c0_i32, %c0_i32_0 : i32, i32
  }
  func.func @transform_7(%arg0: i32) -> (i32, i32, i32) {
    %c0_i32 = arith.constant 0 : i32
    %c0_i32_0 = arith.constant 0 : i32
    %c0_i32_1 = arith.constant 0 : i32
    %c0_i32_2 = arith.constant 0 : i32
    return %c0_i32, %c0_i32_0, %c0_i32_1 : i32, i32, i32
  }
  func.func @transform_8(%arg0: i32) -> (i32, i32) {
    %c0_i32 = arith.constant 0 : i32
    %c0_i32_0 = arith.constant 0 : i32
    %c0_i32_1 = arith.constant 0 : i32
    return %c0_i32, %c0_i32_0 : i32, i32
  }
  func.func @transform_9(%arg0: i32) -> (i32, i32) {
    %c0_i32 = arith.constant 0 : i32
    %c0_i32_0 = arith.constant 0 : i32
    %c0_i32_1 = arith.constant 0 : i32
    return %c0_i32, %c0_i32_0 : i32, i32
  }
  func.func @transform_10(%arg0: i32) -> (i32, i32, i32) {
    %c0_i32 = arith.constant 0 : i32
    %c0_i32_0 = arith.constant 0 : i32
    %c0_i32_1 = arith.constant 0 : i32
    %c0_i32_2 = arith.constant 0 : i32
    return %c0_i32, %c0_i32_0, %c0_i32_1 : i32, i32, i32
  }
  func.func @transform_11(%arg0: i32) -> (i32, i32) {
    %c0_i32 = arith.constant 0 : i32
    %c0_i32_0 = arith.constant 0 : i32
    %c0_i32_1 = arith.constant 0 : i32
    return %c0_i32, %c0_i32_0 : i32, i32
  }
  func.func @transform_12(%arg0: i32) -> (i32, i32) {
    %c0_i32 = arith.constant 0 : i32
    %c0_i32_0 = arith.constant 0 : i32
    return %arg0, %c0_i32 : i32, i32
  }
}

</mosaic_0001>

<bundles_post_ra>
// kernel: tpu_custom_call.1
= control target key start
LH: loop header
LB: loop body
LE: loop exit
PB: predicated region body
PF: predicated region fallthrough
CT: control target
= control target key end

     0   :  { %s10497_s0 = inlined_call_operand.hbm [shape: bf16[1024,128], index: 0, kind: input, shape index: {}]   ;;  %s10498_s1 = inlined_call_operand.hbm [shape: bf16[128,128], index: 1, kind: input, shape index: {}]   ;;  %s10499_s2 = inlined_call_operand.vmem [shape: f32[1,128], index: 2, kind: input, shape index: {}]   ;;  %s10500_s3 = inlined_call_operand.hbm [shape: f32[1,128], index: 3, kind: input, shape index: {}]   ;;  %s10501_s4 = inlined_call_operand.hbm [shape: bf16[4,128,128], index: 4, kind: input, shape index: {}]   ;;  %s10502_s5 = inlined_call_operand.vmem [shape: f32[1,128], index: 5, kind: input, shape index: {}]   ;;  %s10503_s6 = inlined_call_operand.vmem [shape: f32[1,128], index: 6, kind: input, shape index: {}]   ;;  %s10504_s7 = inlined_call_operand.hbm [shape: bf16[4,128,256], index: 7, kind: input, shape index: {}]   ;;  %s10505_s8 = inlined_call_operand.vmem [shape: f32[1,256], index: 8, kind: input, shape index: {}]   ;;  %s10506_s9 = inlined_call_operand.vmem [shape: f32[1,256], index: 9, kind: input, shape index: {}]   ;;  %s10507_s10 = inlined_call_operand.hbm [shape: bf16[8,256,128], index: 10, kind: input, shape index: {}]   ;;  %s10508_s11 = inlined_call_operand.vmem [shape: f32[1,128], index: 11, kind: input, shape index: {}]   ;;  %s10509_s12 = inlined_call_operand.hbm [shape: f32[32,128], index: 12, kind: output, shape index: {}]  }
   0x1   :  { %10551 = sst [smem:[#allocation53_spill]] %s10498_s1 }
   0x2   :  { %10552 = sst [smem:[#allocation54_spill]] %s10500_s3 }
   0x3   :  { %10553 = sst [smem:[#allocation55_spill]] %s10501_s4 }
   0x4   :  { %10554 = sst [smem:[#allocation56_spill]] %s10504_s7 }
   0x5   :  { %10555 = sst [smem:[#allocation57_spill]] %s10507_s10 }
   0x6   :  { %17 = vsyncpa [#allocation3], 0 }
   0x7   :  { %19 = vsyncpa [#allocation3 + $0x1], 0 }
   0x8   :  { %20 = vsyncpa [#allocation6], 0 }
   0x9   :  { %21 = vsyncpa [#allocation9], 0 }
   0xa   :  { %22 = vsyncpa [#allocation12], 0 }
   0xb   :  { %23 = vsyncpa [#allocation4], 0 }
   0xc   :  { %25 = vsyncpa [#allocation4 + $0x1], 0  ;;  %s8242_s21 = smov 0   ;;  %s8244_s22 = smov 0  }
   0xd   :  { %s8246_s23 = smov 0   ;;  %s8248_s24 = smov 0  }
   0xe LB: > { %10556 = sst [smem:[#allocation19_spill]] %s8157_s23  ;;  %s8163_s25 = smov [#allocation5]   ;;  %s8161_s24 = sphi %s8248_s24, %s10697_s24   ;;  %s8157_s23 = sphi %s8246_s23, %s10694_s23   ;;  %s8153_s22 = sphi %s8244_s22, %s10696_s22   ;;  %s8149_s21 = sphi %s8242_s21, %s10695_s21  }
   0xf   : > { %s331_s26 = sshll.u32 %s8163_s25, 4  ;;  %s8263_s27 = sadd.s32 4294967295, %s8161_s24   ;;  %s332_s26 = int_to_ptr.vmem [resolvable:$true] %s331_s26 }
  0x10   : > { %p6537_p0 = scmp.ge.s32.totalorder %s8161_s24, 1  ;;  %p10513_p1 = scmp.eq.s32.totalorder %s8263_s27, 0 }
  0x11   : > { %p319_p2 = scmp.lt.s32.totalorder %s8161_s24, 3  ;;  %s8164_s29 = smov [#allocation8]  }
  0x12   : > { %s358_s30 = sshll.u32 %s8164_s29, 4  ;;  %s8165_s14 = smov [#allocation7]   ;;  %s8281_s30 = int_to_ptr.vmem [resolvable:$true] %s358_s30 }
  0x13   : > { %p8268_p3 = pnand %p6537_p0, %p319_p2  ;;  %s348_s15 = sshll.u32 %s8165_s14, 4  ;;  %s8283_s15 = int_to_ptr.vmem [resolvable:$true] %s348_s15 }
  0x14   : > { %s7938_s17 = scalar_lea.vmem %s332_s26, 1024  ;;  %p7946_p11 = scmp.lt.s32.totalorder %s332_s26, %s332_s26 }
  0x15   : > { %s10557_s28 = scalar_select %p8268_p3, 1, 0 }
  0x16   : > { %p7551_p5 = pneg %p8268_p3  ;;  %p7939_p8 = scmp.ne.s32.totalorder %s332_s26, %s7938_s17 }
  0x17   : > { %p7947_p12 = scmp.lt.s32.totalorder %s7938_s17, %s7938_s17 }
  0x18   : > { %p8277_p6 = pnand %p7551_p5, %p10513_p1 }
  0x19   : > { %p7948_p13 = por %p7947_p12, %p7946_p11 }
  0x1a   : > { %p8287_p7 = pneg %p8277_p6 }
  0x1c   : > { %p7941_p9 = pnand %p7939_p8, %p8287_p7 }
  0x1e   : > { %p7942_p10 = pneg %p7941_p9 }
  0x20   : > { %p7949_p0 = pnand %p7948_p13, %p7942_p10 }
  0x22   : > { %7952 = shalt.err (!%p7949_p0)
}
  0x23   : > { %s10510_s18 = smov 64   ;;  %s10512_s19 = smov 4  }
  0x24   : > { %s10560_s1 = sld [smem:[#allocation53_spill]]  ;;  %s7964_s29 = scalar_lea.vmem %s8281_s30, 4096 }
  0x25   : > { %p7965_p2 = scmp.ne.s32.totalorder %s8281_s30, %s7964_s29  ;;  %p7972_p9 = scmp.lt.s32.totalorder %s8281_s30, %s8281_s30 }
  0x26   : > { %p7973_p10 = scmp.lt.s32.totalorder %s7964_s29, %s7964_s29 }
  0x27   : > { %p7967_p5 = pnand %p7965_p2, %p8287_p7 }
  0x28   : > { %p7974_p11 = por %p7973_p10, %p7972_p9 }
  0x29   : > { %p7968_p8 = pneg %p7967_p5 }
  0x2a   : > { %7554 = dma.hbm_to_vmem [thread:$0]  (!%p8277_p6), %s10560_s1, 1024, %s332_s26, [#allocation6], %s10510_s18, %s10510_s18, %s10512_s19  }
  0x2b   : > { %p7975_p12 = pnand %p7974_p11, %p7968_p8 }
  0x2d   : > { %7978 = shalt.err (!%p7975_p12)
}
  0x2e   : > { %s10561_s4 = sld [smem:[#allocation55_spill]]  ;;  %s7990_s26 = scalar_lea.vmem %s8283_s15, 16 }
  0x2f   : > { %p7991_p13 = scmp.ne.s32.totalorder %s8283_s15, %s7990_s26  ;;  %s7997_s20 = scalar_lea.vmem %s8283_s15, 32 }
  0x30   : > { %p7998_p5 = scmp.lt.s32.totalorder %s8283_s15, %s8283_s15  ;;  %p7999_p8 = scmp.lt.s32.totalorder %s7997_s20, %s7990_s26 }
  0x31   : > { %p7993_p0 = pnand %p7991_p13, %p8287_p7 }
  0x32   : > { %p8000_p9 = por %p7999_p8, %p7998_p5 }
  0x33   : > { %p7994_p2 = pneg %p7993_p0 }
  0x34   : > { %7560 = dma.hbm_to_vmem [thread:$0]  (!%p8277_p6), %s10561_s4, 4096, %s8281_s30, [#allocation9], %s10510_s18, %s10510_s18, %s10512_s19  }
  0x35   : > { %p8001_p10 = pnand %p8000_p9, %p7994_p2 }
  0x37   : > { %8004 = shalt.err (!%p8001_p10)
}
  0x38   : > { %s10562_s3 = sld [smem:[#allocation54_spill]]  ;;  %s8168_s30 = smov [#allocation10]  }
  0x39   : > { %s377_s14 = sshll.u32 %s8168_s30, 4  ;;  %s378_s14 = int_to_ptr.vmem [resolvable:$true] %s377_s14 }
  0x3a   : > { %s8016_s17 = scalar_lea.vmem %s378_s14, 8192  ;;  %p8024_p0 = scmp.lt.s32.totalorder %s378_s14, %s378_s14 }
  0x3b   : > { %p8017_p11 = scmp.ne.s32.totalorder %s378_s14, %s8016_s17  ;;  %p8025_p5 = scmp.lt.s32.totalorder %s8016_s17, %s8016_s17 }
  0x3d   : > { %p8019_p12 = pnand %p8017_p11, %p8287_p7  ;;  %p8026_p2 = por %p8025_p5, %p8024_p0 }
  0x3e   : > { %7557 = dma.hbm_to_vmem [thread:$0]  (!%p8277_p6), %s10562_s3, 16, %s8283_s15, [#allocation6]  }
  0x3f   : > { %p8020_p13 = pneg %p8019_p12 }
  0x41   : > { %p8027_p8 = pnand %p8026_p2, %p8020_p13 }
  0x43   : > { %8030 = shalt.err (!%p8027_p8)
}
  0x44   : > { %s8169_s26 = smov 128   ;;  %s8170_s20 = smov 8  }
  0x45   : > { %s10563_s7 = sld [smem:[#allocation56_spill]]  ;;  %s8171_s29 = smov [#allocation11]  }
  0x46   : > { %s396_s30 = sshll.u32 %s8171_s29, 4  ;;  %s397_s30 = int_to_ptr.vmem [resolvable:$true] %s396_s30 }
  0x47   : > { %s8042_s18 = scalar_lea.vmem %s397_s30, 16384  ;;  %p8050_p12 = scmp.lt.s32.totalorder %s397_s30, %s397_s30 }
  0x48   : > { %p8043_p9 = scmp.ne.s32.totalorder %s397_s30, %s8042_s18  ;;  %p8051_p13 = scmp.lt.s32.totalorder %s8042_s18, %s8042_s18 }
  0x4a   : > { %p8045_p10 = pnand %p8043_p9, %p8287_p7  ;;  %p8052_p0 = por %p8051_p13, %p8050_p12 }
  0x4b   : > { %7563 = dma.hbm_to_vmem [thread:$0]  (!%p8277_p6), %s10563_s7, 8192, %s378_s14, [#allocation9], %s8169_s26, %s8169_s26, %s8170_s20  }
  0x4c   : > { %p8046_p11 = pneg %p8045_p10 }
  0x4e   : > { %p8053_p5 = pnand %p8052_p0, %p8046_p11 }
  0x50   : > { %8056 = shalt.err (!%p8053_p5)
}
  0x51   : > { %s10564_s17 = smov 64   ;;  %s10565_s10 = sld [smem:[#allocation57_spill]] }
  0x52   : > { %s6536_s13 = sadd.s32 4294967294, %s8161_s24   ;;  %s8348_s16 = sadd.s32 1, %s8161_s24  }
  0x53   : > { %s38_s18 = sadd.s32 1, %s8157_s23  ;;  %s35_s26 = ssub.s32 %s8161_s24, %s8348_s16 }
  0x54   : > { %p45_p7 = scmp.ne.s32.totalorder %s8157_s23, %s8153_s22  ;;  %p36_p2 = scmp.eq.s32.totalorder %s35_s26, 0 }
  0x55   : > { %p46_p8 = scmp.eq.s32.totalorder %s8161_s24, 0  ;;  %p51_p9 = scmp.ne.s32.totalorder %s8153_s22, %s8149_s21 }
  0x56   : > { %p306_p10 = scmp.eq.s32.totalorder %s8263_s27, 1  ;;  %p312_p13 = scmp.eq.s32.totalorder %s6536_s13, 1 }
  0x57   : > { %7566 = dma.hbm_to_vmem [thread:$0]  (!%p8277_p6), %s10565_s10, 16384, %s397_s30, [#allocation12], %s10564_s17, %s10564_s17, %s10512_s19  }
  0x58   : > { %s8360_s20 = scalar_select %p36_p2, %s8157_s23, %s38_s18  }
  0x59   : > { %p47_p11 = por %p46_p8, %p45_p7  ;;  %p8364_p12 = por %p10513_p1, %p51_p9 }
  0x5a   : > { %10566 = sst [smem:[#allocation20_spill]] %s8360_s20  ;;  %p8368_p6 = por %p306_p10, %p45_p7 }
  0x5b   : > { %s10567_s15 = scalar_select %p8364_p12, 1, 0 }
  0x5c   : > { %s10568_s29 = scalar_select %p8368_p6, 1, 0 }
  0x5d   : > { %p7580_p0 = scmp.lt.s32.totalorder %s8161_s24, 2  ;;  %s413_s30 = sand.u32 1, %s8157_s23  }
  0x5e   : > { %p8374_p5 = por %p312_p13, %p51_p9  ;;  %s6544_s14 = sshll.u32 %s413_s30, 8 }
  0x5f   : > { %s6893_s18 = sshll.u32 %s8161_s24, 12  ;;  %s417_s3 = scalar_lea.vmem [#allocation2], %s6544_s14 }
  0x60   : > { %s10569_s25 = scalar_select %p8374_p5, 1, 0 }
  0x61   : > { %s8382_s1 = scalar_lea.hbm %s10497_s0, %s6893_s18  ;;  %s424_s4 = sshll.u32 %s417_s3, 4  ;;  %s8388_s4 = int_to_ptr.vmem [resolvable:$true] %s424_s4 }
  0x62   : > { %p8384_p7 = pnand %p7580_p0, %p47_p11  ;;  %s8390_s7 = scalar_lea.sflag [#allocation3], %s413_s30 }
  0x63   : > { %s8057_s10 = scalar_lea.hbm %s8382_s1, 4096  ;;  %s8062_s14 = scalar_lea.hbm %s10497_s0, 8192 }
  0x64   : > { %p8058_p2 = scmp.ne.s32.totalorder %s8382_s1, %s8057_s10  ;;  %p8059_p8 = pneg %p8384_p7 }
  0x65   : > { %p8063_p11 = scmp.lt.s32.totalorder %s8382_s1, %s10497_s0  ;;  %p8064_p13 = scmp.lt.s32.totalorder %s8062_s14, %s8057_s10 }
  0x66   : > { %p8060_p9 = pnand %p8059_p8, %p8058_p2 }
  0x67   : > { %p8065_p0 = por %p8064_p13, %p8063_p11 }
  0x68   : > { %p8061_p10 = pneg %p8060_p9 }
  0x6a   : > { %p8066_p4 = pnand %p8065_p0, %p8061_p10 }
  0x6c   : > { %8069 = shalt.err (!%p8066_p4)
}
  0x6d   : > { %s8070_s30 = scalar_lea.vmem %s8388_s4, 4096  ;;  %s8172_s20 = smov [#allocation2]  }
  0x6e   : > { %p8071_p1 = scmp.ne.s32.totalorder %s8388_s4, %s8070_s30  ;;  %s8075_s23 = sshll.u32 %s8172_s20, 4  ;;  %s8076_s23 = int_to_ptr.vmem [resolvable:$false] %s8075_s23 }
  0x6f   : > { %s8077_s19 = scalar_lea.vmem %s8076_s23, 8192  ;;  %p8078_p9 = scmp.lt.s32.totalorder %s8388_s4, %s8076_s23 }
  0x70   : > { %p8073_p5 = pnand %p8071_p1, %p8059_p8  ;;  %p8079_p6 = scmp.lt.s32.totalorder %s8077_s19, %s8070_s30 }
  0x72   : > { %p8074_p2 = pneg %p8073_p5  ;;  %p8080_p12 = por %p8079_p6, %p8078_p9 }
  0x74   : > { %p8081_p3 = pnand %p8080_p12, %p8074_p2 }
  0x76   : > { %8084 = shalt.err (!%p8081_p3)
}
  0x77   : > { %s10571_s10 = smov 4   ;;  %p10572_p1 = scmp.ne.s32.totalorder %s10557_s28, 0 }
  0x78   : > { %7570 = dma.hbm_to_vmem [thread:$0]  (!%p8384_p7), %s8382_s1, 4096, %s8388_s4, %s8390_s7, %s10564_s17, %s10564_s17, %s10571_s10  }
  0x79   : > { %436 = sbr.rel (%p10572_p1) target bundleno = 1472 (0x5c0), region = 68 }
  0x7e   : > { %s8417_s20 = sand.u32 1, %s8153_s22   ;;  %p10573_p3 = scmp.ne.s32.totalorder %s10567_s15, 0 }
  0x7f   : > { %s6548_s23 = sshll.u32 %s8417_s20, 8  ;;  %s439_s18 = scalar_lea.sflag [#allocation3], %s8417_s20 }
  0x80   : > { %s8421_s14 = scalar_lea.vmem [#allocation2], %s6548_s23 }
  0x81   : > { %8128 = dma.done.wait (%p10573_p3), %s439_s18, 4096  }
  0x82   : > { %8130 = vsyncadd (%p10573_p3), %s439_s18, 4294963200  ;;  %p10574_p4 = scmp.eq.s32.totalorder %s8263_s27, 0 }
  0x84   : > { %8132 = dma.done.wait (%p10574_p4), [#allocation6], 1040   ;;  %p10575_p12 = pmov %p10574_p4 }
  0x85   : > { %p10576_p6 = pmov %p10574_p4 }
  0x86   : > { %8134 = vsyncadd (%p10575_p12), [#allocation6], 4294966256 }
  0x87   : > { %8136 = dma.done.wait (%p10576_p6), [#allocation9], 12288   ;;  %p10577_p5 = pmov %p10574_p4 }
  0x88   : > { %p10578_p7 = pmov %p10574_p4 }
  0x89   : > { %8138 = vsyncadd (%p10577_p5), [#allocation9], 4294955008 }
  0x8a   : > { %8140 = dma.done.wait (%p10578_p7), [#allocation12], 16384   ;;  %p10579_p8 = pmov %p10574_p4 }
  0x8b   : > { %v7631_v0 = vld [vmem:[#allocation5 + $0x38] sm:$0xff]   ;;  %v7632_v1 = vld [vmem:[#allocation5 + $0x30] sm:$0xff]   ;;  %v7633_v2 = vld [vmem:[#allocation5 + $0x28] sm:$0xff]   ;;  %vm1497_vm0 = vcmask 1040384   ;;  %vm1498_vm1 = vsmask.f32 256 }
  0x8c   : > { %8142 = vsyncadd (%p10579_p8), [#allocation12], 4294950912  ;;  %7255 = vmatprep.subr.bf16.mxu0 %v7631_v0  ;;  %v7634_v3 = vld [vmem:[#allocation5 + $0x20] sm:$0xff]   ;;  %v7635_v5 = vld [vmem:[#allocation5 + $0x18] sm:$0xff]   ;;  %vm1548_vm3 = vcmask 1043456   ;;  %vm4598_vm6 = vcmask 1041409  }
  0x8d   : > { %7256 = vmatpush3.bf16.msra.mxu0 %v7631_v0  ;;  %v7639_v4 = vld [vmem:[%s8421_s14] sm:$0xff]   ;;  %v7636_v6 = vld [vmem:[#allocation5 + $0x10] sm:$0xff]   ;;  %v7637_v7 = vld [vmem:[#allocation5 + $0x8] sm:$0xff]   ;;  %vm1742_vm4 = vsmask.f32 3328  ;;  %vm4601_vm7 = vcmask 1042434  }
  0x8e   : > { %7257 = vmatprep.subr.bf16.mxu0 %v7632_v1  ;;  %7271 = vmatprep.mubr.bf16.mxu0 %v7639_v4  ;;  %v7638_v8 = vld [vmem:[#allocation5] sm:$0xff]   ;;  %v7640_v9 = vld [vmem:[%s8421_s14 + $0x8] sm:$0xff]   ;;  %v7641_v10 = vld [vmem:[%s8421_s14 + $0x10] sm:$0xff]   ;;  %vm4604_vm8 = vcmask 1043459   ;;  %vm4607_vm9 = vcmask 1044484   ;;  %vm4610_vm10 = vcmask 1045509  }
  0x8f   : > { %v7642_v11 = vld [vmem:[%s8421_s14 + $0x18] sm:$0xff]   ;;  %v7643_v12 = vld [vmem:[%s8421_s14 + $0x20] sm:$0xff]   ;;  %v7644_v17 = vld [vmem:[%s8421_s14 + $0x28] sm:$0xff]   ;;  %vm4613_vm11 = vcmask 1046534   ;;  %vm4616_vm12 = vcmask 1047559   ;;  %s6554_s19 = sshll.u32 %s8417_s20, 4 }
  0x90   : > { %v7671_v13 = vld [vmem:[#allocation8 + $0xb8] sm:$0xff]   ;;  %v7673_v15 = vld [vmem:[#allocation8 + $0xb0] sm:$0xff]   ;;  %v7675_v18 = vld [vmem:[#allocation8 + $0xa8] sm:$0xff]   ;;  %s502_s18 = scalar_lea.vmem [#allocation13], %s6554_s19  ;;  %s6942_s1 = sshll.u32 %s8263_s27, 8 }
  0x91   : > { %7258 = vmatpush3.bf16.msra.mxu0 %v7632_v1  ;;  %v7672_v14 = vld [vmem:[#allocation8 + $0x78] sm:$0xff]   ;;  %v7674_v16 = vld [vmem:[#allocation8 + $0x70] sm:$0xff]   ;;  %v7676_v20 = vld [vmem:[#allocation8 + $0x68] sm:$0xff]   ;;  %s10454_s28 = scalar_lea.hbm %s10509_s12, %s6942_s1  ;;  %s6402_s17 = scalar_lea.sflag [#allocation4], %s8417_s20 }
  0x92   : > { %7259 = vmatprep.subr.bf16.mxu0 %v7633_v2  ;;  %7335 = vmatprep.subr.bf16.mxu1 %v7672_v14  ;;  %v7645_v19 = vld [vmem:[%s8421_s14 + $0x30] sm:$0xff]   ;;  %v7646_v21 = vld [vmem:[%s8421_s14 + $0x38] sm:$0xff]   ;;  %v7647_v22 = vld [vmem:[%s8421_s14 + $0x40] sm:$0xff]   ;;  %p10690_p11 = scmp.ne.s32.totalorder %s10568_s29, 0  ;;  %s8174_s27 = smov [#allocation13]  }
  0x93   : > { %7336 = vmatpush3.bf16.msra.mxu1 %v7672_v14  ;;  %v7648_v23 = vld [vmem:[%s8421_s14 + $0x48] sm:$0xff]   ;;  %v7649_v24 = vld [vmem:[%s8421_s14 + $0x50] sm:$0xff]   ;;  %v7650_v25 = vld [vmem:[%s8421_s14 + $0x58] sm:$0xff]   ;;  %s8089_s13 = sshll.u32 %s8174_s27, 4  ;;  %s8090_s13 = int_to_ptr.vmem [resolvable:$false] %s8089_s13 }
  0x94   : > { %7337 = vmatprep.subr.bf16.mxu1 %v7674_v16  ;;  %v7651_v26 = vld [vmem:[%s8421_s14 + $0x60] sm:$0xff]   ;;  %v7652_v27 = vld [vmem:[%s8421_s14 + $0x68] sm:$0xff]   ;;  %v7653_v28 = vld [vmem:[%s8421_s14 + $0x70] sm:$0xff]   ;;  %s8091_s3 = scalar_lea.vmem %s8090_s13, 512 }
  0x95   : > { %7260 = vmatpush3.bf16.msra.mxu0 %v7633_v2  ;;  %v7654_v29 = vld [vmem:[%s8421_s14 + $0x78] sm:$0xff]   ;;  %v7655_v30 = vld [vmem:[%s8421_s14 + $0x80] sm:$0xff]   ;;  %v7656_v31 = vld [vmem:[%s8421_s14 + $0x88] sm:$0xff]  }
  0x96   : > { %7261 = vmatprep.subr.bf16.mxu0 %v7634_v3  ;;  %v7657_v32 = vld [vmem:[%s8421_s14 + $0x90] sm:$0xff]   ;;  %v7677_v33 = vld [vmem:[#allocation8 + $0xa0] sm:$0xff]   ;;  %v7658_v35 = vld [vmem:[%s8421_s14 + $0x98] sm:$0xff]  }
  0x97   : > { %7338 = vmatpush3.bf16.msra.mxu1 %v7674_v16  ;;  %v7678_v34 = vld [vmem:[#allocation8 + $0x60] sm:$0xff]   ;;  %v7679_v37 = vld [vmem:[#allocation8 + $0x98] sm:$0xff]   ;;  %v7681_v39 = vld [vmem:[#allocation8 + $0x90] sm:$0xff]  }
  0x98   : > { %7339 = vmatprep.subr.bf16.mxu1 %v7676_v20  ;;  %v7659_v36 = vld [vmem:[%s8421_s14 + $0xa0] sm:$0xff]   ;;  %v7682_v40 = vld [vmem:[#allocation8 + $0x50] sm:$0xff]   ;;  %v7660_v41 = vld [vmem:[%s8421_s14 + $0xa8] sm:$0xff]  }
  0x99   : > { %7262 = vmatpush3.bf16.msra.mxu0 %v7634_v3  ;;  %v7680_v38 = vld [vmem:[#allocation8 + $0x58] sm:$0xff]   ;;  %v7661_v42 = vld [vmem:[%s8421_s14 + $0xb0] sm:$0xff]   ;;  %v7685_v45 = vld [vmem:[#allocation8 + $0x80] sm:$0xff]  }
  0x9a   : > { %7263 = vmatprep.subr.bf16.mxu0 %v7635_v5  ;;  %v7683_v43 = vld [vmem:[#allocation8 + $0x88] sm:$0xff]   ;;  %v7686_v46 = vld [vmem:[#allocation8 + $0x40] sm:$0xff]   ;;  %v7662_v47 = vld [vmem:[%s8421_s14 + $0xb8] sm:$0xff]  }
  0x9b   : > { %7340 = vmatpush3.bf16.msra.mxu1 %v7676_v20  ;;  %v7684_v44 = vld [vmem:[#allocation8 + $0x48] sm:$0xff]   ;;  %v7663_v48 = vld [vmem:[%s8421_s14 + $0xc0] sm:$0xff]   ;;  %v7666_v51 = vld [vmem:[%s8421_s14 + $0xd8] sm:$0xff]  }
  0x9c   : > { %7341 = vmatprep.subr.bf16.mxu1 %v7678_v34  ;;  %v7664_v49 = vld [vmem:[%s8421_s14 + $0xc8] sm:$0xff]   ;;  %v7665_v50 = vld [vmem:[%s8421_s14 + $0xd0] sm:$0xff]   ;;  %v7667_v52 = vld [vmem:[%s8421_s14 + $0xe0] sm:$0xff]  }
  0x9d   : > { %7264 = vmatpush3.bf16.msra.mxu0 %v7635_v5  ;;  %v7668_v53 = vld [vmem:[%s8421_s14 + $0xe8] sm:$0xff]   ;;  %v7669_v54 = vld [vmem:[%s8421_s14 + $0xf0] sm:$0xff]   ;;  %v7670_v55 = vld [vmem:[%s8421_s14 + $0xf8] sm:$0xff]   ;;  %s6415_s14 = sshll.u32 %s502_s18, 4  ;;  %s10449_s14 = int_to_ptr.vmem [resolvable:$true] %s6415_s14 }
  0x9e   : > { %7265 = vmatprep.subr.bf16.mxu0 %v7636_v6  ;;  %v7687_v56 = vld [vmem:[#allocation8 + $0x38] sm:$0xff]   ;;  %vm8705_vm2 = vmand %vm1497_vm0, %vm1498_vm1  ;;  %s8085_s15 = scalar_lea.vmem %s10449_s14, 256  ;;  %p8092_p2 = scmp.lt.s32.totalorder %s10449_s14, %s8090_s13 }
  0x9f   : > { %7342 = vmatpush3.bf16.msra.mxu1 %v7678_v34  ;;  %v8474_v57 = vld [vmem:[%s10499_s2] ss:$0 sm:$0xff]  ;;  %vm8805_vm5 = vmand %vm1548_vm3, %vm1742_vm4  ;;  %p8086_p10 = scmp.ne.s32.totalorder %s10449_s14, %s8085_s15  ;;  %p8093_p9 = scmp.lt.s32.totalorder %s8091_s3, %s8085_s15 }
  0xa0   : > { %7343 = vmatprep.subr.bf16.mxu1 %v7680_v38  ;;  %v8477_v60 = vld [vmem:[#allocation7] ss:$0 sm:$0xff] }
  0xa1   : > { %7266 = vmatpush3.bf16.msra.mxu0 %v7636_v6  ;;  %p8087_p13 = pnand %p8086_p10, %p10690_p11  ;;  %p8094_p1 = por %p8093_p9, %p8092_p2 }
  0xa2   : > { %7267 = vmatprep.subr.bf16.mxu0 %v7637_v7 }
  0xa3   : > { %7344 = vmatpush3.bf16.msra.mxu1 %v7680_v38  ;;  %v7688_v38 = vld [vmem:[#allocation8 + $0x30] sm:$0xff]   ;;  %p8088_p0 = pneg %p8087_p13 }
  0xa4   : > { %7345 = vmatprep.subr.bf16.mxu1 %v7682_v40 }
  0xa5   : > { %7268 = vmatpush3.bf16.msra.mxu0 %v7637_v7  ;;  %p8095_p3 = pnand %p8094_p1, %p8088_p0 }
  0xa6   : > { %7269 = vmatprep.subr.bf16.mxu0 %v7638_v8 }
  0xa7   : > { %7346 = vmatpush3.bf16.msra.mxu1 %v7682_v40 }
  0xa8   : > { %7347 = vmatprep.subr.bf16.mxu1 %v7684_v44 }
  0xa9   : > { %7270 = vmatpush3.bf16.msra.mxu0 %v7638_v8 }
  0xaa   : > { %7431 = vmatprep.subr.bf16.mxu0 %v7671_v13 }
  0xab   : > { %7348 = vmatpush3.bf16.msra.mxu1 %v7684_v44 }
  0xac   : > { %7272 = vmatmul.mubr.bf16.vlgmr.msra.gmra.mxu0 %v7640_v9  ;;  %7349 = vmatprep.subr.bf16.mxu1 %v7686_v46 }
  0xad   : > { %7275 = vmatprep.mubr.bf16.mxu0 %v7641_v10  ;;  %7432 = vmatpush3.bf16.msra.mxu0 %v7671_v13 }
  0xae   : > { %7433 = vmatprep.subr.bf16.mxu0 %v7673_v15 }
  0xaf   : > { %7350 = vmatpush3.bf16.msra.mxu1 %v7686_v46 }
  0xb0   : > { %7383 = vmatprep.subr.bf16.mxu1 %v7687_v56 }
  0xb1   : > { %7434 = vmatpush3.bf16.msra.mxu0 %v7673_v15 }
  0xb2   : > { %7435 = vmatprep.subr.bf16.mxu0 %v7675_v18 }
  0xb4   : > { %7276 = vmatmul.mubr.bf16.gmra.mxu0 %v7642_v11 }
  0xb5   : > { %7279 = vmatprep.mubr.bf16.mxu0 %v7643_v12  ;;  %7436 = vmatpush3.bf16.msra.mxu0 %v7675_v18 }
  0xb6   : > { %7437 = vmatprep.subr.bf16.mxu0 %v7677_v33 }
  0xb9   : > { %7438 = vmatpush3.bf16.msra.mxu0 %v7677_v33 }
  0xba   : > { %7439 = vmatprep.subr.bf16.mxu0 %v7679_v37 }
  0xbc   : > { %7280 = vmatmul.mubr.bf16.gmra.mxu0 %v7644_v17 }
  0xbd   : > { %7283 = vmatprep.mubr.bf16.mxu0 %v7645_v19  ;;  %7440 = vmatpush3.bf16.msra.mxu0 %v7679_v37 }
  0xbe   : > { %7441 = vmatprep.subr.bf16.mxu0 %v7681_v39 }
  0xc1   : > { %7442 = vmatpush3.bf16.msra.mxu0 %v7681_v39 }
  0xc2   : > { %7443 = vmatprep.subr.bf16.mxu0 %v7683_v43 }
  0xc4   : > { %7284 = vmatmul.mubr.bf16.gmra.mxu0 %v7646_v21 }
  0xc5   : > { %7287 = vmatprep.mubr.bf16.mxu0 %v7647_v22  ;;  %7444 = vmatpush3.bf16.msra.mxu0 %v7683_v43 }
  0xc6   : > { %7445 = vmatprep.subr.bf16.mxu0 %v7685_v45 }
  0xc9   : > { %7446 = vmatpush3.bf16.msra.mxu0 %v7685_v45 }
  0xcc   : > { %7288 = vmatmul.mubr.bf16.gmra.mxu0 %v7648_v23 }
  0xcd   : > { %7291 = vmatprep.mubr.bf16.mxu0 %v7649_v24 }
  0xd4   : > { %7292 = vmatmul.mubr.bf16.gmra.mxu0 %v7650_v25 }
  0xd5   : > { %7295 = vmatprep.mubr.bf16.mxu0 %v7651_v26 }
  0xdc   : > { %7296 = vmatmul.mubr.bf16.gmra.mxu0 %v7652_v27 }
  0xdd   : > { %7299 = vmatprep.mubr.bf16.mxu0 %v7653_v28 }
  0xe4   : > { %7300 = vmatmul.mubr.bf16.gmra.mxu0 %v7654_v29 }
  0xe5   : > { %7303 = vmatprep.mubr.bf16.mxu0 %v7655_v30 }
  0xec   : > { %7304 = vmatmul.mubr.bf16.gmra.mxu0 %v7656_v31 }
  0xed   : > { %7307 = vmatprep.mubr.bf16.mxu0 %v7657_v32 }
  0xf4   : > { %7308 = vmatmul.mubr.bf16.gmra.mxu0 %v7658_v35 }
  0xf5   : > { %7311 = vmatprep.mubr.bf16.mxu0 %v7659_v36 }
  0xfc   : > { %7312 = vmatmul.mubr.bf16.gmra.mxu0 %v7660_v41 }
  0xfd   : > { %7315 = vmatprep.mubr.bf16.mxu0 %v7661_v42 }
 0x104   : > { %7316 = vmatmul.mubr.bf16.gmra.mxu0 %v7662_v47  ;;  %v7689_v47 = vld [vmem:[#allocation8 + $0x28] sm:$0xff]  }
 0x105   : > { %7319 = vmatprep.mubr.bf16.mxu0 %v7663_v48 }
 0x10c   : > { %7320 = vmatmul.mubr.bf16.gmra.mxu0 %v7664_v49 }
 0x10d   : > { %7323 = vmatprep.mubr.bf16.mxu0 %v7665_v50 }
 0x114   : > { %7324 = vmatmul.mubr.bf16.gmra.mxu0 %v7666_v51 }
 0x115   : > { %7327 = vmatprep.mubr.bf16.mxu0 %v7667_v52 }
 0x11c   : > { %7328 = vmatmul.mubr.bf16.gmra.mxu0 %v7668_v53 }
 0x11d   : > { %7331 = vmatprep.mubr.bf16.mxu0 %v7669_v54 }
 0x124   : > { %7332 = vmatmul.mubr.bf16.gmra.mxu0 %v7670_v55 }
 0x16c   : > { %v7273_v58 = vpop.f32.mrf.mxu0 }
 0x16d   : > { %v1124_v59 = vmul.f32 %v7273_v58, %v8474_v57  ;;  %v7690_v58 = vld [vmem:[#allocation8 + $0x20] sm:$0xff]  }
 0x16e   : > { %v860_v61 = vpop.f32.mrf.mxu0 }
 0x16f   : > { %v1122_v62 = vmul.f32 %v8474_v57, %v860_v61  ;;  %v1195_v0 = vadd.f32 %v8477_v60, %v1124_v59 }
 0x170   : > { %v7274_v63 = vpop.f32.mrf.mxu0 }
 0x171   : > { %v1125_v1 = vmul.f32 %v7274_v63, %v8474_v57  ;;  %v1193_v3 = vadd.f32 %v8477_v60, %v1122_v62  ;;  %v1259_v7 = vmax.f32 %v1195_v0, 0.0 }
 0x172   : > { %v863_v2 = vpop.f32.mrf.mxu0 }
 0x173   : > { %v1196_v4 = vadd.f32 %v8477_v60, %v1125_v1  ;;  %v1123_v5 = vmul.f32 %v8474_v57, %v863_v2  ;;  %v1257_v12 = vmax.f32 %v1193_v3, 0.0 }
 0x174   : > { %v7277_v6 = vpop.f32.mrf.mxu0 }
 0x175   : > { %v1260_v8 = vmax.f32 %v1196_v4, 0.0  ;;  %v1194_v9 = vadd.f32 %v8477_v60, %v1123_v5  ;;  %v1128_v10 = vmul.f32 %v7277_v6, %v8474_v57  ;;  %v7691_v6 = vld [vmem:[#allocation8 + $0x18] sm:$0xff]  }
 0x176   : > { %v876_v11 = vpop.f32.mrf.mxu0 }
 0x177   : > { %v8487_v13 = vpack.c.bf16 %v1260_v8, %v1259_v7  ;;  %v1258_v14 = vmax.f32 %v1194_v9, 0.0  ;;  %v1126_v15 = vmul.f32 %v8474_v57, %v876_v11  ;;  %v1199_v18 = vadd.f32 %v8477_v60, %v1128_v10 }
 0x178   : > { %v7278_v16 = vpop.f32.mrf.mxu0 }
 0x179   : > { %v8490_v17 = vpack.c.bf16 %v1258_v14, %v1257_v12  ;;  %v1129_v19 = vmul.f32 %v7278_v16, %v8474_v57  ;;  %7447 = vmatprep.mubr.bf16.mxu0 %v8487_v13  ;;  %v1197_v21 = vadd.f32 %v8477_v60, %v1126_v15  ;;  %v1263_v25 = vmax.f32 %v1199_v18, 0.0  ;;  %v7692_v18 = vld [vmem:[#allocation8 + $0x10] sm:$0xff]  }
 0x17a   : > { %v879_v20 = vpop.f32.mrf.mxu0 }
 0x17b   : > { %v1200_v22 = vadd.f32 %v8477_v60, %v1129_v19  ;;  %v1127_v23 = vmul.f32 %v8474_v57, %v879_v20  ;;  %7351 = vmatprep.mubr.bf16.mxu1 %v8490_v17  ;;  %v1261_v30 = vmax.f32 %v1197_v21, 0.0 }
 0x17c   : > { %v7281_v24 = vpop.f32.mrf.mxu0 }
 0x17d   : > { %v1264_v26 = vmax.f32 %v1200_v22, 0.0  ;;  %v1198_v27 = vadd.f32 %v8477_v60, %v1127_v23  ;;  %v1132_v28 = vmul.f32 %v7281_v24, %v8474_v57 }
 0x17e   : > { %v892_v29 = vpop.f32.mrf.mxu0 }
 0x17f   : > { %v8501_v31 = vpack.c.bf16 %v1264_v26, %v1263_v25  ;;  %v1262_v32 = vmax.f32 %v1198_v27, 0.0  ;;  %v1130_v33 = vmul.f32 %v8474_v57, %v892_v29  ;;  %v1203_v36 = vadd.f32 %v8477_v60, %v1132_v28  ;;  %v7693_v28 = vld [vmem:[#allocation8 + $0x8] sm:$0xff]  }
 0x180   : > { %v7282_v34 = vpop.f32.mrf.mxu0 }
 0x181   : > { %v8504_v35 = vpack.c.bf16 %v1262_v32, %v1261_v30  ;;  %v1133_v37 = vmul.f32 %v7282_v34, %v8474_v57  ;;  %7448 = vmatmul.mubr.bf16.vlgmr.msra.gmra.mxu0 %v8501_v31  ;;  %v1201_v41 = vadd.f32 %v8477_v60, %v1130_v33  ;;  %v1267_v44 = vmax.f32 %v1203_v36, 0.0 }
 0x182   : > { %v895_v39 = vpop.f32.mrf.mxu0 }
 0x183   : > { %v1204_v40 = vadd.f32 %v8477_v60, %v1133_v37  ;;  %7352 = vmatmul.mubr.bf16.vlgmr.msra.gmra.mxu1 %v8504_v35  ;;  %v1131_v42 = vmul.f32 %v8474_v57, %v895_v39  ;;  %v1265_v52 = vmax.f32 %v1201_v41, 0.0 }
 0x184   : > { %v7285_v43 = vpop.f32.mrf.mxu0  ;;  %7384 = vmatpush3.bf16.msra.mxu1 %v7687_v56 }
 0x185   : > { %v1268_v45 = vmax.f32 %v1204_v40, 0.0  ;;  %v1136_v46 = vmul.f32 %v7285_v43, %v8474_v57  ;;  %7385 = vmatprep.subr.bf16.mxu1 %v7688_v38  ;;  %v1202_v48 = vadd.f32 %v8477_v60, %v1131_v42  ;;  %v7694_v40 = vld [vmem:[#allocation8] sm:$0xff]  }
 0x186   : > { %v908_v49 = vpop.f32.mrf.mxu0 }
 0x187   : > { %v8515_v50 = vpack.c.bf16 %v1268_v45, %v1267_v44  ;;  %v1134_v51 = vmul.f32 %v8474_v57, %v908_v49  ;;  %v1266_v53 = vmax.f32 %v1202_v48, 0.0  ;;  %v1207_v55 = vadd.f32 %v8477_v60, %v1136_v46 }
 0x188   : > { %v7286_v54 = vpop.f32.mrf.mxu0  ;;  %7386 = vmatpush3.bf16.msra.mxu1 %v7688_v38 }
 0x189   : > { %v1137_v56 = vmul.f32 %v7286_v54, %v8474_v57  ;;  %7451 = vmatprep.mubr.bf16.mxu0 %v8515_v50  ;;  %7387 = vmatprep.subr.bf16.mxu1 %v7689_v47  ;;  %v8521_v59 = vpack.c.bf16 %v1266_v53, %v1265_v52  ;;  %v1205_v62 = vadd.f32 %v8477_v60, %v1134_v51  ;;  %v1271_v2 = vmax.f32 %v1207_v55, 0.0  ;;  %v8557_v51 = vld [vmem:[#allocation8 + $0xf8] sm:$0xff]  }
 0x18a   : > { %v911_v61 = vpop.f32.mrf.mxu0 }
 0x18b   : > { %v1208_v63 = vadd.f32 %v8477_v60, %v1137_v56  ;;  %v1135_v0 = vmul.f32 %v8474_v57, %v911_v61  ;;  %7355 = vmatprep.mubr.bf16.mxu1 %v8521_v59  ;;  %v1269_v8 = vmax.f32 %v1205_v62, 0.0 }
 0x18c   : > { %v7289_v1 = vpop.f32.mrf.mxu0  ;;  %7388 = vmatpush3.bf16.msra.mxu1 %v7689_v47 }
 0x18d   : > { %v1272_v3 = vmax.f32 %v1208_v63, 0.0  ;;  %v1206_v4 = vadd.f32 %v8477_v60, %v1135_v0  ;;  %v1140_v5 = vmul.f32 %v7289_v1, %v8474_v57  ;;  %7389 = vmatprep.subr.bf16.mxu1 %v7690_v58 }
 0x18e   : > { %v924_v7 = vpop.f32.mrf.mxu0 }
 0x18f   : > { %v8529_v9 = vpack.c.bf16 %v1272_v3, %v1271_v2  ;;  %v1270_v10 = vmax.f32 %v1206_v4, 0.0  ;;  %v1138_v11 = vmul.f32 %v8474_v57, %v924_v7  ;;  %v1211_v15 = vadd.f32 %v8477_v60, %v1140_v5 }
 0x190   : > { %v7290_v12 = vpop.f32.mrf.mxu0  ;;  %7390 = vmatpush3.bf16.msra.mxu1 %v7690_v58 }
 0x191   : > { %v8532_v14 = vpack.c.bf16 %v1270_v10, %v1269_v8  ;;  %v1141_v16 = vmul.f32 %v7290_v12, %v8474_v57  ;;  %7452 = vmatmul.mubr.bf16.gmra.mxu0 %v8529_v9  ;;  %7391 = vmatprep.subr.bf16.mxu1 %v7691_v6  ;;  %v1209_v20 = vadd.f32 %v8477_v60, %v1138_v11  ;;  %v1275_v24 = vmax.f32 %v1211_v15, 0.0 }
 0x192   : > { %v927_v19 = vpop.f32.mrf.mxu0 }
 0x193   : > { %v1212_v21 = vadd.f32 %v8477_v60, %v1141_v16  ;;  %v1139_v22 = vmul.f32 %v8474_v57, %v927_v19  ;;  %7356 = vmatmul.mubr.bf16.gmra.mxu1 %v8532_v14  ;;  %v1273_v30 = vmax.f32 %v1209_v20, 0.0 }
 0x194   : > { %v7293_v23 = vpop.f32.mrf.mxu0  ;;  %7392 = vmatpush3.bf16.msra.mxu1 %v7691_v6 }
 0x195   : > { %v1276_v25 = vmax.f32 %v1212_v21, 0.0  ;;  %v1210_v26 = vadd.f32 %v8477_v60, %v1139_v22  ;;  %v1144_v27 = vmul.f32 %v7293_v23, %v8474_v57  ;;  %7393 = vmatprep.subr.bf16.mxu1 %v7692_v18 }
 0x196   : > { %v940_v29 = vpop.f32.mrf.mxu0 }
 0x197   : > { %v8543_v32 = vpack.c.bf16 %v1276_v25, %v1275_v24  ;;  %v1274_v33 = vmax.f32 %v1210_v26, 0.0  ;;  %v1142_v34 = vmul.f32 %v8474_v57, %v940_v29  ;;  %v1215_v38 = vadd.f32 %v8477_v60, %v1144_v27 }
 0x198   : > { %v7294_v36 = vpop.f32.mrf.mxu0  ;;  %7394 = vmatpush3.bf16.msra.mxu1 %v7692_v18 }
 0x199   : > { %v8546_v37 = vpack.c.bf16 %v1274_v33, %v1273_v30  ;;  %v1145_v39 = vmul.f32 %v7294_v36, %v8474_v57  ;;  %7455 = vmatprep.mubr.bf16.mxu0 %v8543_v32  ;;  %7395 = vmatprep.subr.bf16.mxu1 %v7693_v28  ;;  %v1213_v42 = vadd.f32 %v8477_v60, %v1142_v34  ;;  %v1279_v46 = vmax.f32 %v1215_v38, 0.0 }
 0x19a   : > { %v943_v41 = vpop.f32.mrf.mxu0 }
 0x19b   : > { %v1216_v43 = vadd.f32 %v8477_v60, %v1145_v39  ;;  %v1143_v44 = vmul.f32 %v8474_v57, %v943_v41  ;;  %7359 = vmatprep.mubr.bf16.mxu1 %v8546_v37  ;;  %v1277_v53 = vmax.f32 %v1213_v42, 0.0 }
 0x19c   : > { %v7297_v45 = vpop.f32.mrf.mxu0  ;;  %7396 = vmatpush3.bf16.msra.mxu1 %v7693_v28 }
 0x19d   : > { %v1280_v47 = vmax.f32 %v1216_v43, 0.0  ;;  %v1214_v48 = vadd.f32 %v8477_v60, %v1143_v44  ;;  %v1148_v49 = vmul.f32 %v7297_v45, %v8474_v57  ;;  %7397 = vmatprep.subr.bf16.mxu1 %v7694_v40 }
 0x19e   : > { %v956_v52 = vpop.f32.mrf.mxu0 }
 0x19f   : > { %v8559_v54 = vpack.c.bf16 %v1280_v47, %v1279_v46  ;;  %v1278_v55 = vmax.f32 %v1214_v48, 0.0  ;;  %v1146_v56 = vmul.f32 %v8474_v57, %v956_v52  ;;  %v1219_v62 = vadd.f32 %v8477_v60, %v1148_v49 }
 0x1a0   : > { %v7298_v58 = vpop.f32.mrf.mxu0  ;;  %7398 = vmatpush3.bf16.msra.mxu1 %v7694_v40 }
 0x1a1   : > { %v8562_v61 = vpack.c.bf16 %v1278_v55, %v1277_v53  ;;  %v1149_v63 = vmul.f32 %v7298_v58, %v8474_v57  ;;  %7456 = vmatmul.mubr.bf16.gmra.mxu0 %v8559_v54  ;;  %7479 = vmatprep.subr.bf16.mxu1 %v8557_v51  ;;  %v1217_v1 = vadd.f32 %v8477_v60, %v1146_v56  ;;  %v1283_v5 = vmax.f32 %v1219_v62, 0.0 }
 0x1a2   : > { %v959_v0 = vpop.f32.mrf.mxu0 }
 0x1a3   : > { %v1220_v2 = vadd.f32 %v8477_v60, %v1149_v63  ;;  %v1147_v3 = vmul.f32 %v8474_v57, %v959_v0  ;;  %7360 = vmatmul.mubr.bf16.gmra.mxu1 %v8562_v61  ;;  %v1281_v11 = vmax.f32 %v1217_v1, 0.0 }
 0x1a4   : > { %v7301_v4 = vpop.f32.mrf.mxu0 }
 0x1a5   : > { %v1284_v6 = vmax.f32 %v1220_v2, 0.0  ;;  %v1218_v7 = vadd.f32 %v8477_v60, %v1147_v3  ;;  %v1152_v8 = vmul.f32 %v7301_v4, %v8474_v57 }
 0x1a6   : > { %v972_v10 = vpop.f32.mrf.mxu0 }
 0x1a7   : > { %v8574_v12 = vpack.c.bf16 %v1284_v6, %v1283_v5  ;;  %v1282_v15 = vmax.f32 %v1218_v7, 0.0  ;;  %v1150_v16 = vmul.f32 %v8474_v57, %v972_v10  ;;  %v1223_v20 = vadd.f32 %v8477_v60, %v1152_v8 }
 0x1a8   : > { %v7302_v18 = vpop.f32.mrf.mxu0 }
 0x1a9   : > { %v8577_v19 = vpack.c.bf16 %v1282_v15, %v1281_v11  ;;  %v1153_v21 = vmul.f32 %v7302_v18, %v8474_v57  ;;  %7459 = vmatprep.mubr.bf16.mxu0 %v8574_v12  ;;  %v1221_v23 = vadd.f32 %v8477_v60, %v1150_v16  ;;  %v1287_v27 = vmax.f32 %v1223_v20, 0.0 }
 0x1aa   : > { %v975_v22 = vpop.f32.mrf.mxu0 }
 0x1ab   : > { %v1224_v24 = vadd.f32 %v8477_v60, %v1153_v21  ;;  %v1151_v25 = vmul.f32 %v8474_v57, %v975_v22  ;;  %7363 = vmatprep.mubr.bf16.mxu1 %v8577_v19  ;;  %v1285_v34 = vmax.f32 %v1221_v23, 0.0 }
 0x1ac   : > { %v7305_v26 = vpop.f32.mrf.mxu0 }
 0x1ad   : > { %v1288_v28 = vmax.f32 %v1224_v24, 0.0  ;;  %v1222_v29 = vadd.f32 %v8477_v60, %v1151_v25  ;;  %v1156_v30 = vmul.f32 %v7305_v26, %v8474_v57 }
 0x1ae   : > { %v988_v33 = vpop.f32.mrf.mxu0 }
 0x1af   : > { %v8588_v36 = vpack.c.bf16 %v1288_v28, %v1287_v27  ;;  %v1286_v38 = vmax.f32 %v1222_v29, 0.0  ;;  %v1154_v39 = vmul.f32 %v8474_v57, %v988_v33  ;;  %v1227_v42 = vadd.f32 %v8477_v60, %v1156_v30 }
 0x1b0   : > { %v7306_v40 = vpop.f32.mrf.mxu0 }
 0x1b1   : > { %v8591_v41 = vpack.c.bf16 %v1286_v38, %v1285_v34  ;;  %v1157_v43 = vmul.f32 %v7306_v40, %v8474_v57  ;;  %7460 = vmatmul.mubr.bf16.gmra.mxu0 %v8588_v36  ;;  %v1225_v45 = vadd.f32 %v8477_v60, %v1154_v39  ;;  %v1291_v49 = vmax.f32 %v1227_v42, 0.0 }
 0x1b2   : > { %v991_v44 = vpop.f32.mrf.mxu0 }
 0x1b3   : > { %v1228_v46 = vadd.f32 %v8477_v60, %v1157_v43  ;;  %v1155_v47 = vmul.f32 %v8474_v57, %v991_v44  ;;  %7364 = vmatmul.mubr.bf16.gmra.mxu1 %v8591_v41  ;;  %v1289_v58 = vmax.f32 %v1225_v45, 0.0 }
 0x1b4   : > { %v7309_v48 = vpop.f32.mrf.mxu0 }
 0x1b5   : > { %v1292_v52 = vmax.f32 %v1228_v46, 0.0  ;;  %v1226_v53 = vadd.f32 %v8477_v60, %v1155_v47  ;;  %v1160_v55 = vmul.f32 %v7309_v48, %v8474_v57 }
 0x1b6   : > { %v1004_v56 = vpop.f32.mrf.mxu0 }
 0x1b7   : > { %v8602_v62 = vpack.c.bf16 %v1292_v52, %v1291_v49  ;;  %v1290_v63 = vmax.f32 %v1226_v53, 0.0  ;;  %v1158_v0 = vmul.f32 %v8474_v57, %v1004_v56  ;;  %v1231_v3 = vadd.f32 %v8477_v60, %v1160_v55 }
 0x1b8   : > { %v7310_v1 = vpop.f32.mrf.mxu0 }
 0x1b9   : > { %v8605_v2 = vpack.c.bf16 %v1290_v63, %v1289_v58  ;;  %v1161_v4 = vmul.f32 %v7310_v1, %v8474_v57  ;;  %7463 = vmatprep.mubr.bf16.mxu0 %v8602_v62  ;;  %v1229_v6 = vadd.f32 %v8477_v60, %v1158_v0  ;;  %v1295_v11 = vmax.f32 %v1231_v3, 0.0 }
 0x1ba   : > { %v1007_v5 = vpop.f32.mrf.mxu0 }
 0x1bb   : > { %v1232_v7 = vadd.f32 %v8477_v60, %v1161_v4  ;;  %v1159_v8 = vmul.f32 %v8474_v57, %v1007_v5  ;;  %7367 = vmatprep.mubr.bf16.mxu1 %v8605_v2  ;;  %v1293_v21 = vmax.f32 %v1229_v6, 0.0 }
 0x1bc   : > { %v7313_v10 = vpop.f32.mrf.mxu0 }
 0x1bd   : > { %v1296_v15 = vmax.f32 %v1232_v7, 0.0  ;;  %v1230_v16 = vadd.f32 %v8477_v60, %v1159_v8  ;;  %v1164_v18 = vmul.f32 %v7313_v10, %v8474_v57 }
 0x1be   : > { %v1020_v20 = vpop.f32.mrf.mxu0 }
 0x1bf   : > { %v8616_v22 = vpack.c.bf16 %v1296_v15, %v1295_v11  ;;  %v1294_v23 = vmax.f32 %v1230_v16, 0.0  ;;  %v1162_v24 = vmul.f32 %v8474_v57, %v1020_v20  ;;  %v1235_v27 = vadd.f32 %v8477_v60, %v1164_v18 }
 0x1c0   : > { %v7314_v25 = vpop.f32.mrf.mxu0 }
 0x1c1   : > { %v8619_v26 = vpack.c.bf16 %v1294_v23, %v1293_v21  ;;  %v1165_v28 = vmul.f32 %v7314_v25, %v8474_v57  ;;  %7464 = vmatmul.mubr.bf16.gmra.mxu0 %v8616_v22  ;;  %v1233_v30 = vadd.f32 %v8477_v60, %v1162_v24  ;;  %v1299_v39 = vmax.f32 %v1235_v27, 0.0 }
 0x1c2   : > { %v1023_v29 = vpop.f32.mrf.mxu0 }
 0x1c3   : > { %v1236_v33 = vadd.f32 %v8477_v60, %v1165_v28  ;;  %v1163_v34 = vmul.f32 %v8474_v57, %v1023_v29  ;;  %7368 = vmatmul.mubr.bf16.gmra.mxu1 %v8619_v26  ;;  %v1297_v45 = vmax.f32 %v1233_v30, 0.0 }
 0x1c4   : > { %v7317_v38 = vpop.f32.mrf.mxu0 }
 0x1c5   : > { %v1300_v40 = vmax.f32 %v1236_v33, 0.0  ;;  %v1234_v42 = vadd.f32 %v8477_v60, %v1163_v34  ;;  %v1168_v43 = vmul.f32 %v7317_v38, %v8474_v57 }
 0x1c6   : > { %v1036_v44 = vpop.f32.mrf.mxu0 }
 0x1c7   : > { %v8630_v46 = vpack.c.bf16 %v1300_v40, %v1299_v39  ;;  %v1298_v47 = vmax.f32 %v1234_v42, 0.0  ;;  %v1166_v48 = vmul.f32 %v8474_v57, %v1036_v44  ;;  %v1239_v53 = vadd.f32 %v8477_v60, %v1168_v43 }
 0x1c8   : > { %v7318_v49 = vpop.f32.mrf.mxu0 }
 0x1c9   : > { %v8633_v52 = vpack.c.bf16 %v1298_v47, %v1297_v45  ;;  %v1169_v55 = vmul.f32 %v7318_v49, %v8474_v57  ;;  %7467 = vmatprep.mubr.bf16.mxu0 %v8630_v46  ;;  %v1237_v58 = vadd.f32 %v8477_v60, %v1166_v48  ;;  %v1303_v3 = vmax.f32 %v1239_v53, 0.0 }
 0x1ca   : > { %v1039_v56 = vpop.f32.mrf.mxu0 }
 0x1cb   : > { %v1240_v63 = vadd.f32 %v8477_v60, %v1169_v55  ;;  %v1167_v0 = vmul.f32 %v8474_v57, %v1039_v56  ;;  %7371 = vmatprep.mubr.bf16.mxu1 %v8633_v52  ;;  %v1301_v8 = vmax.f32 %v1237_v58, 0.0 }
 0x1cc   : > { %v7321_v1 = vpop.f32.mrf.mxu0 }
 0x1cd   : > { %v1304_v4 = vmax.f32 %v1240_v63, 0.0  ;;  %v1238_v5 = vadd.f32 %v8477_v60, %v1167_v0  ;;  %v1172_v6 = vmul.f32 %v7321_v1, %v8474_v57 }
 0x1ce   : > { %v1052_v7 = vpop.f32.mrf.mxu0 }
 0x1cf   : > { %v8644_v10 = vpack.c.bf16 %v1304_v4, %v1303_v3  ;;  %v1302_v11 = vmax.f32 %v1238_v5, 0.0  ;;  %v1170_v15 = vmul.f32 %v8474_v57, %v1052_v7  ;;  %v1243_v20 = vadd.f32 %v8477_v60, %v1172_v6 }
 0x1d0   : > { %v7322_v16 = vpop.f32.mrf.mxu0 }
 0x1d1   : > { %v8647_v18 = vpack.c.bf16 %v1302_v11, %v1301_v8  ;;  %v1173_v21 = vmul.f32 %v7322_v16, %v8474_v57  ;;  %7468 = vmatmul.mubr.bf16.gmra.mxu0 %v8644_v10  ;;  %v1241_v24 = vadd.f32 %v8477_v60, %v1170_v15  ;;  %v1307_v29 = vmax.f32 %v1243_v20, 0.0 }
 0x1d2   : > { %v1055_v23 = vpop.f32.mrf.mxu0 }
 0x1d3   : > { %v1244_v25 = vadd.f32 %v8477_v60, %v1173_v21  ;;  %v1171_v27 = vmul.f32 %v8474_v57, %v1055_v23  ;;  %7372 = vmatmul.mubr.bf16.gmra.mxu1 %v8647_v18  ;;  %v1305_v39 = vmax.f32 %v1241_v24, 0.0 }
 0x1d4   : > { %v7325_v28 = vpop.f32.mrf.mxu0 }
 0x1d5   : > { %v1308_v30 = vmax.f32 %v1244_v25, 0.0  ;;  %v1242_v33 = vadd.f32 %v8477_v60, %v1171_v27  ;;  %v1176_v34 = vmul.f32 %v7325_v28, %v8474_v57  ;;  %v1354_v28 = vshrl.u32 %v8487_v13, 16 }
 0x1d6   : > { %v1068_v38 = vpop.f32.mrf.mxu0 }
 0x1d7   : > { %v8658_v40 = vpack.c.bf16 %v1308_v30, %v1307_v29  ;;  %v1306_v42 = vmax.f32 %v1242_v33, 0.0  ;;  %v1174_v43 = vmul.f32 %v8474_v57, %v1068_v38  ;;  %v1247_v47 = vadd.f32 %v8477_v60, %v1176_v34 }
 0x1d8   : > { %v7326_v44 = vpop.f32.mrf.mxu0  ;;  %v1357_v29 = vshll.u32 %v8487_v13, 16 }
 0x1d9   : > { %v8661_v45 = vpack.c.bf16 %v1306_v42, %v1305_v39  ;;  %v1177_v48 = vmul.f32 %v7326_v44, %v8474_v57  ;;  %7471 = vmatprep.mubr.bf16.mxu0 %v8658_v40  ;;  %v1245_v53 = vadd.f32 %v8477_v60, %v1174_v43  ;;  %v1311_v63 = vmax.f32 %v1247_v47, 0.0 }
 0x1da   : > { %v1071_v49 = vpop.f32.mrf.mxu0 }
 0x1db   : > { %v1248_v55 = vadd.f32 %v8477_v60, %v1177_v48  ;;  %v1175_v56 = vmul.f32 %v8474_v57, %v1071_v49  ;;  %7375 = vmatprep.mubr.bf16.mxu1 %v8661_v45  ;;  %v1309_v5 = vmax.f32 %v1245_v53, 0.0  ;;  %v1356_v49 = vrot.slane %v1354_v28, 3 }
 0x1dc   : > { %v7329_v58 = vpop.f32.mrf.mxu0  ;;  %v1359_v53 = vrot.slane %v1357_v29, 4 }
 0x1dd   : > { %v1312_v0 = vmax.f32 %v1248_v55, 0.0  ;;  %v1246_v1 = vadd.f32 %v8477_v60, %v1175_v56  ;;  %v1180_v3 = vmul.f32 %v7329_v58, %v8474_v57 }
 0x1de   : > { %v1084_v4 = vpop.f32.mrf.mxu0 }
 0x1df   : > { %v8672_v6 = vpack.c.bf16 %v1312_v0, %v1311_v63  ;;  %v1310_v7 = vmax.f32 %v1246_v1, 0.0  ;;  %v1178_v8 = vmul.f32 %v8474_v57, %v1084_v4  ;;  %v1251_v16 = vadd.f32 %v8477_v60, %v1180_v3 }
 0x1e0   : > { %v7330_v11 = vpop.f32.mrf.mxu0  ;;  %v1362_v0 = vshrl.u32 %v8501_v31, 16 }
 0x1e1   : > { %v8675_v15 = vpack.c.bf16 %v1310_v7, %v1309_v5  ;;  %v1181_v20 = vmul.f32 %v7330_v11, %v8474_v57  ;;  %7472 = vmatmul.mubr.bf16.gmra.mxu0 %v8672_v6  ;;  %v1249_v23 = vadd.f32 %v8477_v60, %v1178_v8  ;;  %v1315_v30 = vmax.f32 %v1251_v16, 0.0 }
 0x1e2   : > { %v1087_v21 = vpop.f32.mrf.mxu0  ;;  %v1365_v5 = vshll.u32 %v8501_v31, 16  ;;  %v1360_v7 = vor.u32 %v1359_v53, %v1356_v49  ;;  %v1370_v8 = vshrl.u32 %v8515_v50, 16  ;;  %v1373_v11 = vshll.u32 %v8515_v50, 16 }
 0x1e3   : > { %v1252_v24 = vadd.f32 %v8477_v60, %v1181_v20  ;;  %v1179_v25 = vmul.f32 %v8474_v57, %v1087_v21  ;;  %7376 = vmatmul.mubr.bf16.gmra.mxu1 %v8675_v15  ;;  %v1313_v42 = vmax.f32 %v1249_v23, 0.0  ;;  %v10580_v23 = vmov 0 }
 0x1e4   : > { %v7333_v27 = vpop.f32.mrf.mxu0  ;;  %v10581_v23 = vsel %vm8705_vm2, 4294967295, %v10580_v23  ;;  %v1367_v28 = vrot.slane %v1365_v5, 4  ;;  %v1500_v29 = vsel %vm8705_vm2, 0, %v1360_v7  ;;  %v1389_v49 = vshll.u32 %v8543_v32, 16 }
 0x1e5   : > { %v1316_v33 = vmax.f32 %v1252_v24, 0.0  ;;  %v1250_v34 = vadd.f32 %v8477_v60, %v1179_v25  ;;  %v1184_v38 = vmul.f32 %v7333_v27, %v8474_v57  ;;  %10582 = vst [vmem:[#allocation21_spill] sm:$0xff] %v10581_v23  ;;  %v1364_v24 = vrot.slane %v1362_v0, 3 }
 0x1e6   : > { %v1100_v39 = vpop.f32.mrf.mxu0 }
 0x1e7   : > { %v8688_v43 = vpack.c.bf16 %v1316_v33, %v1315_v30  ;;  %v1314_v44 = vmax.f32 %v1250_v34, 0.0  ;;  %v1182_v47 = vmul.f32 %v8474_v57, %v1100_v39  ;;  %v1255_v56 = vadd.f32 %v8477_v60, %v1184_v38 }
 0x1e8   : > { %v7334_v48 = vpop.f32.mrf.mxu0  ;;  %v1372_v30 = vrot.slane %v1370_v8, 3  ;;  %v1375_v33 = vrot.slane %v1373_v11, 4  ;;  %v1368_v39 = vor.u32 %v1367_v28, %v1364_v24  ;;  %v1394_v11 = vshrl.u32 %v8559_v54, 16 }
 0x1e9   : > { %v8691_v55 = vpack.c.bf16 %v1314_v44, %v1313_v42  ;;  %v1185_v58 = vmul.f32 %v7334_v48, %v8474_v57  ;;  %7475 = vmatprep.mubr.bf16.mxu0 %v8688_v43  ;;  %v1253_v1 = vadd.f32 %v8477_v60, %v1182_v47  ;;  %v1319_v16 = vmax.f32 %v1255_v56, 0.0 }
 0x1ea   : > { %v1103_v63 = vpop.f32.mrf.mxu0  ;;  %v1378_v42 = vshrl.u32 %v8529_v9, 16  ;;  %v1381_v44 = vshll.u32 %v8529_v9, 16  ;;  %v1376_v47 = vor.u32 %v1375_v33, %v1372_v30  ;;  %v1386_v48 = vshrl.u32 %v8543_v32, 16 }
 0x1eb   : > { %v1256_v3 = vadd.f32 %v8477_v60, %v1185_v58  ;;  %v1183_v4 = vmul.f32 %v8474_v57, %v1103_v63  ;;  %7379 = vmatprep.mubr.bf16.mxu1 %v8691_v55  ;;  %v1317_v25 = vmax.f32 %v1253_v1, 0.0  ;;  %v1501_v53 = vsel %vm8705_vm2, 0, %v1368_v39 }
 0x1ec   : > { %v1380_v56 = vrot.slane %v1378_v42, 3  ;;  %v1533_v58 = vrot.slane %v8501_v31, 4  ;;  %v1502_v63 = vsel %vm8705_vm2, 0, %v1376_v47  ;;  %v1388_v0 = vrot.slane %v1386_v48, 3 }
 0x1ed   : > { %v1320_v20 = vmax.f32 %v1256_v3, 0.0  ;;  %v1254_v21 = vadd.f32 %v8477_v60, %v1183_v4  ;;  %v1532_v60 = vrot.slane %v8487_v13, 4  ;;  %v1383_v13 = vrot.slane %v1381_v44, 4  ;;  %v7696_v4 = vld [vmem:[#allocation8 + $0xf0] sm:$0xff]  }
 0x1ee   : > { %v1391_v1 = vrot.slane %v1389_v49, 4  ;;  %v1534_v3 = vrot.slane %v8515_v50, 4  ;;  %v1555_v5 = vsel %vm1548_vm3, %v1501_v53, %v1533_v58  ;;  %v7697_v50 = vld [vmem:[#allocation8 + $0xe8] sm:$0xff]   ;;  %v1535_v28 = vrot.slane %v8529_v9, 4 }
 0x1ef   : > { %v8709_v57 = vpack.c.bf16 %v1320_v20, %v1319_v16  ;;  %v1318_v27 = vmax.f32 %v1254_v21, 0.0  ;;  %v1551_v38 = vsel %vm1548_vm3, %v1500_v29, %v1532_v60  ;;  %v1384_v8 = vor.u32 %v1383_v13, %v1380_v56  ;;  %v7698_v60 = vld [vmem:[#allocation8 + $0xe0] sm:$0xff]  }
 0x1f0   : > { %v1559_v7 = vsel %vm1548_vm3, %v1502_v63, %v1534_v3  ;;  %v1397_v16 = vshll.u32 %v8559_v54, 16  ;;  %v1392_v31 = vor.u32 %v1391_v1, %v1388_v0  ;;  %v1402_v20 = vshrl.u32 %v8574_v12, 16 }
 0x1f1   : > { %v8713_v34 = vpack.c.bf16 %v1318_v27, %v1317_v25  ;;  %7476 = vmatmul.mubr.bf16.gmra.mxu0 %v8709_v57  ;;  %v1405_v21 = vshll.u32 %v8574_v12, 16  ;;  %v1503_v24 = vsel %vm8705_vm2, 0, %v1384_v8  ;;  %v1396_v25 = vrot.slane %v1394_v11, 3 }
 0x1f2   : > { %v1399_v27 = vrot.slane %v1397_v16, 4  ;;  %v1504_v29 = vsel %vm8705_vm2, 0, %v1392_v31  ;;  %v1536_v33 = vrot.slane %v8543_v32, 4  ;;  %v1410_v44 = vshrl.u32 %v8588_v36, 16  ;;  %v7699_v32 = vld [vmem:[#allocation8 + $0xd8] sm:$0xff]  }
 0x1f3   : > { %7380 = vmatmul.mubr.bf16.gmra.mxu1 %v8713_v34  ;;  %v1407_v30 = vrot.slane %v1405_v21, 4  ;;  %v1413_v9 = vshll.u32 %v8588_v36, 16  ;;  %v1418_v48 = vshrl.u32 %v8602_v62, 16  ;;  %v1421_v49 = vshll.u32 %v8602_v62, 16 }
 0x1f4   : > { %7399 = vmatprep.mubr.bf16.mxu1 %v1551_v38  ;;  %v1563_v38 = vsel %vm1548_vm3, %v1503_v24, %v1535_v28  ;;  %v1567_v39 = vsel %vm1548_vm3, %v1504_v29, %v1536_v33  ;;  %v1400_v42 = vor.u32 %v1399_v27, %v1396_v25  ;;  %v1412_v56 = vrot.slane %v1410_v44, 3 }
 0x1f5   : > { %v1415_v13 = vrot.slane %v1413_v9, 4  ;;  %v1537_v58 = vrot.slane %v8559_v54, 4  ;;  %v1420_v0 = vrot.slane %v1418_v48, 3  ;;  %v1423_v1 = vrot.slane %v1421_v49, 4 }
 0x1f6   : > { %v1505_v53 = vsel %vm8705_vm2, 0, %v1400_v42  ;;  %v1538_v3 = vrot.slane %v8574_v12, 4  ;;  %v1426_v11 = vshrl.u32 %v8616_v22, 16  ;;  %v1429_v54 = vshll.u32 %v8616_v22, 16  ;;  %v7701_v12 = vld [vmem:[#allocation8 + $0xc8] sm:$0xff]  }
 0x1f7   : > { %v1416_v8 = vor.u32 %v1415_v13, %v1412_v56  ;;  %v1424_v16 = vor.u32 %v1423_v1, %v1420_v0  ;;  %v1434_v31 = vshrl.u32 %v8630_v46, 16  ;;  %v1539_v25 = vrot.slane %v8588_v36, 4 }
 0x1f8   : > { %v1431_v24 = vrot.slane %v1429_v54, 4  ;;  %v1445_v36 = vshll.u32 %v8644_v10, 16  ;;  %v1450_v44 = vshrl.u32 %v8658_v40, 16  ;;  %v1453_v9 = vshll.u32 %v8658_v40, 16 }
 0x1f9   : > { %v1507_v21 = vsel %vm8705_vm2, 0, %v1416_v8  ;;  %v1508_v27 = vsel %vm8705_vm2, 0, %v1424_v16  ;;  %v1436_v28 = vrot.slane %v1434_v31, 3  ;;  %v1541_v49 = vrot.slane %v8616_v22, 4 }
 0x1fa   : > { %v1579_v33 = vsel %vm1548_vm3, %v1507_v21, %v1539_v25  ;;  %v1447_v48 = vrot.slane %v1445_v36, 4  ;;  %v1455_v56 = vrot.slane %v1453_v9, 4  ;;  %v1542_v13 = vrot.slane %v8630_v46, 4 }
 0x1fb   : > { %7400 = vmatmul.mubr.bf16.vlgmr.msra.gmra.mxu1 %v1555_v5  ;;  %v1571_v5 = vsel %vm1548_vm3, %v1505_v53, %v1537_v58  ;;  %v1452_v53 = vrot.slane %v1450_v44, 3  ;;  %v1458_v1 = vshrl.u32 %v8672_v6, 16  ;;  %v1543_v54 = vrot.slane %v8644_v10, 4 }
 0x1fc   : > { %7480 = vmatpush3.bf16.msra.mxu1 %v8557_v51  ;;  %7403 = vmatprep.mubr.bf16.mxu1 %v1559_v7  ;;  %v1404_v51 = vrot.slane %v1402_v20, 3  ;;  %v1437_v20 = vshll.u32 %v8630_v46, 16  ;;  %v1474_v25 = vshrl.u32 %v8709_v57, 16  ;;  %v1630_v36 = vshll.u32 %v8521_v59, 16 }
 0x1fd   : > { %7481 = vmatprep.subr.bf16.mxu1 %v7696_v4  ;;  %v1456_v22 = vor.u32 %v1455_v56, %v1452_v53  ;;  %v1460_v46 = vrot.slane %v1458_v1, 3  ;;  %v10583_v44 = vmov 0  ;;  %v1644_v1 = vshll.u32 %v8546_v37, 16 }
 0x1fe   : > { %v1408_v47 = vor.u32 %v1407_v30, %v1404_v51  ;;  %v1439_v29 = vrot.slane %v1437_v20, 4  ;;  %v1540_v51 = vrot.slane %v8602_v62, 4  ;;  %v7702_v30 = vld [vmem:[#allocation8 + $0xc0] sm:$0xff]   ;;  %v10584_v44 = vsel %vm8805_vm5, 4294967295, %v10583_v44 }
 0x1ff   : > { %v1512_v16 = vsel %vm8705_vm2, 0, %v1456_v22  ;;  %10585 = vst [vmem:[#allocation22_spill] sm:$0xff] %v10584_v44 }
 0x200   : > { %7482 = vmatpush3.bf16.msra.mxu1 %v7696_v4  ;;  %v1506_v63 = vsel %vm8705_vm2, 0, %v1408_v47  ;;  %v7700_v4 = vld [vmem:[#allocation8 + $0xd0] sm:$0xff]   ;;  %v1440_v42 = vor.u32 %v1439_v29, %v1436_v28  ;;  %v1614_v29 = vshrl.u32 %v8490_v17, 16 }
 0x201   : > { %7483 = vmatprep.subr.bf16.mxu1 %v7697_v50  ;;  %v1575_v7 = vsel %vm1548_vm3, %v1506_v63, %v1538_v3  ;;  %v1461_v3 = vshll.u32 %v8672_v6, 16 }
 0x203   : > { %7404 = vmatmul.mubr.bf16.gmra.mxu1 %v1563_v38  ;;  %v1463_v8 = vrot.slane %v1461_v3, 4  ;;  %v1776_v3 = vrot.slane %v8490_v17, 4 }
 0x204   : > { %7407 = vmatprep.mubr.bf16.mxu1 %v1567_v39  ;;  %7484 = vmatpush3.bf16.msra.mxu1 %v7697_v50  ;;  %v1428_v50 = vrot.slane %v1426_v11, 3  ;;  %v1442_v39 = vshrl.u32 %v8644_v10, 16  ;;  %v1616_v11 = vshll.u32 %v8490_v17, 16 }
 0x205   : > { %7485 = vmatprep.subr.bf16.mxu1 %v7698_v60 }
 0x206   : > { %v1432_v38 = vor.u32 %v1431_v24, %v1428_v50  ;;  %v1444_v47 = vrot.slane %v1442_v39, 3  ;;  %v1464_v24 = vor.u32 %v1463_v8, %v1460_v46  ;;  %v1618_v10 = vrot.slane %v1616_v11, 1 }
 0x207   : > { %v1646_v8 = vrot.slane %v1644_v1, 1 }
 0x208   : > { %7486 = vmatpush3.bf16.msra.mxu1 %v7698_v60  ;;  %v1583_v60 = vsel %vm1548_vm3, %v1508_v27, %v1540_v51  ;;  %v1509_v62 = vsel %vm8705_vm2, 0, %v1432_v38  ;;  %v1448_v0 = vor.u32 %v1447_v48, %v1444_v47  ;;  %v1477_v27 = vshll.u32 %v8709_v57, 16 }
 0x209   : > { %7487 = vmatprep.subr.bf16.mxu1 %v7699_v32  ;;  %v1587_v58 = vsel %vm1548_vm3, %v1509_v62, %v1541_v49  ;;  %v1623_v51 = vshll.u32 %v8504_v35, 16  ;;  %v1619_v39 = vor.u32 %v1618_v10, %v1614_v29  ;;  %v1632_v49 = vrot.slane %v1630_v36, 1 }
 0x20a   : > { %v1780_v36 = vrot.slane %v8546_v37, 4 }
 0x20b   : > { %7408 = vmatmul.mubr.bf16.gmra.mxu1 %v1571_v5  ;;  %v1469_v5 = vshll.u32 %v8688_v43, 16  ;;  %v1744_v48 = vsel %vm8805_vm5, %v1619_v39, 0  ;;  %v1672_v39 = vshll.u32 %v8605_v2, 16 }
 0x20c   : > { %7411 = vmatprep.mubr.bf16.mxu1 %v1575_v7  ;;  %7488 = vmatpush3.bf16.msra.mxu1 %v7699_v32  ;;  %v1510_v32 = vsel %vm8705_vm2, 0, %v1440_v42  ;;  %v1511_v7 = vsel %vm8705_vm2, 0, %v1448_v0  ;;  %v1546_v42 = vrot.slane %v8688_v43, 4  ;;  %v1808_v56 = vrot.slane %v1744_v48, 4 }
 0x20d   : > { %7489 = vmatprep.subr.bf16.mxu1 %v7700_v4  ;;  %v1591_v63 = vsel %vm1548_vm3, %v1510_v32, %v1542_v13  ;;  %v1471_v20 = vrot.slane %v1469_v5, 4  ;;  %v1595_v21 = vsel %vm1548_vm3, %v1511_v7, %v1543_v54  ;;  %v1621_v32 = vshrl.u32 %v8504_v35, 16 }
 0x20e   : > { %v1642_v54 = vshrl.u32 %v8546_v37, 16  ;;  %v1674_v48 = vrot.slane %v1672_v39, 1 }
 0x210   : > { %7490 = vmatpush3.bf16.msra.mxu1 %v7700_v4  ;;  %v1466_v4 = vshrl.u32 %v8688_v43, 16  ;;  %v1628_v43 = vshrl.u32 %v8521_v59, 16 }
 0x211   : > { %7491 = vmatprep.subr.bf16.mxu1 %v7701_v12 }
 0x212   : > { %v1468_v31 = vrot.slane %v1466_v4, 3  ;;  %v1633_v0 = vor.u32 %v1632_v49, %v1628_v43  ;;  %v1826_v4 = vsel %vm1548_vm3, %v1776_v3, %v1808_v56  ;;  %v1781_v56 = vrot.slane %v8562_v61, 4 }
 0x213   : > { %7412 = vmatmul.mubr.bf16.gmra.mxu1 %v1579_v33  ;;  %v1479_v33 = vrot.slane %v1477_v27, 4 }
 0x214   : > { %7415 = vmatprep.mubr.bf16.mxu1 %v1583_v60  ;;  %7492 = vmatpush3.bf16.msra.mxu1 %v7701_v12  ;;  %v1544_v12 = vrot.slane %v8658_v40, 4  ;;  %v1472_v28 = vor.u32 %v1471_v20, %v1468_v31  ;;  %v1513_v40 = vsel %vm8705_vm2, 0, %v1464_v24  ;;  %v1545_v60 = vrot.slane %v8672_v6, 4 }
 0x215   : > { %7493 = vmatprep.subr.bf16.mxu1 %v7702_v30  ;;  %v1625_v6 = vrot.slane %v1623_v51, 1  ;;  %v1746_v46 = vsel %vm8805_vm5, %v1633_v0, 0  ;;  %v1651_v31 = vshll.u32 %v8562_v61, 16  ;;  %v1777_v20 = vrot.slane %v8504_v35, 4 }
 0x216   : > { %v1599_v50 = vsel %vm1548_vm3, %v1512_v16, %v1544_v12  ;;  %v1514_v38 = vsel %vm8705_vm2, 0, %v1472_v28  ;;  %v1603_v9 = vsel %vm1548_vm3, %v1513_v40, %v1545_v60  ;;  %v1810_v17 = vrot.slane %v1746_v46, 4 }
 0x217   : > { %v1607_v62 = vsel %vm1548_vm3, %v1514_v38, %v1546_v42  ;;  %v1626_v13 = vor.u32 %v1625_v6, %v1621_v32  ;;  %v1647_v12 = vor.u32 %v1646_v8, %v1642_v54  ;;  %v1653_v28 = vrot.slane %v1651_v31, 1 }
 0x218   : > { %7494 = vmatpush3.bf16.msra.mxu1 %v7702_v30  ;;  %v1476_v30 = vrot.slane %v1474_v25, 3  ;;  %v1649_v35 = vshrl.u32 %v8562_v61, 16  ;;  %v1656_v40 = vshrl.u32 %v8577_v19, 16  ;;  %v1779_v60 = vrot.slane %v8532_v14, 4 }
 0x219   : > { %v1745_v5 = vsel %vm8805_vm5, %v1626_v13, 0  ;;  %v1748_v10 = vsel %vm8805_vm5, %v1647_v12, 0  ;;  %v1670_v32 = vshrl.u32 %v8605_v2, 16  ;;  %v1677_v61 = vshrl.u32 %v8619_v26, 16  ;;  %v7703_v12 = vld [vmem:[#allocation10 + $0xf0] ss:$8 sps:$4 sm:$0xff]  }
 0x21a   : > { %v1480_v47 = vor.u32 %v1479_v33, %v1476_v30  ;;  %v1809_v11 = vrot.slane %v1745_v5, 4  ;;  %v1654_v30 = vor.u32 %v1653_v28, %v1649_v35  ;;  %v1665_v33 = vshll.u32 %v8591_v41, 16  ;;  %v7706_v28 = vld [vmem:[#allocation10 + $0x70] ss:$8 sps:$4 sm:$0xff]  }
 0x21b   : > { %7416 = vmatmul.mubr.bf16.gmra.mxu1 %v1587_v58  ;;  %v1637_v58 = vshll.u32 %v8532_v14, 16  ;;  %v1675_v13 = vor.u32 %v1674_v48, %v1670_v32  ;;  %v1684_v46 = vshrl.u32 %v8633_v52, 16  ;;  %v1784_v31 = vrot.slane %v8605_v2, 4  ;;  %v7714_v32 = vld [vmem:[#allocation10 + $0x64] ss:$8 sps:$4 sm:$0xff]  }
 0x21c   : > { %7419 = vmatprep.mubr.bf16.mxu1 %v1591_v63  ;;  %v1515_v53 = vsel %vm8705_vm2, 0, %v1480_v47  ;;  %v1547_v63 = vrot.slane %v8709_v57, 4  ;;  %v1635_v57 = vshrl.u32 %v8532_v14, 16  ;;  %v1830_v24 = vsel %vm1548_vm3, %v1777_v20, %v1809_v11 }
 0x21d   : > { %v1639_v7 = vrot.slane %v1637_v58, 1  ;;  %v1667_v47 = vrot.slane %v1665_v33, 1  ;;  %v1663_v14 = vshrl.u32 %v8591_v41, 16  ;;  %v1686_v58 = vshll.u32 %v8633_v52, 16 }
 0x21e   : > { %v1611_v22 = vsel %vm1548_vm3, %v1515_v53, %v1547_v63  ;;  %v1679_v53 = vshll.u32 %v8619_v26, 16  ;;  %v1782_v63 = vrot.slane %v8577_v19, 4  ;;  %v1783_v11 = vrot.slane %v8591_v41, 4 }
 0x21f   : > { %v1640_v16 = vor.u32 %v1639_v7, %v1635_v57  ;;  %v1668_v43 = vor.u32 %v1667_v47, %v1663_v14  ;;  %v1688_v5 = vrot.slane %v1686_v58, 1  ;;  %v1693_v57 = vshll.u32 %v8647_v18, 16 }
 0x220   : > { %v1785_v33 = vrot.slane %v8619_v26, 4 }
 0x221   : > { %v1747_v27 = vsel %vm8805_vm5, %v1640_v16, 0  ;;  %v1751_v3 = vsel %vm8805_vm5, %v1668_v43, 0  ;;  %v1689_v54 = vor.u32 %v1688_v5, %v1684_v46  ;;  %v7717_v5 = vld [vmem:[#allocation10 + $0xd4] ss:$8 sps:$4 sm:$0xff]  }
 0x222   : > { %v1811_v51 = vrot.slane %v1747_v27, 4  ;;  %v1815_v7 = vrot.slane %v1751_v3, 4  ;;  %v1788_v3 = vrot.slane %v8661_v45, 4 }
 0x223   : > { %7420 = vmatmul.mubr.bf16.gmra.mxu1 %v1595_v21  ;;  %v1658_v21 = vshll.u32 %v8577_v19, 16  ;;  %v1754_v41 = vsel %vm8805_vm5, %v1689_v54, 0 }
 0x224   : > { %7423 = vmatprep.mubr.bf16.mxu1 %v1599_v50  ;;  %v1778_v50 = vrot.slane %v8521_v59, 4  ;;  %v1812_v59 = vrot.slane %v1748_v10, 4  ;;  %v1838_v42 = vsel %vm1548_vm3, %v1779_v60, %v1811_v51  ;;  %v1854_v20 = vsel %vm1548_vm3, %v1783_v11, %v1815_v7  ;;  %v7708_v10 = vld [vmem:[#allocation10 + $0x74] ss:$8 sps:$4 sm:$0xff]  }
 0x225   : > { %v1660_v29 = vrot.slane %v1658_v21, 1  ;;  %v7705_v21 = vld [vmem:[#allocation10 + $0xf4] ss:$8 sps:$4 sm:$0xff]   ;;  %v1698_v51 = vshrl.u32 %v8661_v45, 16  ;;  %3623 = vmatprep.subr.bf16.mxu1 %v7708_v10  ;;  %v7726_v10 = vld [vmem:[#allocation10 + $0x44] ss:$8 sps:$4 sm:$0xff]  }
 0x226   : > { %v1834_v25 = vsel %vm1548_vm3, %v1778_v50, %v1810_v17  ;;  %v1700_v17 = vshll.u32 %v8661_v45, 16  ;;  %3382 = vmatprep.subr.bf16.mxu0 %v7705_v21  ;;  %v7720_v45 = vld [vmem:[#allocation10 + $0x54] ss:$8 sps:$4 sm:$0xff]  }
 0x227   : > { %v1661_v38 = vor.u32 %v1660_v29, %v1656_v40  ;;  %v1691_v29 = vshrl.u32 %v8647_v18, 16  ;;  %3383 = vmatpush1.bf16.msra.mxu0 %v7703_v12  ;;  %v1818_v40 = vrot.slane %v1754_v41, 4  ;;  %v1790_v12 = vrot.slane %v8691_v55, 4 }
 0x228   : > { %v1702_v27 = vrot.slane %v1700_v17, 1 }
 0x229   : > { %v1750_v6 = vsel %vm8805_vm5, %v1661_v38, 0  ;;  %v1714_v38 = vshll.u32 %v8691_v55, 16 }
 0x22a   : > { %v1814_v37 = vrot.slane %v1750_v6, 4  ;;  %v1703_v60 = vor.u32 %v1702_v27, %v1698_v51 }
 0x22b   : > { %7424 = vmatmul.mubr.bf16.gmra.mxu1 %v1603_v9  ;;  %v1842_v9 = vsel %vm1548_vm3, %v1780_v36, %v1812_v59  ;;  %v1786_v36 = vrot.slane %v8633_v52, 4  ;;  %v1716_v14 = vrot.slane %v1714_v38, 1 }
 0x22c   : > { %7427 = vmatprep.mubr.bf16.mxu1 %v1607_v62  ;;  %v1749_v62 = vsel %vm8805_vm5, %v1654_v30, 0  ;;  %v1850_v1 = vsel %vm1548_vm3, %v1782_v63, %v1814_v37  ;;  %v1707_v30 = vshll.u32 %v8675_v15, 16  ;;  %v1756_v26 = vsel %vm8805_vm5, %v1703_v60, 0 }
 0x22d   : > { %v1813_v49 = vrot.slane %v1749_v62, 4  ;;  %v7711_v62 = vld [vmem:[#allocation10 + $0xe4] ss:$8 sps:$4 sm:$0xff]   ;;  %v1866_v47 = vsel %vm1548_vm3, %v1786_v36, %v1818_v40  ;;  %v1705_v37 = vshrl.u32 %v8675_v15, 16  ;;  %v1721_v63 = vshll.u32 %v8713_v34, 16 }
 0x22e   : > { %v1709_v48 = vrot.slane %v1707_v30, 1  ;;  %3384 = vmatprep.subr.bf16.mxu0 %v7711_v62  ;;  %v7727_v40 = vld [vmem:[#allocation10 + $0xb0] ss:$8 sps:$4 sm:$0xff]   ;;  %v7733_v36 = vld [vmem:[#allocation10 + $0xa0] ss:$8 sps:$4 sm:$0xff]  }
 0x22f   : > { %v1846_v0 = vsel %vm1548_vm3, %v1781_v56, %v1813_v49  ;;  %v7712_v49 = vld [vmem:[#allocation10 + $0x60] ss:$8 sps:$4 sm:$0xff]   ;;  %v7730_v30 = vld [vmem:[#allocation10 + $0x30] ss:$8 sps:$4 sm:$0xff]  }
 0x230   : > { %v1710_v58 = vor.u32 %v1709_v48, %v1705_v37  ;;  %v7736_v62 = vld [vmem:[#allocation10 + $0x20] ss:$8 sps:$4 sm:$0xff]  }
 0x232   : > { %v1757_v46 = vsel %vm8805_vm5, %v1710_v58, 0  ;;  %v7745_v58 = vld [vmem:[#allocation10 + $0x10] ss:$8 sps:$4 sm:$0xff]  }
 0x233   : > { %7428 = vmatmul.mubr.bf16.gmra.mxu1 %v1611_v22  ;;  %v1681_v22 = vrot.slane %v1679_v53, 1  ;;  %v1712_v53 = vshrl.u32 %v8691_v55, 16  ;;  %v1821_v11 = vrot.slane %v1757_v46, 4  ;;  %v1791_v55 = vrot.slane %v8713_v34, 4 }
 0x234   : > { %7495 = vmatprep.mubr.bf16.mxu1 %v1826_v4  ;;  %v1752_v4 = vsel %vm8805_vm5, %v1675_v13, 0  ;;  %v1820_v13 = vrot.slane %v1756_v26, 4  ;;  %v7739_v26 = vld [vmem:[#allocation10 + $0x90] ss:$8 sps:$4 sm:$0xff]  }
 0x235   : > { %v1816_v19 = vrot.slane %v1752_v4, 4  ;;  %v1682_v8 = vor.u32 %v1681_v22, %v1677_v61  ;;  %v7715_v4 = vld [vmem:[#allocation10 + $0xd0] ss:$8 sps:$4 sm:$0xff]  }
 0x236   : > { %v1874_v7 = vsel %vm1548_vm3, %v1788_v3, %v1820_v13  ;;  %v7747_v13 = vld [vmem:[#allocation10 + $0x14] ss:$8 sps:$4 sm:$0xff]  }
 0x237   : > { %v1858_v50 = vsel %vm1548_vm3, %v1784_v31, %v1816_v19  ;;  %v1723_v19 = vrot.slane %v1721_v63, 1 }
 0x23b   : > { %7496 = vmatmul.mubr.bf16.vlgmr.msra.gmra.mxu1 %v1830_v24  ;;  %v1753_v24 = vsel %vm8805_vm5, %v1682_v8, 0  ;;  %v7718_v8 = vld [vmem:[#allocation10 + $0x50] ss:$8 sps:$4 sm:$0xff]  }
 0x23c   : > { %7499 = vmatprep.mubr.bf16.mxu1 %v1834_v25  ;;  %v1695_v25 = vrot.slane %v1693_v57, 1  ;;  %v1817_v35 = vrot.slane %v1753_v24, 4  ;;  %3624 = vmatpush1.bf16.msra.mxu1 %v7706_v28  ;;  %v1719_v57 = vshrl.u32 %v8713_v34, 16  ;;  %v7723_v24 = vld [vmem:[#allocation10 + $0xc4] ss:$8 sps:$4 sm:$0xff]  }
 0x23d   : > { %3625 = vmatprep.subr.bf16.mxu1 %v7714_v32  ;;  %v7724_v28 = vld [vmem:[#allocation10 + $0x40] ss:$8 sps:$4 sm:$0xff]  }
 0x23e   : > { %v1696_v59 = vor.u32 %v1695_v25, %v1691_v29  ;;  %v1724_v31 = vor.u32 %v1723_v19, %v1719_v57  ;;  %v7742_v32 = vld [vmem:[#allocation10 + $0x80] ss:$8 sps:$4 sm:$0xff]   ;;  %v7756_v19 = vld [vmem:[#allocation10 + $0x1f4] ss:$8 sps:$4 sm:$0xff]  }
 0x240   : > { %v1755_v6 = vsel %vm8805_vm5, %v1696_v59, 0  ;;  %3626 = vmatpush1.bf16.msra.mxu1 %v7712_v49  ;;  %v1759_v27 = vsel %vm8805_vm5, %v1724_v31, 0  ;;  %v7729_v59 = vld [vmem:[#allocation10 + $0xb4] ss:$8 sps:$4 sm:$0xff]  }
 0x241   : > { %v1819_v43 = vrot.slane %v1755_v6, 4  ;;  %3627 = vmatprep.subr.bf16.mxu1 %v7720_v45  ;;  %v7741_v6 = vld [vmem:[#allocation10 + $0x94] ss:$8 sps:$4 sm:$0xff]   ;;  %v8961_v45 = vpop.f32.mrf.mxu0 }
 0x243   : > { %7500 = vmatmul.mubr.bf16.gmra.mxu1 %v1838_v42  ;;  %v8868_v16 = vpop.f32.mrf.mxu1  ;;  %v1862_v42 = vsel %vm1548_vm3, %v1785_v33, %v1817_v35  ;;  %v7732_v33 = vld [vmem:[#allocation10 + $0x34] ss:$8 sps:$4 sm:$0xff]  }
 0x244   : > { %7503 = vmatprep.mubr.bf16.mxu1 %v1842_v9  ;;  %v7709_v9 = vld [vmem:[#allocation10 + $0xe0] ss:$8 sps:$4 sm:$0xff]   ;;  %3628 = vmatpush1.bf16.msra.mxu1 %v7718_v8 }
 0x245   : > { %v8877_v2 = vpop.f32.mrf.mxu1  ;;  %3385 = vmatpush1.bf16.msra.mxu0 %v7709_v9  ;;  %3629 = vmatprep.subr.bf16.mxu1 %v7726_v10 }
 0x246   : > { %3386 = vmatprep.subr.bf16.mxu0 %v7717_v5 }
 0x247   : > { %v8884_v39 = vpop.f32.mrf.mxu1 }
 0x248   : > { %3630 = vmatpush1.bf16.msra.mxu1 %v7724_v28 }
 0x249   : > { %v8893_v52 = vpop.f32.mrf.mxu1  ;;  %3387 = vmatpush1.bf16.msra.mxu0 %v7715_v4  ;;  %3631 = vmatprep.subr.bf16.mxu1 %v7732_v33 }
 0x24a   : > { %3388 = vmatprep.subr.bf16.mxu0 %v7723_v24 }
 0x24b   : > { %7504 = vmatmul.mubr.bf16.gmra.mxu1 %v1846_v0  ;;  %v1787_v0 = vrot.slane %v8647_v18, 4 }
 0x24c   : > { %7507 = vmatprep.mubr.bf16.mxu1 %v1850_v1  ;;  %v1717_v1 = vor.u32 %v1716_v14, %v1712_v53  ;;  %3632 = vmatpush1.bf16.msra.mxu1 %v7730_v30  ;;  %v7744_v14 = vld [vmem:[#allocation10 + $0x84] ss:$8 sps:$4 sm:$0xff]  }
 0x24d   : > { %v1870_v22 = vsel %vm1548_vm3, %v1787_v0, %v1819_v43  ;;  %v10518_v43 = vmov 0   ;;  %v7750_v0 = vld [vmem:[#allocation10 + $0x4] ss:$8 sps:$4 sm:$0xff]  }
 0x24e   : > { %v1758_v18 = vsel %vm8805_vm5, %v1717_v1, 0  ;;  %3414 = vmatprep.mubr.bf16.mxu0 %v10518_v43  ;;  %v7748_v1 = vld [vmem:[#allocation10] ss:$8 sps:$4 sm:$0xff]  }
 0x24f   : > { %v1822_v17 = vrot.slane %v1758_v18, 4 }
 0x251   : > { %v1882_v41 = vsel %vm1548_vm3, %v1790_v12, %v1822_v17 }
 0x253   : > { %7508 = vmatmul.mubr.bf16.gmra.mxu1 %v1854_v20  ;;  %v8897_v56 = vpop.f32.mrf.mxu1  ;;  %v1789_v20 = vrot.slane %v8675_v15, 4  ;;  %v1823_v15 = vrot.slane %v1759_v27, 4 }
 0x254   : > { %7511 = vmatprep.mubr.bf16.mxu1 %v1858_v50  ;;  %v7721_v50 = vld [vmem:[#allocation10 + $0xc0] ss:$8 sps:$4 sm:$0xff]  }
 0x255   : > { %v8903_v61 = vpop.f32.mrf.mxu1  ;;  %v1878_v21 = vsel %vm1548_vm3, %v1789_v20, %v1821_v11  ;;  %3389 = vmatpush1.bf16.msra.mxu0 %v7721_v50  ;;  %v1886_v51 = vsel %vm1548_vm3, %v1791_v55, %v1823_v15  ;;  %v8965_v11 = vpop.f32.mrf.mxu0 }
 0x256   : > { %3390 = vmatprep.subr.bf16.mxu0 %v7729_v59 }
 0x257   : > { %v8911_v54 = vpop.f32.mrf.mxu1  ;;  %v8969_v31 = vpop.f32.mrf.mxu0 }
 0x259   : > { %v8916_v25 = vpop.f32.mrf.mxu1  ;;  %3391 = vmatpush1.bf16.msra.mxu0 %v7727_v40 }
 0x25b   : > { %7512 = vmatmul.mubr.bf16.gmra.mxu1 %v1862_v42  ;;  %v7735_v42 = vld [vmem:[#allocation10 + $0xa4] ss:$8 sps:$4 sm:$0xff]  }
 0x25c   : > { %7515 = vmatprep.mubr.bf16.mxu1 %v1866_v47  ;;  %3392 = vmatprep.subr.bf16.mxu0 %v7735_v42  ;;  %v7738_v47 = vld [vmem:[#allocation10 + $0x24] ss:$8 sps:$4 sm:$0xff]  }
 0x25d   : > { %3393 = vmatpush1.bf16.msra.mxu0 %v7733_v36  ;;  %3633 = vmatprep.subr.bf16.mxu1 %v7738_v47 }
 0x25e   : > { %3394 = vmatprep.subr.bf16.mxu0 %v7741_v6  ;;  %3634 = vmatpush1.bf16.msra.mxu1 %v7736_v62 }
 0x25f   : > { %3635 = vmatprep.subr.bf16.mxu1 %v7747_v13 }
 0x261   : > { %3395 = vmatpush1.bf16.msra.mxu0 %v7739_v26 }
 0x262   : > { %3396 = vmatprep.subr.bf16.mxu0 %v7744_v14  ;;  %3636 = vmatpush1.bf16.msra.mxu1 %v7745_v58 }
 0x263   : > { %7516 = vmatmul.mubr.bf16.gmra.mxu1 %v1870_v22  ;;  %v8921_v29 = vpop.f32.mrf.mxu1  ;;  %3637 = vmatprep.subr.bf16.mxu1 %v7750_v0 }
 0x264   : > { %7519 = vmatprep.mubr.bf16.mxu1 %v1874_v7  ;;  %v7753_v7 = vld [vmem:[#allocation10 + $0x174] ss:$8 sps:$4 sm:$0xff]  }
 0x265   : > { %v8924_v35 = vpop.f32.mrf.mxu1  ;;  %3397 = vmatpush1.bf16.msra.mxu0 %v7742_v32 }
 0x266   : > { %3638 = vmatpush1.bf16.msra.mxu1 %v7748_v1  ;;  %3849 = vmatprep.subr.bf16.mxu0 %v7753_v7 }
 0x267   : > { %v8927_v60 = vpop.f32.mrf.mxu1  ;;  %4139 = vmatprep.subr.bf16.mxu1 %v7756_v19 }
 0x269   : > { %v8929_v38 = vpop.f32.mrf.mxu1 }
 0x26b   : > { %7520 = vmatmul.mubr.bf16.gmra.mxu1 %v1878_v21  ;;  %v8971_v21 = vpop.f32.mrf.mxu0 }
 0x26c   : > { %7523 = vmatprep.mubr.bf16.mxu1 %v1882_v41 }
 0x26d   : > { %v8975_v24 = vpop.f32.mrf.mxu0 }
 0x26f   : > { %v8979_v28 = vpop.f32.mrf.mxu0 }
 0x271   : > { %v8981_v55 = vpop.f32.mrf.mxu0 }
 0x273   : > { %7524 = vmatmul.mubr.bf16.gmra.mxu1 %v1886_v51  ;;  %v8931_v34 = vpop.f32.mrf.mxu1  ;;  %v8983_v59 = vpop.f32.mrf.mxu0 }
 0x274   : > { %3655 = vmatprep.mubr.bf16.mxu1 %v10518_v43 }
 0x275   : > { %v8933_v9 = vpop.f32.mrf.mxu1  ;;  %v8985_v33 = vpop.f32.mrf.mxu0 }
 0x277   : > { %v8935_v48 = vpop.f32.mrf.mxu1  ;;  %v8987_v62 = vpop.f32.mrf.mxu0 }
 0x279   : > { %v8937_v49 = vpop.f32.mrf.mxu1  ;;  %v8989_v26 = vpop.f32.mrf.mxu0 }
 0x27a   : > { %10597 = vst [vmem:[#allocation34_spill] sm:$0xff] %v8989_v26 }
 0x27b   : > { %v8991_v13 = vpop.f32.mrf.mxu0 }
 0x27c   : > { %10598 = vst [vmem:[#allocation35_spill] sm:$0xff] %v8991_v13 }
 0x27d   : > { %v8993_v0 = vpop.f32.mrf.mxu0 }
 0x27e   : > { %10599 = vst [vmem:[#allocation36_spill] sm:$0xff] %v8993_v0 }
 0x27f   : > { %v8995_v19 = vpop.f32.mrf.mxu0 }
 0x280   : > { %10600 = vst [vmem:[#allocation37_spill] sm:$0xff] %v8995_v19 }
 0x283   : > { %v8939_v37 = vpop.f32.mrf.mxu1 }
 0x285   : > { %v8943_v53 = vpop.f32.mrf.mxu1 }
 0x287   : > { %v8945_v63 = vpop.f32.mrf.mxu1 }
 0x288   : > { %10586 = vst [vmem:[#allocation23_spill] sm:$0xff] %v8945_v63 }
 0x289   : > { %v8947_v3 = vpop.f32.mrf.mxu1 }
 0x28a   : > { %10587 = vst [vmem:[#allocation24_spill] sm:$0xff] %v8947_v3 }
 0x293   : > { %v8949_v22 = vpop.f32.mrf.mxu1 }
 0x294   : > { %10588 = vst [vmem:[#allocation25_spill] sm:$0xff] %v8949_v22 }
 0x295   : > { %v8951_v4 = vpop.f32.mrf.mxu1 }
 0x296   : > { %10589 = vst [vmem:[#allocation26_spill] sm:$0xff] %v8951_v4 }
 0x297   : > { %v8953_v5 = vpop.f32.mrf.mxu1 }
 0x298   : > { %10590 = vst [vmem:[#allocation27_spill] sm:$0xff] %v8953_v5 }
 0x299   : > { %v8955_v46 = vpop.f32.mrf.mxu1 }
 0x29a   : > { %10591 = vst [vmem:[#allocation28_spill] sm:$0xff] %v8955_v46 }
 0x2a3   : > { %v8957_v18 = vpop.f32.mrf.mxu1 }
 0x2a4   : > { %10592 = vst [vmem:[#allocation29_spill] sm:$0xff] %v8957_v18 }
 0x2a5   : > { %v8959_v8 = vpop.f32.mrf.mxu1 }
 0x2a6   : > { %10593 = vst [vmem:[#allocation30_spill] sm:$0xff] %v8959_v8 }
 0x2a7   : > { %v8963_v57 = vpop.f32.mrf.mxu1 }
 0x2a8   : > { %10594 = vst [vmem:[#allocation31_spill] sm:$0xff] %v8963_v57 }
 0x2a9   : > { %v8967_v17 = vpop.f32.mrf.mxu1 }
 0x2aa   : > { %10595 = vst [vmem:[#allocation32_spill] sm:$0xff] %v8967_v17 }
 0x2b3   : > { %v7381_v20 = vpop.f32.mrf.mxu1 }
 0x2b5   : > { %v2115_v12 = vpop.f32.mrf.mxu1 }
 0x2b7   : > { %v8973_v50 = vpop.f32.mrf.mxu1 }
 0x2b9   : > { %v8977_v41 = vpop.f32.mrf.mxu1 }
 0x2ba   : > { %10596 = vst [vmem:[#allocation33_spill] sm:$0xff] %v8977_v41  ;;  %v8997_v41 = vpop.f32.mrf.mxu0 }
 0x2bb   : > { %v7401_v27 = vpop.f32.mrf.mxu1  ;;  %10601 = vst [vmem:[#allocation38_spill] sm:$0xff] %v8997_v41 }
 0x2bc   : > { %v8999_v57 = vpop.f32.mrf.mxu0 }
 0x2bd   : > { %v2212_v10 = vpop.f32.mrf.mxu1  ;;  %10602 = vst [vmem:[#allocation39_spill] sm:$0xff] %v8999_v57 }
 0x2be   : > { %v9001_v18 = vpop.f32.mrf.mxu0 }
 0x2bf   : > { %v7402_v15 = vpop.f32.mrf.mxu1  ;;  %10603 = vst [vmem:[#allocation40_spill] sm:$0xff] %v9001_v18 }
 0x2c0   : > { %v9005_v4 = vpop.f32.mrf.mxu0 }
 0x2c1   : > { %v2215_v51 = vpop.f32.mrf.mxu1  ;;  %10605 = vst [vmem:[#allocation42_spill] sm:$0xff] %v9005_v4 }
 0x2c2   : > { %v9011_v19 = vpop.f32.mrf.mxu0 }
 0x2c3   : > { %v7405_v40 = vpop.f32.mrf.mxu1  ;;  %10608 = vst [vmem:[#allocation45_spill] sm:$0xff] %v9011_v19  ;;  %v2213_v19 = vadd.f32 %v2212_v10, %v8877_v2 }
 0x2c4   : > { %v9017_v3 = vpop.f32.mrf.mxu0 }
 0x2c5   : > { %v2228_v30 = vpop.f32.mrf.mxu1  ;;  %10611 = vst [vmem:[#allocation48_spill] sm:$0xff] %v9017_v3 }
 0x2c6   : > { %v9021_v18 = vpop.f32.mrf.mxu0 }
 0x2c7   : > { %v7406_v36 = vpop.f32.mrf.mxu1  ;;  %10613 = vst [vmem:[#allocation50_spill] sm:$0xff] %v9021_v18  ;;  %v2229_v18 = vadd.f32 %v2228_v30, %v8903_v61  ;;  %v10621_v30 = vld [vmem:[#allocation36_spill] sm:$0xff] }
 0x2c8   : > { %v9025_v4 = vpop.f32.mrf.mxu0 }
 0x2c9   : > { %v2231_v42 = vpop.f32.mrf.mxu1  ;;  %10615 = vst [vmem:[#allocation52_spill] sm:$0xff] %v9025_v4 }
 0x2ca   : > { %v2232_v4 = vadd.f32 %v2231_v42, %v8916_v25 }
 0x2cb   : > { %v7409_v47 = vpop.f32.mrf.mxu1 }
 0x2cc   : > { %v2253_v2 = vadd.f32 %v7409_v47, %v8921_v29 }
 0x2cd   : > { %v2244_v6 = vpop.f32.mrf.mxu1 }
 0x2cf   : > { %v7410_v14 = vpop.f32.mrf.mxu1 }
 0x2d0   : > { %v2256_v61 = vadd.f32 %v7410_v14, %v8927_v60  ;;  %v10624_v14 = vld [vmem:[#allocation39_spill] sm:$0xff] }
 0x2d1   : > { %v2247_v32 = vpop.f32.mrf.mxu1 }
 0x2d3   : > { %v7413_v58 = vpop.f32.mrf.mxu1 }
 0x2d4   : > { %v2269_v60 = vadd.f32 %v7413_v58, %v8931_v34 }
 0x2d5   : > { %v2260_v1 = vpop.f32.mrf.mxu1 }
 0x2d7   : > { %v7414_v7 = vpop.f32.mrf.mxu1 }
 0x2d9   : > { %v2263_v43 = vpop.f32.mrf.mxu1 }
 0x2db   : > { %v7417_v23 = vpop.f32.mrf.mxu1 }
 0x2dd   : > { %v2276_v44 = vpop.f32.mrf.mxu1 }
 0x2df   : > { %v7418_v17 = vpop.f32.mrf.mxu1 }
 0x2e1   : > { %v2279_v8 = vpop.f32.mrf.mxu1 }
 0x2e3   : > { %v7421_v46 = vpop.f32.mrf.mxu1 }
 0x2e5   : > { %v9003_v5 = vpop.f32.mrf.mxu1 }
 0x2e6   : > { %10604 = vst [vmem:[#allocation41_spill] sm:$0xff] %v9003_v5 }
 0x2e7   : > { %v9007_v0 = vpop.f32.mrf.mxu1 }
 0x2e8   : > { %10606 = vst [vmem:[#allocation43_spill] sm:$0xff] %v9007_v0  ;;  %v2221_v0 = vadd.f32 %v7401_v27, %v8868_v16 }
 0x2e9   : > { %v9009_v22 = vpop.f32.mrf.mxu1 }
 0x2ea   : > { %10607 = vst [vmem:[#allocation44_spill] sm:$0xff] %v9009_v22 }
 0x2eb   : > { %v9013_v13 = vpop.f32.mrf.mxu1 }
 0x2ec   : > { %10609 = vst [vmem:[#allocation46_spill] sm:$0xff] %v9013_v13  ;;  %v2224_v13 = vadd.f32 %v7402_v15, %v8884_v39  ;;  %v2245_v39 = vadd.f32 %v2244_v6, %v8924_v35  ;;  %v9056_v35 = vadd.f32 %v8979_v28, %v2229_v18 }
 0x2ed   : > { %v9015_v41 = vpop.f32.mrf.mxu1 }
 0x2ee   : > { %10610 = vst [vmem:[#allocation47_spill] sm:$0xff] %v9015_v41  ;;  %v2216_v41 = vadd.f32 %v2215_v51, %v8893_v52  ;;  %v2568_v25 = vadd.f32 %v8969_v31, %v2224_v13  ;;  %v9067_v31 = vld [vmem:[%s10502_s5] ss:$0 sm:$0xff]  ;;  %v9077_v34 = vadd.f32 %v8987_v62, %v2245_v39  ;;  %v10623_v62 = vld [vmem:[#allocation38_spill] sm:$0xff] }
 0x2ef   : > { %v9019_v57 = vpop.f32.mrf.mxu1  ;;  %v10625_v13 = vld [vmem:[#allocation26_spill] sm:$0xff] }
 0x2f0   : > { %10612 = vst [vmem:[#allocation49_spill] sm:$0xff] %v9019_v57  ;;  %v2237_v57 = vadd.f32 %v7405_v40, %v8897_v56  ;;  %v2567_v56 = vadd.f32 %v8961_v45, %v2221_v0  ;;  %v2261_v45 = vadd.f32 %v2260_v1, %v8933_v9  ;;  %v2285_v9 = vadd.f32 %v7417_v23, %v8939_v37  ;;  %v10619_v23 = vld [vmem:[#allocation35_spill] sm:$0xff]  ;;  %v10627_v1 = vld [vmem:[#allocation40_spill] sm:$0xff] }
 0x2f1   : > { %v9023_v26 = vpop.f32.mrf.mxu1 }
 0x2f2   : > { %10614 = vst [vmem:[#allocation51_spill] sm:$0xff] %v9023_v26  ;;  %v2240_v26 = vadd.f32 %v7406_v36, %v8911_v54  ;;  %v2565_v54 = vadd.f32 %v8965_v11, %v2213_v19  ;;  %v2571_v29 = vadd.f32 %v8975_v24, %v2237_v57  ;;  %v2272_v11 = vadd.f32 %v7414_v7, %v8935_v48  ;;  %v10622_v36 = vld [vmem:[#allocation37_spill] sm:$0xff]  ;;  %v10628_v19 = vld [vmem:[#allocation42_spill] sm:$0xff] }
 0x2f3   : > { %v7429_v5 = vpop.f32.mrf.mxu1  ;;  %v2264_v57 = vadd.f32 %v2263_v43, %v8937_v49  ;;  %v9074_v24 = vadd.f32 %v8985_v33, %v2253_v2  ;;  %v2277_v48 = vadd.f32 %v2276_v44, %v8943_v53  ;;  %v10617_v49 = vld [vmem:[#allocation34_spill] sm:$0xff]  ;;  %v10620_v44 = vld [vmem:[#allocation25_spill] sm:$0xff]  ;;  %v9097_v33 = vadd.f32 %v10621_v30, %v2269_v60 }
 0x2f4   : > { %v9028_v22 = vadd.f32 %v7429_v5, %v7381_v20  ;;  %v9039_v5 = vpop.f32.mrf.mxu0  ;;  %v9088_v43 = vadd.f32 %v10617_v49, %v2256_v61  ;;  %v2301_v53 = vadd.f32 %v7421_v46, %v10620_v44  ;;  %v9100_v42 = vadd.f32 %v10622_v36, %v2261_v45  ;;  %v10626_v46 = vld [vmem:[#allocation41_spill] sm:$0xff]  ;;  %v10631_v45 = vld [vmem:[#allocation27_spill] sm:$0xff]  ;;  %v10638_v44 = vld [vmem:[#allocation30_spill] sm:$0xff] }
 0x2f5   : > { %v2324_v3 = vpop.f32.mrf.mxu1  ;;  %v9103_v47 = vadd.f32 %v10623_v62, %v2272_v11  ;;  %v2293_v58 = vadd.f32 %v10626_v46, %v10625_v13  ;;  %v9113_v7 = vadd.f32 %v10627_v1, %v2285_v9  ;;  %v10629_v2 = vld [vmem:[#allocation45_spill] sm:$0xff]  ;;  %v10632_v11 = vld [vmem:[#allocation43_spill] sm:$0xff] }
 0x2f6   : > { %v9036_v63 = vadd.f32 %v2324_v3, %v2115_v12  ;;  %v2566_v3 = vadd.f32 %v8971_v21, %v2216_v41  ;;  %v2248_v12 = vadd.f32 %v2247_v32, %v8929_v38  ;;  %v9070_v38 = vadd.f32 %v8983_v59, %v2232_v4  ;;  %v2521_v18 = vpop.f32.mrf.mxu0  ;;  %v10616_v41 = vld [vmem:[#allocation23_spill] sm:$0xff]  ;;  %v9085_v4 = vld [vmem:[%s10503_s6] ss:$0 sm:$0xff] }
 0x2f7   : > { %v7430_v16 = vpop.f32.mrf.mxu1  ;;  %v2288_v28 = vadd.f32 %v7418_v17, %v10616_v41  ;;  %v9108_v32 = vadd.f32 %v10624_v14, %v2264_v57  ;;  %v10633_v57 = vld [vmem:[#allocation28_spill] sm:$0xff]  ;;  %v10640_v36 = vld [vmem:[#allocation31_spill] sm:$0xff]  ;;  %v10641_v62 = vld [vmem:[#allocation49_spill] sm:$0xff] }
 0x2f8   : > { %v9044_v52 = vadd.f32 %v7430_v16, %v8973_v50  ;;  %v9059_v50 = vadd.f32 %v8981_v55, %v2240_v26  ;;  %v7473_v15 = vpop.f32.mrf.mxu0  ;;  %v10618_v55 = vld [vmem:[#allocation24_spill] sm:$0xff]  ;;  %v9093_v37 = vadd.f32 %v10619_v23, %v2248_v12  ;;  %v9116_v16 = vadd.f32 %v10628_v19, %v2277_v48  ;;  %v7759_v19 = vld [vmem:[#allocation10 + $0x164] ss:$8 sps:$4 sm:$0xff]  }
 0x2f9   : > { %v9048_v20 = vpop.f32.mrf.mxu1  ;;  %v2280_v51 = vadd.f32 %v2279_v8, %v10618_v55  ;;  %v9119_v39 = vadd.f32 %v10629_v2, %v2288_v28  ;;  %v10630_v12 = vld [vmem:[#allocation48_spill] sm:$0xff] }
 0x2fa   : > { %v10643_v2 = vld [vmem:[#allocation32_spill] sm:$0xff] }
 0x2fb   : > { %v7497_v27 = vpop.f32.mrf.mxu1  ;;  %v9124_v60 = vadd.f32 %v10630_v12, %v2280_v51  ;;  %v10636_v51 = vld [vmem:[#allocation29_spill] sm:$0xff] }
 0x2fc   : > { %v2825_v21 = vadd.f32 %v7497_v27, %v2567_v56  ;;  %v2534_v56 = vpop.f32.mrf.mxu0  ;;  %v2304_v27 = vadd.f32 %v10632_v11, %v10631_v45 }
 0x2fd   : > { %v2696_v10 = vpop.f32.mrf.mxu1 }
 0x2fe   : > { %v2864_v40 = vmul.f32 %v9067_v31, %v2825_v21  ;;  %v2823_v59 = vadd.f32 %v2696_v10, %v2565_v54  ;;  %v10634_v21 = vld [vmem:[#allocation44_spill] sm:$0xff]  ;;  %v10635_v10 = vld [vmem:[#allocation50_spill] sm:$0xff]  ;;  %v7474_v13 = vpop.f32.mrf.mxu0  ;;  %v9155_v45 = vadd.f32 %v9039_v5, %v2304_v27 }
 0x2ff   : > { %v7498_v17 = vpop.f32.mrf.mxu1  ;;  %v2296_v9 = vadd.f32 %v10634_v21, %v10633_v57  ;;  %v9131_v28 = vadd.f32 %v10635_v10, %v2301_v53  ;;  %v10642_v53 = vld [vmem:[#allocation52_spill] sm:$0xff]  ;;  %v7757_v5 = vld [vmem:[#allocation10 + $0x160] ss:$8 sps:$4 sm:$0xff]  }
 0x300   : > { %v2903_v8 = vadd.f32 %v9085_v4, %v2864_v40  ;;  %v2862_v6 = vmul.f32 %v9067_v31, %v2823_v59  ;;  %v2826_v26 = vadd.f32 %v7498_v17, %v2568_v25  ;;  %v10637_v59 = vld [vmem:[#allocation46_spill] sm:$0xff]  ;;  %v10639_v17 = vld [vmem:[#allocation47_spill] sm:$0xff]  ;;  %v9144_v14 = vadd.f32 %v10642_v53, %v2293_v58 }
 0x301   : > { %v2699_v0 = vpop.f32.mrf.mxu1  ;;  %v2317_v23 = vadd.f32 %v10637_v59, %v10636_v51  ;;  %v2309_v30 = vadd.f32 %v10639_v17, %v10638_v44  ;;  %v9157_v58 = vadd.f32 %v2521_v18, %v2296_v9  ;;  %v2537_v9 = vpop.f32.mrf.mxu0 }
 0x302   : > { %v2901_v61 = vadd.f32 %v9085_v4, %v2862_v6  ;;  %v2865_v54 = vmul.f32 %v9067_v31, %v2826_v26  ;;  %v2824_v25 = vadd.f32 %v2699_v0, %v2566_v3  ;;  %v2935_v48 = vmax.f32 %v2903_v8, 0.0  ;;  %v7751_v26 = vld [vmem:[#allocation10 + $0x170] ss:$8 sps:$4 sm:$0xff]  }
 0x303   : > { %v7501_v41 = vpop.f32.mrf.mxu1  ;;  %v2320_v8 = vadd.f32 %v10641_v62, %v10640_v36  ;;  %v9166_v27 = vadd.f32 %v7473_v15, %v2317_v23  ;;  %v9168_v18 = vadd.f32 %v2534_v56, %v2309_v30  ;;  %v7477_v56 = vpop.f32.mrf.mxu0 }
 0x304   : > { %v2933_v49 = vmax.f32 %v2901_v61, 0.0  ;;  %v9134_v55 = vadd.f32 %v9085_v4, %v2865_v54  ;;  %v2863_v3 = vmul.f32 %v9067_v31, %v2824_v25  ;;  %v2829_v40 = vadd.f32 %v7501_v41, %v2571_v29  ;;  %v10644_v61 = vld [vmem:[#allocation51_spill] sm:$0xff] }
 0x305   : > { %v2712_v6 = vpop.f32.mrf.mxu1  ;;  %v2312_v54 = vadd.f32 %v10644_v61, %v10643_v2  ;;  %v9172_v59 = vadd.f32 %v7474_v13, %v2320_v8 }
 0x306   : > { %v6894_v46 = vpack.c.bf16 %v2935_v48, %v2933_v49  ;;  %v2936_v0 = vmax.f32 %v9134_v55, 0.0  ;;  %v9148_v29 = vadd.f32 %v9085_v4, %v2863_v3  ;;  %v2868_v1 = vmul.f32 %v9067_v31, %v2829_v40 }
 0x307   : > { %v2827_v25 = vadd.f32 %v2712_v6, %v9056_v35  ;;  %v7502_v12 = vpop.f32.mrf.mxu1  ;;  %v10645_v35 = vmov 0   ;;  %v9177_v23 = vadd.f32 %v2537_v9, %v2312_v54  ;;  %v7771_v54 = vld [vmem:[#allocation10 + $0x144] ss:$8 sps:$4 sm:$0xff]  }
 0x308   : > { %v2966_v11 = vpack.c.bf16 %v2936_v0, %v2935_v48  ;;  %v2934_v57 = vmax.f32 %v9148_v29, 0.0  ;;  %v2907_v21 = vadd.f32 %v9085_v4, %v2868_v1  ;;  %v2830_v41 = vadd.f32 %v7502_v12, %v9059_v50  ;;  %3415 = vmatmul.mubr.bf16.vlgmr.msra.gmra.mxu0 %v6894_v46  ;;  %v7765_v50 = vld [vmem:[#allocation10 + $0x154] ss:$8 sps:$4 sm:$0xff]  }
 0x309   : > { %v2866_v10 = vmul.f32 %v9067_v31, %v2827_v25  ;;  %v2715_v3 = vpop.f32.mrf.mxu1  ;;  %3424 = vmatprep.mubr.bf16.mxu0 %v10645_v35  ;;  %3850 = vmatpush1.bf16.msra.mxu0 %v7751_v26 }
 0x30a   : > { %v2990_v48 = vshrl.u32 %v2966_v11, 16  ;;  %v2993_v40 = vshll.u32 %v2966_v11, 16  ;;  %v2965_v51 = vpack.c.bf16 %v2934_v57, %v2933_v49  ;;  %3851 = vmatprep.subr.bf16.mxu0 %v7759_v19  ;;  %v2869_v17 = vmul.f32 %v9067_v31, %v2830_v41 }
 0x30b   : > { %v2905_v44 = vadd.f32 %v9085_v4, %v2866_v10  ;;  %v2828_v36 = vadd.f32 %v2715_v3, %v9070_v38  ;;  %v7505_v15 = vpop.f32.mrf.mxu1  ;;  %v2939_v26 = vmax.f32 %v2907_v21, 0.0  ;;  %v7763_v38 = vld [vmem:[#allocation10 + $0x150] ss:$8 sps:$4 sm:$0xff]   ;;  %v2550_v10 = vpop.f32.mrf.mxu0 }
 0x30c   : > { %v9179_v30 = vrot.slane %v2990_v48, 3  ;;  %v3175_v62 = vrot.slane %v2993_v40, 1  ;;  %v2982_v6 = vshrl.u32 %v2965_v51, 16  ;;  %v9181_v49 = vrot.slane %v2993_v40, 4 }
 0x30d   : > { %v2985_v53 = vshll.u32 %v2965_v51, 16  ;;  %v9184_v8 = vadd.f32 %v9085_v4, %v2869_v17  ;;  %v2867_v13 = vmul.f32 %v9067_v31, %v2828_v36  ;;  %v2728_v46 = vpop.f32.mrf.mxu1  ;;  %3852 = vmatpush1.bf16.msra.mxu0 %v7757_v5  ;;  %v2937_v2 = vmax.f32 %v2905_v44, 0.0  ;;  %v7769_v17 = vld [vmem:[#allocation10 + $0x140] ss:$8 sps:$4 sm:$0xff]  }
 0x30e   : > { %v3176_v1 = vor.u32 %v3175_v62, %v2990_v48  ;;  %v2984_v19 = vrot.slane %v2982_v6, 3  ;;  %v2833_v61 = vadd.f32 %v7505_v15, %v9074_v24  ;;  %3853 = vmatprep.subr.bf16.mxu0 %v7765_v50  ;;  %v2831_v5 = vadd.f32 %v2728_v46, %v9077_v34  ;;  %v7777_v15 = vld [vmem:[#allocation10 + $0x134] ss:$8 sps:$4 sm:$0xff]   ;;  %v10647_v46 = vld [vmem:[#allocation33_spill] sm:$0xff] }
 0x30f   : > { %v2987_v25 = vrot.slane %v2985_v53, 4  ;;  %v3173_v12 = vrot.slane %v2985_v53, 1  ;;  %v10527_v11 = vmax.f32 %v9184_v8, 0.0  ;;  %v9190_v21 = vadd.f32 %v9085_v4, %v2867_v13  ;;  %v7506_v41 = vpop.f32.mrf.mxu1  ;;  %v7478_v13 = vpop.f32.mrf.mxu0 }
 0x310   : > { %v2872_v3 = vmul.f32 %v9067_v31, %v2833_v61  ;;  %v2834_v9 = vadd.f32 %v7506_v41, %v9088_v43  ;;  %v9196_v48 = vadd.f32 %v7477_v56, %v9028_v22  ;;  %v2996_v24 = vor.u32 %v9181_v49, %v9179_v30 }
 0x311   : > { %v3174_v40 = vor.u32 %v3173_v12, %v2982_v6  ;;  %v9202_v51 = vpack.c.bf16 %v10527_v11, %v2939_v26  ;;  %v10528_v50 = vmax.f32 %v9190_v21, 0.0  ;;  %v2731_v44 = vpop.f32.mrf.mxu1  ;;  %3854 = vmatpush1.bf16.msra.mxu0 %v7763_v38  ;;  %v2870_v43 = vmul.f32 %v9067_v31, %v2831_v5 }
 0x312   : > { %v2911_v34 = vadd.f32 %v9085_v4, %v2872_v3  ;;  %v2873_v22 = vmul.f32 %v9067_v31, %v2834_v9  ;;  %v6895_v36 = vpack.c.bf16 %v2939_v26, %v2937_v2  ;;  %3855 = vmatprep.subr.bf16.mxu0 %v7771_v54  ;;  %v3222_v30 = vsel %vm8805_vm5, %v3176_v1, 0 }
 0x313   : > { %v2988_v62 = vor.u32 %v2987_v25, %v2984_v19  ;;  %v3221_v6 = vsel %vm8805_vm5, %v3174_v40, 0  ;;  %v9214_v49 = vpack.c.bf16 %v10528_v50, %v2937_v2  ;;  %v7509_v53 = vpop.f32.mrf.mxu1  ;;  %v2328_v38 = vadd.f32 %v9048_v20, %v10647_v46  ;;  %v7775_v20 = vld [vmem:[#allocation10 + $0x130] ss:$8 sps:$4 sm:$0xff]  }
 0x314   : > { %v9218_v61 = vcombine.low %v3221_v6, %v3222_v30  ;;  %v9221_v26 = vadd.f32 %v9085_v4, %v2870_v43  ;;  %3425 = vmatmul.mubr.bf16.gmra.mxu0 %v6895_v36  ;;  %v9224_v1 = vadd.f32 %v2550_v10, %v9036_v63  ;;  %v2943_v54 = vmax.f32 %v2911_v34, 0.0  ;;  %v7754_v40 = vld [vmem:[#allocation10 + $0x1f0] ss:$8 sps:$4 sm:$0xff]   ;;  %v2553_v36 = vpop.f32.mrf.mxu0 }
 0x315   : > { %v10530_v19 = vshrl.u32 %v9214_v49, 16  ;;  %v9228_v2 = vadd.f32 %v9085_v4, %v2873_v22  ;;  %v2744_v25 = vpop.f32.mrf.mxu1  ;;  %3434 = vmatprep.mubr.bf16.mxu0 %v10645_v35  ;;  %3856 = vmatpush1.bf16.msra.mxu0 %v7769_v17  ;;  %v9232_v12 = vadd.f32 %v7478_v13, %v9044_v52  ;;  %v2832_v3 = vadd.f32 %v2731_v44, %v9093_v37  ;;  %v7762_v44 = vld [vmem:[#allocation10 + $0x1e4] ss:$8 sps:$4 sm:$0xff]  }
 0x316   : > { %10648 = vst [vmem:[#allocation23_spill] sm:$0xff] %v9218_v61  ;;  %v2941_v41 = vmax.f32 %v9221_v26, 0.0  ;;  %v2837_v63 = vadd.f32 %v7509_v53, %v9097_v33  ;;  %v2835_v10 = vadd.f32 %v2744_v25, %v9100_v42  ;;  %3857 = vmatprep.subr.bf16.mxu0 %v7777_v15  ;;  %v3001_v5 = vshll.u32 %v9214_v49, 16  ;;  %v7783_v53 = vld [vmem:[#allocation10 + $0x124] ss:$8 sps:$4 sm:$0xff]  }
 0x317   : > { %10649 = vst [vmem:[#allocation34_spill] sm:$0xff] %v9228_v2  ;;  %v10525_v9 = vmax.f32 %v9228_v2, 0.0  ;;  %v3125_v17 = vsel %vm8705_vm2, 0, %v2988_v62  ;;  %v3126_v52 = vsel %vm8705_vm2, 0, %v2996_v24  ;;  %v7510_v43 = vpop.f32.mrf.mxu1  ;;  %v2871_v22 = vmul.f32 %v9067_v31, %v2832_v3  ;;  %v7760_v25 = vld [vmem:[#allocation10 + $0x1e0] ss:$8 sps:$4 sm:$0xff]  }
 0x318   : > { %v2876_v37 = vmul.f32 %v9067_v31, %v2837_v63  ;;  %v2874_v33 = vmul.f32 %v9067_v31, %v2835_v10  ;;  %v6655_v42 = vcombine.low %v3125_v17, %v3126_v52  ;;  %v2838_v30 = vadd.f32 %v7510_v43, %v9103_v47  ;;  %v7781_v47 = vld [vmem:[#allocation10 + $0x120] ss:$8 sps:$4 sm:$0xff]   ;;  %v7789_v52 = vld [vmem:[#allocation10 + $0x114] ss:$8 sps:$4 sm:$0xff]  }
 0x319   : > { %v9249_v15 = vpack.c.bf16 %v10525_v9, %v2943_v54  ;;  %v6896_v62 = vpack.c.bf16 %v2943_v54, %v2941_v41  ;;  %v2747_v6 = vpop.f32.mrf.mxu1  ;;  %v3000_v24 = vrot.slane %v10530_v19, 3  ;;  %3858 = vmatpush1.bf16.msra.mxu0 %v7775_v20  ;;  %v9255_v13 = vadd.f32 %v9085_v4, %v2871_v22  ;;  %v7768_v22 = vld [vmem:[#allocation10 + $0x1d4] ss:$8 sps:$4 sm:$0xff]  }
 0x31a   : > { %v9258_v46 = vadd.f32 %v9085_v4, %v2876_v37  ;;  %3656 = vmatmul.mubr.bf16.vlgmr.msra.gmra.mxu1 %v6655_v42  ;;  %v2836_v26 = vadd.f32 %v2747_v6, %v9108_v32  ;;  %v9261_v3 = vadd.f32 %v2553_v36, %v2328_v38  ;;  %v10529_v54 = vshrl.u32 %v9202_v51, 16  ;;  %3859 = vmatprep.subr.bf16.mxu0 %v7783_v53 }
 0x31b   : > { %10651 = vst [vmem:[#allocation24_spill] sm:$0xff] %v9255_v13  ;;  %v3009_v63 = vshll.u32 %v9202_v51, 16  ;;  %4140 = vmatpush1.bf16.msra.mxu1 %v7754_v40  ;;  %v2877_v20 = vmul.f32 %v9067_v31, %v2838_v30  ;;  %v7513_v10 = vpop.f32.mrf.mxu1  ;;  %3665 = vmatprep.mubr.bf16.mxu1 %v10645_v35  ;;  %v3003_v17 = vrot.slane %v3001_v5, 4  ;;  %v9273_v32 = vpack.c.bf16 %v2936_v0, %v2934_v57  ;;  %v7766_v30 = vld [vmem:[#allocation10 + $0x1d0] ss:$8 sps:$4 sm:$0xff]  }
 0x31c   : > { %v10526_v38 = vmax.f32 %v9255_v13, 0.0  ;;  %v2913_v43 = vadd.f32 %v9085_v4, %v2874_v33  ;;  %3435 = vmatmul.mubr.bf16.gmra.mxu0 %v6896_v62  ;;  %v2875_v40 = vmul.f32 %v9067_v31, %v2836_v26  ;;  %4141 = vmatprep.subr.bf16.mxu1 %v7762_v44  ;;  %v3025_v37 = vshll.u32 %v9249_v15, 16  ;;  %v7787_v62 = vld [vmem:[#allocation10 + $0x110] ss:$8 sps:$4 sm:$0xff]  }
 0x31d   : > { %v9280_v42 = vadd.f32 %v9085_v4, %v2877_v20  ;;  %v2841_v29 = vadd.f32 %v7513_v10, %v9113_v7  ;;  %v2760_v36 = vpop.f32.mrf.mxu1  ;;  %v3004_v55 = vor.u32 %v3003_v17, %v3000_v24  ;;  %3444 = vmatprep.mubr.bf16.mxu0 %v10645_v35  ;;  %v2947_v57 = vmax.f32 %v9258_v46, 0.0  ;;  %3860 = vmatpush1.bf16.msra.mxu0 %v7781_v47  ;;  %v7792_v46 = vld [vmem:[#allocation10 + $0x104] ss:$8 sps:$4 sm:$0xff]  }
 0x31e   : > { %v9286_v0 = vpack.c.bf16 %v10526_v38, %v2941_v41  ;;  %v9290_v33 = vadd.f32 %v9085_v4, %v2875_v40  ;;  %v2839_v44 = vadd.f32 %v2760_v36, %v9116_v16  ;;  %v3008_v24 = vrot.slane %v10529_v54, 3  ;;  %3861 = vmatprep.subr.bf16.mxu0 %v7789_v52  ;;  %v7774_v10 = vld [vmem:[#allocation10 + $0x1c4] ss:$8 sps:$4 sm:$0xff]   ;;  %v7772_v38 = vld [vmem:[#allocation10 + $0x1c0] ss:$8 sps:$4 sm:$0xff]  }
 0x31f   : > { %10652 = vst [vmem:[#allocation35_spill] sm:$0xff] %v9280_v42  ;;  %v10524_v7 = vmax.f32 %v9280_v42, 0.0  ;;  %v2880_v6 = vmul.f32 %v9067_v31, %v2841_v29  ;;  %v3011_v53 = vrot.slane %v3009_v63, 4  ;;  %4142 = vmatpush1.bf16.msra.mxu1 %v7760_v25  ;;  %v7514_v41 = vpop.f32.mrf.mxu1  ;;  %v2945_v20 = vmax.f32 %v2913_v43, 0.0 }
 0x320   : > { %10653 = vst [vmem:[#allocation25_spill] sm:$0xff] %v9290_v33  ;;  %v3017_v26 = vshll.u32 %v9286_v0, 16  ;;  %v10531_v16 = vmax.f32 %v9290_v33, 0.0  ;;  %v2878_v47 = vmul.f32 %v9067_v31, %v2839_v44  ;;  %4143 = vmatprep.subr.bf16.mxu1 %v7768_v22  ;;  %v3127_v52 = vsel %vm8705_vm2, 0, %v3004_v55 }
 0x321   : > { %v9302_v17 = vpack.c.bf16 %v10524_v7, %v2947_v57  ;;  %v9305_v40 = vadd.f32 %v9085_v4, %v2880_v6  ;;  %v3012_v25 = vor.u32 %v3011_v53, %v3008_v24  ;;  %v2763_v29 = vpop.f32.mrf.mxu1  ;;  %v9309_v36 = vrot.slane %v3009_v63, 1  ;;  %3862 = vmatpush1.bf16.msra.mxu0 %v7787_v62  ;;  %v7790_v7 = vld [vmem:[#allocation10 + $0x100] ss:$8 sps:$4 sm:$0xff]  }
 0x322   : > { %v9313_v43 = vrot.slane %v3001_v5, 1  ;;  %v10534_v22 = vshrl.u32 %v9249_v15, 16  ;;  %v9317_v44 = vadd.f32 %v9085_v4, %v2878_v47  ;;  %v9321_v6 = vrot.slane %v3025_v37, 1  ;;  %3863 = vmatprep.subr.bf16.mxu0 %v7792_v46  ;;  %v7780_v46 = vld [vmem:[#allocation10 + $0x1b4] ss:$8 sps:$4 sm:$0xff]  }
 0x323   : > { %v10536_v55 = vshrl.u32 %v9286_v0, 16  ;;  %v9324_v24 = vrot.slane %v3017_v26, 1  ;;  %v3128_v63 = vsel %vm8705_vm2, 0, %v3012_v25  ;;  %v7517_v5 = vpop.f32.mrf.mxu1  ;;  %4144 = vmatpush1.bf16.msra.mxu1 %v7766_v30  ;;  %v9330_v53 = vpack.c.bf16 %v10531_v16, %v2945_v20 }
 0x324   : > { %v2951_v62 = vmax.f32 %v9305_v40, 0.0  ;;  %v2949_v47 = vmax.f32 %v9317_v44, 0.0  ;;  %v6656_v9 = vcombine.low %v3127_v52, %v3128_v63  ;;  %4145 = vmatprep.subr.bf16.mxu1 %v7774_v10  ;;  %v2842_v50 = vadd.f32 %v7514_v41, %v9119_v39  ;;  %v7786_v63 = vld [vmem:[#allocation10 + $0x1a4] ss:$8 sps:$4 sm:$0xff]  }
 0x325   : > { %v6897_v54 = vpack.c.bf16 %v2947_v57, %v2945_v20  ;;  %v2840_v25 = vadd.f32 %v2763_v29, %v9124_v60  ;;  %v2776_v30 = vpop.f32.mrf.mxu1  ;;  %v10537_v19 = vshll.u32 %v9302_v17, 16  ;;  %v2845_v40 = vadd.f32 %v7517_v5, %v9131_v28  ;;  %3864 = vmatpush1.bf16.msra.mxu0 %v7790_v7 }
 0x326   : > { %v6898_v16 = vpack.c.bf16 %v2951_v62, %v2949_v47  ;;  %3666 = vmatmul.mubr.bf16.gmra.mxu1 %v6656_v9  ;;  %v2843_v44 = vadd.f32 %v2776_v30, %v9144_v14  ;;  %v2881_v10 = vmul.f32 %v9067_v31, %v2842_v50  ;;  %v3016_v39 = vrot.slane %v10536_v55, 3  ;;  %v7778_v50 = vld [vmem:[#allocation10 + $0x1b0] ss:$8 sps:$4 sm:$0xff]  }
 0x327   : > { %3445 = vmatmul.mubr.bf16.gmra.mxu0 %v6897_v54  ;;  %v2879_v52 = vmul.f32 %v9067_v31, %v2840_v25  ;;  %3675 = vmatprep.mubr.bf16.mxu1 %v10645_v35  ;;  %v3019_v60 = vrot.slane %v3017_v26, 4  ;;  %v7518_v57 = vpop.f32.mrf.mxu1  ;;  %v2884_v41 = vmul.f32 %v9067_v31, %v2845_v40  ;;  %v3024_v28 = vrot.slane %v10534_v22, 3  ;;  %v7798_v22 = vld [vmem:[#allocation10 + $0x184] ss:$8 sps:$4 sm:$0xff]   ;;  %v10679_v56 = vld [vmem:[#allocation35_spill] sm:$0xff] }
 0x328   : > { %v2882_v9 = vmul.f32 %v9067_v31, %v2843_v44  ;;  %v3027_v14 = vrot.slane %v3025_v37, 4  ;;  %3454 = vmatprep.mubr.bf16.mxu0 %v10645_v35  ;;  %4146 = vmatpush1.bf16.msra.mxu1 %v7772_v38  ;;  %v9353_v54 = vadd.f32 %v9085_v4, %v2881_v10  ;;  %v2846_v20 = vadd.f32 %v7518_v57, %v9155_v45 }
 0x329   : > { %v9356_v7 = vadd.f32 %v9085_v4, %v2879_v52  ;;  %v3020_v26 = vor.u32 %v3019_v60, %v3016_v39  ;;  %v2779_v29 = vpop.f32.mrf.mxu1  ;;  %4147 = vmatprep.subr.bf16.mxu1 %v7780_v46  ;;  %v2923_v5 = vadd.f32 %v9085_v4, %v2884_v41 }
 0x32a   : > { %10654 = vst [vmem:[#allocation36_spill] sm:$0xff] %v9353_v54  ;;  %v2921_v37 = vadd.f32 %v9085_v4, %v2882_v9  ;;  %v3028_v25 = vor.u32 %v3027_v14, %v3024_v28  ;;  %v2844_v38 = vadd.f32 %v2779_v29, %v9157_v58  ;;  %v10532_v30 = vmax.f32 %v9353_v54, 0.0  ;;  %v7784_v14 = vld [vmem:[#allocation10 + $0x1a0] ss:$8 sps:$4 sm:$0xff]  }
 0x32b   : > { %10655 = vst [vmem:[#allocation37_spill] sm:$0xff] %v9356_v7  ;;  %v10533_v40 = vmax.f32 %v9356_v7, 0.0  ;;  %v3129_v44 = vsel %vm8705_vm2, 0, %v3020_v26  ;;  %v2885_v10 = vmul.f32 %v9067_v31, %v2846_v20  ;;  %v7521_v45 = vpop.f32.mrf.mxu1  ;;  %v2955_v52 = vmax.f32 %v2923_v5, 0.0  ;;  %v7795_v5 = vld [vmem:[#allocation10 + $0x194] ss:$8 sps:$4 sm:$0xff]  }
 0x32c   : > { %v2953_v46 = vmax.f32 %v2921_v37, 0.0  ;;  %v3130_v39 = vsel %vm8705_vm2, 0, %v3028_v25  ;;  %v2883_v60 = vmul.f32 %v9067_v31, %v2844_v38  ;;  %4148 = vmatpush1.bf16.msra.mxu1 %v7778_v50  ;;  %v3033_v58 = vshll.u32 %v9330_v53, 16 }
 0x32d   : > { %v9373_v57 = vpack.c.bf16 %v10532_v30, %v2951_v62  ;;  %v9377_v41 = vpack.c.bf16 %v10533_v40, %v2949_v47  ;;  %v6657_v9 = vcombine.low %v3129_v44, %v3130_v39  ;;  %v2792_v28 = vpop.f32.mrf.mxu1  ;;  %4149 = vmatprep.subr.bf16.mxu1 %v7786_v63  ;;  %v9380_v20 = vadd.f32 %v9085_v4, %v2885_v10 }
 0x32e   : > { %v6899_v26 = vpack.c.bf16 %v2955_v52, %v2953_v46  ;;  %v9383_v50 = vadd.f32 %v9085_v4, %v2883_v60  ;;  %v2849_v29 = vadd.f32 %v7521_v45, %v9166_v27  ;;  %v10542_v62 = vshrl.u32 %v9330_v53, 16 }
 0x32f   : > { %10656 = vst [vmem:[#allocation38_spill] sm:$0xff] %v9380_v20  ;;  %v10535_v37 = vshrl.u32 %v9373_v57, 16  ;;  %v3057_v47 = vshll.u32 %v9373_v57, 16  ;;  %v10540_v25 = vshrl.u32 %v9377_v41, 16  ;;  %3676 = vmatmul.mubr.bf16.gmra.mxu1 %v6657_v9  ;;  %3455 = vmatmul.mubr.bf16.gmra.mxu0 %v6898_v16  ;;  %v7522_v63 = vpop.f32.mrf.mxu1  ;;  %v10538_v38 = vmax.f32 %v9380_v20, 0.0 }
 0x330   : > { %10657 = vst [vmem:[#allocation39_spill] sm:$0xff] %v9383_v50  ;;  %v10539_v44 = vmax.f32 %v9383_v50, 0.0  ;;  %v2888_v10 = vmul.f32 %v9067_v31, %v2849_v29  ;;  %3685 = vmatprep.mubr.bf16.mxu1 %v10645_v35  ;;  %v2847_v27 = vadd.f32 %v2792_v28, %v9168_v18  ;;  %3464 = vmatprep.mubr.bf16.mxu0 %v10645_v35  ;;  %v9398_v45 = vrot.slane %v10537_v19, 1  ;;  %v7793_v29 = vld [vmem:[#allocation10 + $0x190] ss:$8 sps:$4 sm:$0xff]  }
 0x331   : > { %v9400_v39 = vrot.slane %v3033_v58, 1  ;;  %v9404_v16 = vrot.slane %v10535_v37, 3  ;;  %v3049_v60 = vshll.u32 %v9377_v41, 16  ;;  %v2795_v9 = vpop.f32.mrf.mxu1  ;;  %4150 = vmatpush1.bf16.msra.mxu1 %v7784_v14  ;;  %v3059_v30 = vrot.slane %v3057_v47, 4 }
 0x332   : > { %v9407_v40 = vrot.slane %v3057_v47, 1  ;;  %v9411_v18 = vpack.c.bf16 %v10538_v38, %v2955_v52  ;;  %v9415_v28 = vpack.c.bf16 %v10539_v44, %v2953_v46  ;;  %4151 = vmatprep.subr.bf16.mxu1 %v7795_v5  ;;  %v3048_v37 = vrot.slane %v10540_v25, 3 }
 0x333   : > { %v9420_v55 = vadd.f32 %v9085_v4, %v2888_v10  ;;  %v2886_v14 = vmul.f32 %v9067_v31, %v2847_v27  ;;  %v3032_v47 = vrot.slane %v10542_v62, 3  ;;  %v7525_v19 = vpop.f32.mrf.mxu1  ;;  %v3051_v44 = vrot.slane %v3049_v60, 4  ;;  %v7796_v27 = vld [vmem:[#allocation10 + $0x180] ss:$8 sps:$4 sm:$0xff]  }
 0x334   : > { %v10548_v52 = vshrl.u32 %v9411_v18, 16  ;;  %v3073_v38 = vshll.u32 %v9411_v18, 16  ;;  %v3065_v5 = vshll.u32 %v9415_v28, 16  ;;  %v9429_v11 = vrot.slane %v3049_v60, 1 }
 0x335   : > { %v2925_v10 = vadd.f32 %v9085_v4, %v2886_v14  ;;  %v3035_v25 = vrot.slane %v3033_v58, 4  ;;  %v2808_v20 = vpop.f32.mrf.mxu1  ;;  %4152 = vmatpush1.bf16.msra.mxu1 %v7793_v29  ;;  %v2959_v54 = vmax.f32 %v9420_v55, 0.0  ;;  %v10658_v46 = vshrl.u32 %v9302_v17, 16 }
 0x336   : > { %v9434_v62 = vrot.slane %v10548_v52, 3  ;;  %v9436_v50 = vrot.slane %v3073_v38, 4  ;;  %4153 = vmatprep.subr.bf16.mxu1 %v7798_v22  ;;  %v10659_v60 = vshrl.u32 %v9415_v28, 16  ;;  %v3067_v14 = vrot.slane %v3065_v5, 4 }
 0x337   : > { %v3040_v7 = vrot.slane %v10658_v46, 3  ;;  %v2957_v58 = vmax.f32 %v2925_v10, 0.0  ;;  %v3036_v42 = vor.u32 %v3035_v25, %v3032_v47  ;;  %3465 = vmatmul.mubr.bf16.gmra.mxu0 %v6899_v26  ;;  %v10660_v29 = vshll.u32 %v9302_v17, 16  ;;  %v7526_v13 = vpop.f32.mrf.mxu1 }
 0x338   : > { %v3064_v61 = vrot.slane %v10659_v60, 3  ;;  %v2850_v52 = vadd.f32 %v7522_v63, %v9172_v59  ;;  %v2848_v2 = vadd.f32 %v2795_v9, %v9177_v23  ;;  %v2853_v55 = vadd.f32 %v7525_v19, %v9196_v48  ;;  %3474 = vmatprep.mubr.bf16.mxu0 %v10645_v35 }
 0x339   : > { %v3043_v33 = vrot.slane %v10660_v29, 4  ;;  %v6900_v22 = vpack.c.bf16 %v2959_v54, %v2957_v58  ;;  %v3131_v46 = vsel %vm8705_vm2, 0, %v3036_v42  ;;  %v2851_v10 = vadd.f32 %v2808_v20, %v9224_v1  ;;  %4154 = vmatpush1.bf16.msra.mxu1 %v7796_v27  ;;  %v2811_v20 = vpop.f32.mrf.mxu1 }
 0x33a   : > { %v3052_v25 = vor.u32 %v3051_v44, %v3048_v37  ;;  %v2889_v47 = vmul.f32 %v9067_v31, %v2850_v52  ;;  %v2887_v59 = vmul.f32 %v9067_v31, %v2848_v2  ;;  %v2892_v23 = vmul.f32 %v9067_v31, %v2853_v55 }
 0x33b   : > { %v3044_v26 = vor.u32 %v3043_v33, %v3040_v7  ;;  %v2890_v48 = vmul.f32 %v9067_v31, %v2851_v10  ;;  %v3060_v19 = vor.u32 %v3059_v30, %v9404_v16  ;;  %v2854_v42 = vadd.f32 %v7526_v13, %v9232_v12 }
 0x33c   : > { %v3133_v63 = vsel %vm8705_vm2, 0, %v3052_v25  ;;  %v9463_v33 = vadd.f32 %v9085_v4, %v2889_v47  ;;  %v9466_v7 = vadd.f32 %v9085_v4, %v2887_v59  ;;  %v2931_v2 = vadd.f32 %v9085_v4, %v2892_v23 }
 0x33d   : > { %v3132_v1 = vsel %vm8705_vm2, 0, %v3044_v26  ;;  %v2929_v30 = vadd.f32 %v9085_v4, %v2890_v48  ;;  %v3134_v44 = vsel %vm8705_vm2, 0, %v3060_v19  ;;  %v2893_v12 = vmul.f32 %v9067_v31, %v2854_v42 }
 0x33e   : > { %v6658_v37 = vcombine.low %v3131_v46, %v3132_v1  ;;  %v2960_v13 = vmax.f32 %v9463_v33, 0.0  ;;  %v2958_v16 = vmax.f32 %v9466_v7, 0.0  ;;  %v2963_v9 = vmax.f32 %v2931_v2, 0.0  ;;  %v7799_v33 = vld [vmem:[#allocation11 + $0xf8] sm:$0xff]  }
 0x33f   : > { %v6659_v52 = vcombine.low %v3133_v63, %v3134_v44  ;;  %v2961_v27 = vmax.f32 %v2929_v30, 0.0  ;;  %v9476_v60 = vadd.f32 %v9085_v4, %v2893_v12  ;;  %3475 = vmatmul.mubr.bf16.gmra.mxu0 %v6900_v22  ;;  %v2852_v29 = vadd.f32 %v2811_v20, %v9261_v3  ;;  %v7800_v7 = vld [vmem:[#allocation11 + $0xb8] sm:$0xff]   ;;  %7079 = vmatprep.subr.bf16.mxu0 %v7799_v33  ;;  %v7826_v33 = vld [vmem:[#allocation11 + $0x8] sm:$0xff]  }
 0x340   : > { %3686 = vmatmul.mubr.bf16.gmra.mxu1 %v6658_v37  ;;  %v3068_v55 = vor.u32 %v3067_v14, %v3064_v61  ;;  %v9479_v46 = vrot.slane %v3073_v38, 1  ;;  %v9483_v10 = vpack.c.bf16 %v2960_v13, %v2959_v54  ;;  %v9487_v25 = vpack.c.bf16 %v2958_v16, %v2957_v58  ;;  %3484 = vmatprep.mubr.bf16.mxu0 %v10645_v35 }
 0x341   : > { %3695 = vmatprep.mubr.bf16.mxu1 %v10645_v35  ;;  %v3076_v26 = vor.u32 %v9436_v50, %v9434_v62  ;;  %v3193_v47 = vrot.slane %v3065_v5, 1  ;;  %v6901_v22 = vpack.c.bf16 %v2963_v9, %v2961_v27  ;;  %v2964_v3 = vmax.f32 %v9476_v60, 0.0 }
 0x342   : > { %v2891_v61 = vmul.f32 %v9067_v31, %v2852_v29  ;;  %v3086_v54 = vshrl.u32 %v9483_v10, 16  ;;  %v3089_v38 = vshll.u32 %v9483_v10, 16  ;;  %v3078_v14 = vshrl.u32 %v9487_v25, 16 }
 0x343   : > { %v3081_v58 = vshll.u32 %v9487_v25, 16  ;;  %v9501_v59 = vpack.c.bf16 %v2964_v3, %v2963_v9  ;;  %v3135_v31 = vsel %vm8705_vm2, 0, %v3068_v55  ;;  %v10661_v62 = vshrl.u32 %v9214_v49, 16 }
 0x344   : > { %v9504_v50 = vadd.f32 %v9085_v4, %v2891_v61  ;;  %v3088_v23 = vrot.slane %v3086_v54, 3  ;;  %v3091_v48 = vrot.slane %v3089_v38, 4  ;;  %v3080_v19 = vrot.slane %v3078_v14, 3 }
 0x345   : > { %v3178_v5 = vor.u32 %v9313_v43, %v10661_v62  ;;  %v3136_v63 = vsel %vm8705_vm2, 0, %v3076_v26  ;;  %v3199_v42 = vrot.slane %v3089_v38, 1  ;;  %v3083_v4 = vrot.slane %v3081_v58, 4 }
 0x346   : > { %v3102_v1 = vshrl.u32 %v9501_v59, 16  ;;  %v3105_v2 = vshll.u32 %v9501_v59, 16  ;;  %v2962_v49 = vmax.f32 %v9504_v50, 0.0  ;;  %v6660_v20 = vcombine.low %v3135_v31, %v3136_v63  ;;  %v7803_v50 = vld [vmem:[#allocation11 + $0xf0] sm:$0xff]  }
 0x347   : > { %v3092_v43 = vor.u32 %v3091_v48, %v3088_v23  ;;  %v10662_v37 = vshrl.u32 %v9202_v51, 16  ;;  %v3197_v44 = vrot.slane %v3081_v58, 1  ;;  %3485 = vmatmul.mubr.bf16.gmra.mxu0 %v6901_v22  ;;  %v3084_v29 = vor.u32 %v3083_v4, %v3080_v19 }
 0x348   : > { %3696 = vmatmul.mubr.bf16.gmra.mxu1 %v6659_v52  ;;  %v3104_v12 = vrot.slane %v3102_v1, 3  ;;  %v3107_v9 = vrot.slane %v3105_v2, 4  ;;  %v3203_v55 = vrot.slane %v3105_v2, 1  ;;  %v2979_v26 = vpack.c.bf16 %v2962_v49, %v2961_v27  ;;  %3881 = vmatprep.mubr.bf16.mxu0 %v10645_v35 }
 0x349   : > { %v3180_v30 = vor.u32 %v9309_v36, %v10662_v37  ;;  %3705 = vmatprep.mubr.bf16.mxu1 %v10645_v35  ;;  %v3138_v61 = vsel %vm8705_vm2, 0, %v3092_v43  ;;  %v3223_v51 = vsel %vm8805_vm5, %v3178_v5, 0  ;;  %v3137_v36 = vsel %vm8705_vm2, 0, %v3084_v29 }
 0x34a   : > { %v3108_v52 = vor.u32 %v3107_v9, %v3104_v12  ;;  %v10663_v38 = vshrl.u32 %v9286_v0, 16  ;;  %v3094_v58 = vshrl.u32 %v2979_v26, 16  ;;  %v3097_v59 = vshll.u32 %v2979_v26, 16 }
 0x34b   : > { %v3224_v22 = vsel %vm8805_vm5, %v3180_v30, 0  ;;  %v6661_v31 = vcombine.low %v3137_v36, %v3138_v61  ;;  %v10664_v5 = vshrl.u32 %v9249_v15, 16  ;;  %v10665_v63 = vshrl.u32 %v9330_v53, 16 }
 0x34c   : > { %v3182_v27 = vor.u32 %v9324_v24, %v10663_v38  ;;  %v6704_v62 = vcombine.low %v3223_v51, %v3224_v22  ;;  %v3140_v23 = vsel %vm8705_vm2, 0, %v3108_v52  ;;  %v3096_v4 = vrot.slane %v3094_v58, 3 }
 0x34d   : > { %v3184_v48 = vor.u32 %v9321_v6, %v10664_v5  ;;  %v3186_v0 = vor.u32 %v9400_v39, %v10665_v63  ;;  %v3099_v24 = vrot.slane %v3097_v59, 4  ;;  %v3201_v2 = vrot.slane %v3097_v59, 1 }
 0x34e   : > { %v3225_v19 = vsel %vm8805_vm5, %v3182_v27, 0  ;;  %v10666_v43 = vshrl.u32 %v9302_v17, 16  ;;  %v10667_v6 = vshrl.u32 %v9377_v41, 16  ;;  %v10668_v53 = vshrl.u32 %v9373_v57, 16 }
 0x34f   : > { %v3226_v30 = vsel %vm8805_vm5, %v3184_v48, 0  ;;  %v3227_v15 = vsel %vm8805_vm5, %v3186_v0, 0  ;;  %v3100_v9 = vor.u32 %v3099_v24, %v3096_v4  ;;  %3882 = vmatmul.mubr.bf16.vlgmr.msra.gmra.mxu0 %v9273_v32  ;;  %v3202_v36 = vor.u32 %v3201_v2, %v3094_v58  ;;  %v10675_v58 = vld [vmem:[#allocation34_spill] sm:$0xff]  ;;  %v10681_v48 = vld [vmem:[#allocation23_spill] sm:$0xff]  ;;  %v10684_v0 = vld [vmem:[#allocation36_spill] sm:$0xff] }
 0x350   : > { %v3188_v37 = vor.u32 %v9398_v45, %v10666_v43  ;;  %v3190_v12 = vor.u32 %v9429_v11, %v10667_v6  ;;  %v3192_v39 = vor.u32 %v9407_v40, %v10668_v53  ;;  %v6705_v29 = vcombine.low %v3225_v19, %v3226_v30  ;;  %3706 = vmatmul.mubr.bf16.gmra.mxu1 %v6660_v20  ;;  %v10682_v19 = vld [vmem:[#allocation37_spill] sm:$0xff]  ;;  %v10686_v2 = vld [vmem:[#allocation39_spill] sm:$0xff] }
 0x351   : > { %v10669_v45 = vshrl.u32 %v9415_v28, 16  ;;  %v10670_v40 = vshrl.u32 %v9411_v18, 16  ;;  %3715 = vmatprep.mubr.bf16.mxu1 %v10645_v35  ;;  %v3139_v28 = vsel %vm8705_vm2, 0, %v3100_v9  ;;  %3891 = vmatprep.mubr.bf16.mxu0 %v10645_v35  ;;  %v3198_v20 = vor.u32 %v3197_v44, %v3078_v14  ;;  %v7805_v53 = vld [vmem:[#allocation11 + $0x70] sm:$0xff]   ;;  %v7807_v9 = vld [vmem:[#allocation11 + $0xe8] sm:$0xff]  }
 0x352   : > { %v3228_v17 = vsel %vm8805_vm5, %v3188_v37, 0  ;;  %v3229_v41 = vsel %vm8805_vm5, %v3190_v12, 0  ;;  %v3230_v11 = vsel %vm8805_vm5, %v3192_v39, 0  ;;  %v6662_v51 = vcombine.low %v3139_v28, %v3140_v23  ;;  %v10688_v37 = vld [vmem:[#allocation38_spill] sm:$0xff]  ;;  %7080 = vmatpush3.bf16.msra.mxu0 %v7800_v7  ;;  %v7806_v39 = vld [vmem:[#allocation11 + $0x30] sm:$0xff]   ;;  %v7812_v28 = vld [vmem:[#allocation11 + $0xa0] sm:$0xff]  }
 0x353   : > { %v3194_v26 = vor.u32 %v3193_v47, %v10669_v45  ;;  %v6706_v61 = vcombine.low %v3227_v15, %v3228_v17  ;;  %v3196_v57 = vor.u32 %v9479_v46, %v10670_v40  ;;  %v6707_v47 = vcombine.low %v3229_v41, %v3230_v11  ;;  %7081 = vmatprep.subr.bf16.mxu0 %v7803_v50  ;;  %v7809_v45 = vld [vmem:[#allocation11 + $0x68] sm:$0xff]   ;;  %v7827_v7 = vld [vmem:[#allocation11 + $0xc0] sm:$0xff]  }
 0x354   : > { %v3200_v46 = vor.u32 %v3199_v42, %v3086_v54  ;;  %v3233_v34 = vsel %vm8805_vm5, %v3198_v20, 0  ;;  %v3204_v22 = vor.u32 %v3203_v55, %v3102_v1  ;;  %v3235_v25 = vsel %vm8805_vm5, %v3202_v36, 0  ;;  %v10673_v1 = vld [vmem:[#allocation24_spill] sm:$0xff]  ;;  %v7828_v50 = vld [vmem:[#allocation11 + $0x80] sm:$0xff]  }
 0x355   : > { %v3231_v32 = vsel %vm8805_vm5, %v3194_v26, 0  ;;  %v3232_v18 = vsel %vm8805_vm5, %v3196_v57, 0  ;;  %v10671_v27 = vmax.f32 %v9190_v21, 0.0  ;;  %v10672_v10 = vmax.f32 %v9184_v8, 0.0  ;;  %v10677_v8 = vld [vmem:[#allocation25_spill] sm:$0xff]  ;;  %v7810_v26 = vld [vmem:[#allocation11 + $0x28] sm:$0xff]  }
 0x356   : > { %v6708_v52 = vcombine.low %v3231_v32, %v3232_v18  ;;  %v3234_v38 = vsel %vm8805_vm5, %v3200_v46, 0  ;;  %v3236_v44 = vsel %vm8805_vm5, %v3204_v22, 0  ;;  %v10674_v55 = vmax.f32 %v10673_v1, 0.0  ;;  %v7811_v57 = vld [vmem:[#allocation11 + $0xe0] sm:$0xff]  }
 0x357   : > { %v6709_v14 = vcombine.low %v3233_v34, %v3234_v38  ;;  %v6903_v54 = vpack.c.bf16 %v10672_v10, %v10671_v27  ;;  %v6710_v42 = vcombine.low %v3235_v25, %v3236_v44  ;;  %v10676_v59 = vmax.f32 %v10675_v58, 0.0  ;;  %v7814_v18 = vld [vmem:[#allocation11 + $0x20] sm:$0xff]   ;;  %v7816_v44 = vld [vmem:[#allocation11 + $0x98] sm:$0xff]  }
 0x358   : > { %3716 = vmatmul.mubr.bf16.gmra.mxu1 %v6661_v31  ;;  %v10678_v21 = vmax.f32 %v10677_v8, 0.0  ;;  %v10680_v31 = vmax.f32 %v10679_v56, 0.0  ;;  %v10683_v63 = vmax.f32 %v10682_v19, 0.0  ;;  %v10685_v4 = vmax.f32 %v10684_v0, 0.0  ;;  %v7817_v10 = vld [vmem:[#allocation11 + $0x58] sm:$0xff]   ;;  %v7821_v0 = vld [vmem:[#allocation11 + $0x50] sm:$0xff]  }
 0x359   : > { %3892 = vmatmul.mubr.bf16.gmra.mxu0 %v6903_v54  ;;  %3725 = vmatprep.mubr.bf16.mxu1 %v10645_v35  ;;  %v6904_v23 = vpack.c.bf16 %v10676_v59, %v10674_v55  ;;  %v10687_v43 = vmax.f32 %v10686_v2, 0.0  ;;  %v10689_v30 = vmax.f32 %v10688_v37, 0.0  ;;  %v6909_v6 = vpack.c.bf16 %v2964_v3, %v2962_v49  ;;  %v7804_v49 = vld [vmem:[#allocation11 + $0xb0] sm:$0xff]   ;;  %v7818_v54 = vld [vmem:[#allocation11 + $0x18] sm:$0xff]   ;;  %v7823_v37 = vld [vmem:[#allocation11 + $0xc8] sm:$0xff]  }
 0x35a   : > { %3901 = vmatprep.mubr.bf16.mxu0 %v10645_v35  ;;  %v6905_v5 = vpack.c.bf16 %v10680_v31, %v10678_v21  ;;  %v6906_v24 = vpack.c.bf16 %v10685_v4, %v10683_v63  ;;  %7082 = vmatpush3.bf16.msra.mxu0 %v7804_v49  ;;  %v7819_v31 = vld [vmem:[#allocation11 + $0xd0] sm:$0xff]  }
 0x35b   : > { %v6907_v15 = vpack.c.bf16 %v10689_v30, %v10687_v43  ;;  %7083 = vmatprep.subr.bf16.mxu0 %v7807_v9  ;;  %v7822_v4 = vld [vmem:[#allocation11 + $0x10] sm:$0xff]   ;;  %v7824_v30 = vld [vmem:[#allocation11 + $0x88] sm:$0xff]  }
 0x360   : > { %3726 = vmatmul.mubr.bf16.gmra.mxu1 %v6662_v51  ;;  %v7813_v51 = vld [vmem:[#allocation11 + $0x60] sm:$0xff]  }
 0x361   : > { %3902 = vmatmul.mubr.bf16.gmra.mxu0 %v6904_v23  ;;  %4171 = vmatprep.mubr.bf16.mxu1 %v10645_v35 }
 0x362   : > { %3911 = vmatprep.mubr.bf16.mxu0 %v10645_v35 }
 0x368   : > { %4172 = vmatmul.mubr.bf16.vlgmr.msra.gmra.mxu1 %v10681_v48 }
 0x369   : > { %3912 = vmatmul.mubr.bf16.gmra.mxu0 %v6905_v5  ;;  %4181 = vmatprep.mubr.bf16.mxu1 %v10645_v35  ;;  %v7820_v5 = vld [vmem:[#allocation11 + $0x90] sm:$0xff]  }
 0x36a   : > { %3921 = vmatprep.mubr.bf16.mxu0 %v10645_v35 }
 0x370   : > { %4182 = vmatmul.mubr.bf16.gmra.mxu1 %v6704_v62  ;;  %v6908_v62 = vpack.c.bf16 %v2960_v13, %v2958_v16  ;;  %v7801_v13 = vld [vmem:[#allocation11 + $0x78] sm:$0xff]  }
 0x371   : > { %3922 = vmatmul.mubr.bf16.gmra.mxu0 %v6906_v24  ;;  %4191 = vmatprep.mubr.bf16.mxu1 %v10645_v35  ;;  %v7802_v16 = vld [vmem:[#allocation11 + $0x38] sm:$0xff]  }
 0x372   : > { %3931 = vmatprep.mubr.bf16.mxu0 %v10645_v35  ;;  %7101 = vmatprep.subr.bf16.mxu1 %v7801_v13 }
 0x373   : > { %7102 = vmatpush3.bf16.msra.mxu1 %v7802_v16  ;;  %v7829_v16 = vld [vmem:[#allocation11 + $0x40] sm:$0xff]  }
 0x374   : > { %7103 = vmatprep.subr.bf16.mxu1 %v7805_v53 }
 0x377   : > { %7104 = vmatpush3.bf16.msra.mxu1 %v7806_v39 }
 0x378   : > { %4192 = vmatmul.mubr.bf16.gmra.mxu1 %v6705_v29  ;;  %v7808_v29 = vld [vmem:[#allocation11 + $0xa8] sm:$0xff]   ;;  %7105 = vmatprep.subr.bf16.mxu1 %v7809_v45 }
 0x379   : > { %3932 = vmatmul.mubr.bf16.gmra.mxu0 %v6907_v15  ;;  %4201 = vmatprep.mubr.bf16.mxu1 %v10645_v35  ;;  %v7825_v15 = vld [vmem:[#allocation11 + $0x48] sm:$0xff]  }
 0x37a   : > { %3941 = vmatprep.mubr.bf16.mxu0 %v10645_v35  ;;  %7084 = vmatpush3.bf16.msra.mxu0 %v7808_v29  ;;  %v7831_v29 = vld [vmem:[#allocation11 + $0x178] sm:$0xff]  }
 0x37b   : > { %7106 = vmatpush3.bf16.msra.mxu1 %v7810_v26  ;;  %7085 = vmatprep.subr.bf16.mxu0 %v7811_v57 }
 0x37c   : > { %7107 = vmatprep.subr.bf16.mxu1 %v7813_v51 }
 0x37e   : > { %7086 = vmatpush3.bf16.msra.mxu0 %v7812_v28 }
 0x37f   : > { %7108 = vmatpush3.bf16.msra.mxu1 %v7814_v18 }
 0x380   : > { %4202 = vmatmul.mubr.bf16.gmra.mxu1 %v6706_v61  ;;  %7109 = vmatprep.subr.bf16.mxu1 %v7817_v10 }
 0x381   : > { %3942 = vmatmul.mubr.bf16.gmra.mxu0 %v6908_v62  ;;  %4211 = vmatprep.mubr.bf16.mxu1 %v10645_v35 }
 0x382   : > { %3951 = vmatprep.mubr.bf16.mxu0 %v10645_v35 }
 0x383   : > { %7110 = vmatpush3.bf16.msra.mxu1 %v7818_v54 }
 0x384   : > { %7111 = vmatprep.subr.bf16.mxu1 %v7821_v0 }
 0x387   : > { %7112 = vmatpush3.bf16.msra.mxu1 %v7822_v4 }
 0x388   : > { %4212 = vmatmul.mubr.bf16.gmra.mxu1 %v6707_v47  ;;  %7113 = vmatprep.subr.bf16.mxu1 %v7825_v15 }
 0x389   : > { %3952 = vmatmul.mubr.bf16.gmra.mxu0 %v6909_v6  ;;  %4221 = vmatprep.mubr.bf16.mxu1 %v10645_v35 }
 0x38b   : > { %7114 = vmatpush3.bf16.msra.mxu1 %v7826_v33 }
 0x38c   : > { %7115 = vmatprep.subr.bf16.mxu1 %v7829_v16 }
 0x390   : > { %4222 = vmatmul.mubr.bf16.gmra.mxu1 %v6708_v52 }
 0x391   : > { %4231 = vmatprep.mubr.bf16.mxu1 %v10645_v35 }
 0x398   : > { %4232 = vmatmul.mubr.bf16.gmra.mxu1 %v6709_v14  ;;  %v7815_v14 = vld [vmem:[#allocation11 + $0xd8] sm:$0xff]  }
 0x399   : > { %4241 = vmatprep.mubr.bf16.mxu1 %v10645_v35  ;;  %7087 = vmatprep.subr.bf16.mxu0 %v7815_v14 }
 0x39a   : > { %7088 = vmatpush3.bf16.msra.mxu0 %v7816_v44 }
 0x39b   : > { %7089 = vmatprep.subr.bf16.mxu0 %v7819_v31 }
 0x39e   : > { %7090 = vmatpush3.bf16.msra.mxu0 %v7820_v5 }
 0x39f   : > { %7091 = vmatprep.subr.bf16.mxu0 %v7823_v37 }
 0x3a0   : > { %4242 = vmatmul.mubr.bf16.gmra.mxu1 %v6710_v42 }
 0x3a2   : > { %7092 = vmatpush3.bf16.msra.mxu0 %v7824_v30 }
 0x3a3   : > { %7093 = vmatprep.subr.bf16.mxu0 %v7827_v7 }
 0x3a6   : > { %7094 = vmatpush3.bf16.msra.mxu0 %v7828_v50  ;;  %v4286_v50 = vlaneseq }
 0x3a7   : > { %7123 = vmatprep.subr.bf16.mxu0 %v7831_v29 }
 0x3c8   : > { %v3416_v60 = vpop.f32.mrf.mxu0 }
 0x3ca   : > { %v3418_v3 = vpop.f32.mrf.mxu0 }
 0x3cc   : > { %v3420_v12 = vpop.f32.mrf.mxu0 }
 0x3ce   : > { %v3422_v35 = vpop.f32.mrf.mxu0 }
 0x3d4   : > { %v3426_v17 = vpop.f32.mrf.mxu0 }
 0x3d6   : > { %v3428_v61 = vpop.f32.mrf.mxu0 }
 0x3d8   : > { %v3430_v41 = vpop.f32.mrf.mxu0 }
 0x3da   : > { %v3657_v11 = vpop.f32.mrf.mxu1  ;;  %v3432_v40 = vpop.f32.mrf.mxu0 }
 0x3db   : > { %v9637_v47 = vadd.f32 %v3657_v11, %v3416_v60 }
 0x3dc   : > { %v3659_v32 = vpop.f32.mrf.mxu1  ;;  %v3436_v20 = vpop.f32.mrf.mxu0 }
 0x3dd   : > { %v9639_v46 = vadd.f32 %v3659_v32, %v3418_v3 }
 0x3de   : > { %v3661_v36 = vpop.f32.mrf.mxu1  ;;  %v3438_v52 = vpop.f32.mrf.mxu0 }
 0x3df   : > { %v9641_v34 = vadd.f32 %v3661_v36, %v3420_v12  ;;  %v7830_v12 = vld [vmem:[#allocation11] sm:$0xff]  }
 0x3e0   : > { %v3663_v22 = vpop.f32.mrf.mxu1  ;;  %v3440_v38 = vpop.f32.mrf.mxu0  ;;  %7116 = vmatpush3.bf16.msra.mxu1 %v7830_v12 }
 0x3e1   : > { %v9643_v25 = vadd.f32 %v3663_v22, %v3422_v35 }
 0x3e2   : > { %v3442_v27 = vpop.f32.mrf.mxu0 }
 0x3e6   : > { %v3667_v42 = vpop.f32.mrf.mxu1 }
 0x3e7   : > { %v9645_v1 = vadd.f32 %v3667_v42, %v3426_v17  ;;  %v3446_v55 = vpop.f32.mrf.mxu0  ;;  %v7832_v17 = vld [vmem:[#allocation11 + $0x1f8] sm:$0xff]  }
 0x3e8   : > { %v3669_v58 = vpop.f32.mrf.mxu1  ;;  %7145 = vmatprep.subr.bf16.mxu1 %v7832_v17 }
 0x3e9   : > { %v9647_v59 = vadd.f32 %v3669_v58, %v3428_v61  ;;  %v3448_v23 = vpop.f32.mrf.mxu0 }
 0x3ea   : > { %v3671_v8 = vpop.f32.mrf.mxu1 }
 0x3eb   : > { %v9649_v21 = vadd.f32 %v3671_v8, %v3430_v41  ;;  %v3450_v56 = vpop.f32.mrf.mxu0 }
 0x3ec   : > { %v3673_v48 = vpop.f32.mrf.mxu1 }
 0x3ed   : > { %v9651_v19 = vadd.f32 %v3673_v48, %v3432_v40  ;;  %v3452_v63 = vpop.f32.mrf.mxu0 }
 0x3ef   : > { %v3677_v24 = vpop.f32.mrf.mxu1  ;;  %v3456_v2 = vpop.f32.mrf.mxu0 }
 0x3f0   : > { %v9653_v43 = vadd.f32 %v3677_v24, %v3436_v20 }
 0x3f1   : > { %v3679_v62 = vpop.f32.mrf.mxu1  ;;  %v3458_v6 = vpop.f32.mrf.mxu0 }
 0x3f2   : > { %v9655_v13 = vadd.f32 %v3679_v62, %v3438_v52 }
 0x3f3   : > { %v3681_v60 = vpop.f32.mrf.mxu1  ;;  %v3460_v3 = vpop.f32.mrf.mxu0 }
 0x3f4   : > { %v9657_v49 = vadd.f32 %v3681_v60, %v3440_v38 }
 0x3f5   : > { %v3683_v53 = vpop.f32.mrf.mxu1  ;;  %v3462_v39 = vpop.f32.mrf.mxu0 }
 0x3f6   : > { %v9659_v35 = vadd.f32 %v3683_v53, %v3442_v27 }
 0x3f7   : > { %v3466_v9 = vpop.f32.mrf.mxu0 }
 0x3f9   : > { %v3468_v45 = vpop.f32.mrf.mxu0 }
 0x3fb   : > { %v3470_v26 = vpop.f32.mrf.mxu0 }
 0x3fd   : > { %v3472_v61 = vpop.f32.mrf.mxu0 }
 0x3ff   : > { %v3476_v11 = vpop.f32.mrf.mxu0 }
 0x400   : > { %v3687_v41 = vpop.f32.mrf.mxu1 }
 0x401   : > { %v9661_v40 = vadd.f32 %v3687_v41, %v3446_v55  ;;  %v3478_v28 = vpop.f32.mrf.mxu0 }
 0x402   : > { %v3689_v57 = vpop.f32.mrf.mxu1 }
 0x403   : > { %v9663_v32 = vadd.f32 %v3689_v57, %v3448_v23  ;;  %v3480_v51 = vpop.f32.mrf.mxu0 }
 0x404   : > { %v3691_v20 = vpop.f32.mrf.mxu1 }
 0x405   : > { %v9665_v18 = vadd.f32 %v3691_v20, %v3450_v56  ;;  %v3482_v52 = vpop.f32.mrf.mxu0 }
 0x406   : > { %v3693_v36 = vpop.f32.mrf.mxu1 }
 0x407   : > { %v9667_v22 = vadd.f32 %v3693_v36, %v3452_v63  ;;  %v3486_v14 = vpop.f32.mrf.mxu0 }
 0x408   : > { %v3697_v38 = vpop.f32.mrf.mxu1 }
 0x409   : > { %v9669_v44 = vadd.f32 %v3697_v38, %v3456_v2  ;;  %v9671_v10 = vpop.f32.mrf.mxu0 }
 0x40a   : > { %v3699_v27 = vpop.f32.mrf.mxu1 }
 0x40b   : > { %v9673_v54 = vadd.f32 %v3699_v27, %v3458_v6  ;;  %v3490_v55 = vpop.f32.mrf.mxu0 }
 0x40c   : > { %v3701_v42 = vpop.f32.mrf.mxu1 }
 0x40d   : > { %v9675_v58 = vadd.f32 %v3701_v42, %v3460_v3  ;;  %v9677_v8 = vpop.f32.mrf.mxu0 }
 0x40e   : > { %v3703_v23 = vpop.f32.mrf.mxu1 }
 0x40f   : > { %v9679_v56 = vadd.f32 %v3703_v23, %v3462_v39  ;;  %v3883_v5 = vpop.f32.mrf.mxu0 }
 0x410   : > { %v3707_v31 = vpop.f32.mrf.mxu1 }
 0x411   : > { %v9681_v48 = vadd.f32 %v3707_v31, %v3466_v9  ;;  %v3885_v0 = vpop.f32.mrf.mxu0 }
 0x412   : > { %v3709_v63 = vpop.f32.mrf.mxu1 }
 0x413   : > { %v9683_v4 = vadd.f32 %v3709_v63, %v3468_v45  ;;  %v3887_v2 = vpop.f32.mrf.mxu0  ;;  %v4287_v45 = vshrl.u32 %v4286_v50, 7 }
 0x414   : > { %v3711_v24 = vpop.f32.mrf.mxu1 }
 0x415   : > { %v9685_v37 = vadd.f32 %v3711_v24, %v3470_v26  ;;  %v3889_v15 = vpop.f32.mrf.mxu0  ;;  %v4288_v20 = vsub.s32 0, %v4287_v45  ;;  %v4292_v27 = vsub.s32 1, %v4287_v45 }
 0x416   : > { %v3713_v30 = vpop.f32.mrf.mxu1 }
 0x417   : > { %v9687_v62 = vadd.f32 %v3713_v30, %v3472_v61  ;;  %v3963_v30 = vadd.f32 %v3885_v0, %v9639_v46 }
 0x418   : > { %v3717_v6 = vpop.f32.mrf.mxu1 }
 0x419   : > { %v3893_v33 = vpop.f32.mrf.mxu0  ;;  %v9689_v7 = vadd.f32 %v3717_v6, %v3476_v11 }
 0x41a   : > { %v3719_v16 = vpop.f32.mrf.mxu1 }
 0x41b   : > { %v3895_v60 = vpop.f32.mrf.mxu0  ;;  %v9691_v3 = vadd.f32 %v3719_v16, %v3478_v28  ;;  %v4284_v28 = vld [vmem:[%s10505_s8] sm:$0x3] }
 0x41c   : > { %v3721_v12 = vpop.f32.mrf.mxu1  ;;  %v9708_v31 = vrot.slane %v4284_v28, %v4288_v20  ;;  %v3967_v46 = vadd.f32 %v3895_v60, %v9647_v59 }
 0x41d   : > { %v3897_v53 = vpop.f32.mrf.mxu0  ;;  %v9693_v39 = vadd.f32 %v3721_v12, %v3480_v51 }
 0x41e   : > { %v3723_v9 = vpop.f32.mrf.mxu1 }
 0x41f   : > { %v3899_v29 = vpop.f32.mrf.mxu0  ;;  %v9695_v17 = vadd.f32 %v3723_v9, %v3482_v52  ;;  %v4328_v52 = vld [vmem:[%s10506_s9] sm:$0x3]  ;;  %v3964_v9 = vadd.f32 %v3887_v2, %v9641_v34 }
 0x420   : > { %v3727_v26 = vpop.f32.mrf.mxu1  ;;  %v9711_v16 = vrot.slane %v4328_v52, %v4288_v20 }
 0x421   : > { %v3903_v61 = vpop.f32.mrf.mxu0  ;;  %v9697_v41 = vadd.f32 %v3727_v26, %v3486_v14  ;;  %v3962_v14 = vadd.f32 %v3883_v5, %v9637_v47  ;;  %v3965_v47 = vadd.f32 %v3889_v15, %v9643_v25  ;;  %v3966_v5 = vadd.f32 %v3893_v33, %v9645_v1 }
 0x422   : > { %v3729_v11 = vpop.f32.mrf.mxu1  ;;  %v3970_v25 = vadd.f32 %v3903_v61, %v9653_v43 }
 0x423   : > { %v3905_v57 = vpop.f32.mrf.mxu0  ;;  %v9726_v2 = vadd.f32 %v3729_v11, %v9671_v10 }
 0x424   : > { %v3731_v36 = vpop.f32.mrf.mxu1  ;;  %v9731_v1 = vadd.f32 %v3905_v57, %v9655_v13 }
 0x425   : > { %v3907_v38 = vpop.f32.mrf.mxu0  ;;  %v9702_v51 = vadd.f32 %v3731_v36, %v3490_v55  ;;  %v9713_v55 = vrot.slane %v4284_v28, %v4292_v27  ;;  %v9717_v36 = vrot.slane %v4328_v52, %v4292_v27  ;;  %v3968_v28 = vadd.f32 %v3897_v53, %v9649_v21 }
 0x426   : > { %v3733_v42 = vpop.f32.mrf.mxu1  ;;  %v3969_v27 = vadd.f32 %v3899_v29, %v9651_v19  ;;  %v9739_v10 = vadd.f32 %v3907_v38, %v9657_v49 }
 0x427   : > { %v3909_v23 = vpop.f32.mrf.mxu0  ;;  %v9736_v52 = vadd.f32 %v3733_v42, %v9677_v8 }
 0x428   : > { %v4173_v63 = vpop.f32.mrf.mxu1  ;;  %v9742_v43 = vadd.f32 %v3909_v23, %v9659_v35 }
 0x429   : > { %v3913_v24 = vpop.f32.mrf.mxu0  ;;  %v4252_v6 = vadd.f32 %v4173_v63, %v3962_v14 }
 0x42a   : > { %v4175_v50 = vpop.f32.mrf.mxu1  ;;  %v9745_v13 = vadd.f32 %v3913_v24, %v9661_v40 }
 0x42b   : > { %v3915_v12 = vpop.f32.mrf.mxu0  ;;  %v4296_v45 = vmul.f32 %v9708_v31, %v4252_v6  ;;  %v4253_v26 = vadd.f32 %v4175_v50, %v3963_v30 }
 0x42c   : > { %v4177_v0 = vpop.f32.mrf.mxu1  ;;  %v9750_v42 = vadd.f32 %v3915_v12, %v9663_v32 }
 0x42d   : > { %v3917_v20 = vpop.f32.mrf.mxu0  ;;  %v4340_v14 = vadd.f32 %v9711_v16, %v4296_v45  ;;  %v4297_v63 = vmul.f32 %v9713_v55, %v4253_v26  ;;  %v4254_v34 = vadd.f32 %v4177_v0, %v3964_v9 }
 0x42e   : > { %v4179_v59 = vpop.f32.mrf.mxu1  ;;  %v9753_v49 = vadd.f32 %v3917_v20, %v9665_v18 }
 0x42f   : > { %v3919_v15 = vpop.f32.mrf.mxu0  ;;  %v4372_v33 = vmax.f32 %v4340_v14, 0.0  ;;  %v4341_v21 = vadd.f32 %v9717_v36, %v4297_v63  ;;  %v4298_v60 = vmul.f32 %v9708_v31, %v4254_v34  ;;  %v4255_v53 = vadd.f32 %v4179_v59, %v3965_v47 }
 0x430   : > { %v4183_v19 = vpop.f32.mrf.mxu1  ;;  %v9756_v35 = vadd.f32 %v3919_v15, %v9667_v22 }
 0x431   : > { %v3923_v29 = vpop.f32.mrf.mxu0  ;;  %v6910_v61 = vpack.c.bf16 %v4372_v33, %v4372_v33  ;;  %v4373_v11 = vmax.f32 %v4341_v21, 0.0  ;;  %v4342_v57 = vadd.f32 %v9711_v16, %v4298_v60  ;;  %v4299_v30 = vmul.f32 %v9713_v55, %v4255_v53 }
 0x432   : > { %v4256_v6 = vadd.f32 %v4183_v19, %v3966_v5  ;;  %v4185_v8 = vpop.f32.mrf.mxu1  ;;  %v9763_v32 = vadd.f32 %v3923_v29, %v9669_v44 }
 0x433   : > { %v3925_v40 = vpop.f32.mrf.mxu0  ;;  %v9758_v38 = vunpack.c.l.b16 %v6910_v61  ;;  %v6911_v23 = vpack.c.bf16 %v4373_v11, %v4373_v11  ;;  %v4374_v24 = vmax.f32 %v4342_v57, 0.0  ;;  %v4343_v50 = vadd.f32 %v9717_v36, %v4299_v30 }
 0x434   : > { %v4300_v9 = vmul.f32 %v9708_v31, %v4256_v6  ;;  %v4257_v45 = vadd.f32 %v4185_v8, %v3967_v46  ;;  %v4187_v26 = vpop.f32.mrf.mxu1  ;;  %v9766_v18 = vadd.f32 %v3925_v40, %v9673_v54 }
 0x435   : > { %v3927_v12 = vpop.f32.mrf.mxu0  ;;  %v9768_v22 = vunpack.c.l.b16 %v6911_v23  ;;  %v6912_v47 = vpack.c.bf16 %v4374_v24, %v4374_v24  ;;  %v4375_v5 = vmax.f32 %v4343_v50, 0.0  ;;  %v4258_v0 = vadd.f32 %v4187_v26, %v3968_v28 }
 0x436   : > { %v4344_v20 = vadd.f32 %v9711_v16, %v4300_v9  ;;  %v4301_v14 = vmul.f32 %v9713_v55, %v4257_v45  ;;  %v4189_v63 = vpop.f32.mrf.mxu1  ;;  %v9773_v46 = vadd.f32 %v3927_v12, %v9675_v58  ;;  %v4597_v44 = vrot.slane %v9758_v38, 1 }
 0x437   : > { %v3929_v34 = vpop.f32.mrf.mxu0  ;;  %v9776_v59 = vunpack.c.l.b16 %v6912_v47  ;;  %v6913_v54 = vpack.c.bf16 %v4375_v5, %v4375_v5  ;;  %v4302_v15 = vmul.f32 %v9708_v31, %v4258_v0  ;;  %v4259_v33 = vadd.f32 %v4189_v63, %v3969_v27 }
 0x438   : > { %v4376_v21 = vmax.f32 %v4344_v20, 0.0  ;;  %v4345_v28 = vadd.f32 %v9717_v36, %v4301_v14  ;;  %v4193_v60 = vpop.f32.mrf.mxu1  ;;  %v9781_v53 = vadd.f32 %v3929_v34, %v9679_v56  ;;  %v4618_v58 = vrot.slane %v9768_v22, 1 }
 0x439   : > { %v3933_v19 = vpop.f32.mrf.mxu0  ;;  %v9784_v29 = vunpack.c.l.b16 %v6913_v54  ;;  %v4346_v61 = vadd.f32 %v9711_v16, %v4302_v15  ;;  %v4303_v11 = vmul.f32 %v9713_v55, %v4259_v33  ;;  %v4260_v57 = vadd.f32 %v4193_v60, %v3970_v25 }
 0x43a   : > { %v6914_v30 = vpack.c.bf16 %v4376_v21, %v4376_v21  ;;  %v4377_v27 = vmax.f32 %v4345_v28, 0.0  ;;  %v4195_v6 = vpop.f32.mrf.mxu1  ;;  %v9789_v8 = vadd.f32 %v3933_v19, %v9681_v48  ;;  %v9793_v56 = vsel %vm4598_vm6, %v9776_v59, %v4597_v44 }
 0x43b   : > { %v3935_v40 = vpop.f32.mrf.mxu0  ;;  %v4378_v23 = vmax.f32 %v4346_v61, 0.0  ;;  %v4347_v24 = vadd.f32 %v9717_v36, %v4303_v11  ;;  %v4304_v50 = vmul.f32 %v9708_v31, %v4260_v57  ;;  %v4261_v9 = vadd.f32 %v4195_v6, %v9731_v1 }
 0x43c   : > { %v9798_v25 = vunpack.c.l.b16 %v6914_v30  ;;  %v6915_v45 = vpack.c.bf16 %v4377_v27, %v4377_v27  ;;  %v4197_v26 = vpop.f32.mrf.mxu1  ;;  %v9801_v12 = vadd.f32 %v3935_v40, %v9683_v4  ;;  %v4619_v47 = vsel %vm4598_vm6, %v9784_v29, %v4618_v58 }
 0x43d   : > { %v3937_v48 = vpop.f32.mrf.mxu0  ;;  %v6916_v5 = vpack.c.bf16 %v4378_v23, %v4378_v23  ;;  %v4379_v0 = vmax.f32 %v4347_v24, 0.0  ;;  %v4348_v20 = vadd.f32 %v9711_v16, %v4304_v50  ;;  %v4305_v14 = vmul.f32 %v9713_v55, %v4261_v9 }
 0x43e   : > { %v9807_v63 = vunpack.c.l.b16 %v6915_v45  ;;  %v4262_v1 = vadd.f32 %v4197_v26, %v9739_v10  ;;  %v4199_v34 = vpop.f32.mrf.mxu1  ;;  %v9811_v44 = vadd.f32 %v3937_v48, %v9685_v37  ;;  %v4815_v54 = vrot.slane %v9784_v29, 7 }
 0x43f   : > { %v3939_v4 = vpop.f32.mrf.mxu0  ;;  %v9814_v15 = vunpack.c.l.b16 %v6916_v5  ;;  %v6917_v33 = vpack.c.bf16 %v4379_v0, %v4379_v0  ;;  %v4380_v21 = vmax.f32 %v4348_v20, 0.0  ;;  %v4349_v28 = vadd.f32 %v9717_v36, %v4305_v14 }
 0x440   : > { %v4306_v60 = vmul.f32 %v9708_v31, %v4262_v1  ;;  %v4263_v19 = vadd.f32 %v4199_v34, %v9742_v43  ;;  %v4203_v58 = vpop.f32.mrf.mxu1  ;;  %v9820_v10 = vadd.f32 %v3939_v4, %v9687_v62  ;;  %v4620_v37 = vrot.slane %v9807_v63, 7 }
 0x441   : > { %v3943_v61 = vpop.f32.mrf.mxu0  ;;  %v9823_v11 = vunpack.c.l.b16 %v6917_v33  ;;  %v6918_v57 = vpack.c.bf16 %v4380_v21, %v4380_v21  ;;  %v4381_v30 = vmax.f32 %v4349_v28, 0.0  ;;  %v4264_v27 = vadd.f32 %v4203_v58, %v9745_v13 }
 0x442   : > { %v4350_v6 = vadd.f32 %v9711_v16, %v4306_v60  ;;  %v4307_v40 = vmul.f32 %v9713_v55, %v4263_v19  ;;  %v4205_v23 = vpop.f32.mrf.mxu1  ;;  %v9829_v43 = vadd.f32 %v3943_v61, %v9689_v7  ;;  %v4621_v24 = vsel %vm4601_vm7, %v4620_v37, %v4619_v47 }
 0x443   : > { %v3945_v62 = vpop.f32.mrf.mxu0  ;;  %v9832_v50 = vunpack.c.l.b16 %v6918_v57  ;;  %v6919_v9 = vpack.c.bf16 %v4381_v30, %v4381_v30  ;;  %v4308_v45 = vmul.f32 %v9708_v31, %v4264_v27  ;;  %v4265_v26 = vadd.f32 %v4205_v23, %v9750_v42 }
 0x444   : > { %v4382_v13 = vmax.f32 %v4350_v6, 0.0  ;;  %v4351_v48 = vadd.f32 %v9717_v36, %v4307_v40  ;;  %v4207_v5 = vpop.f32.mrf.mxu1  ;;  %v9838_v0 = vadd.f32 %v3945_v62, %v9691_v3  ;;  %v4622_v7 = vrot.slane %v9823_v11, 6 }
 0x445   : > { %v3947_v20 = vpop.f32.mrf.mxu0  ;;  %v9841_v14 = vunpack.c.l.b16 %v6919_v9  ;;  %v4352_v47 = vadd.f32 %v9711_v16, %v4308_v45  ;;  %v4309_v1 = vmul.f32 %v9713_v55, %v4265_v26  ;;  %v4266_v34 = vadd.f32 %v4207_v5, %v9753_v49 }
 0x446   : > { %v6920_v42 = vpack.c.bf16 %v4382_v13, %v4382_v13  ;;  %v4383_v4 = vmax.f32 %v4351_v48, 0.0  ;;  %v4209_v33 = vpop.f32.mrf.mxu1  ;;  %v9847_v21 = vadd.f32 %v3947_v20, %v9693_v39  ;;  %v4623_v28 = vsel %vm4604_vm8, %v4622_v7, %v4621_v24 }
 0x447   : > { %v3949_v3 = vpop.f32.mrf.mxu0  ;;  %v4384_v60 = vmax.f32 %v4352_v47, 0.0  ;;  %v4353_v19 = vadd.f32 %v9717_v36, %v4309_v1  ;;  %v4310_v58 = vmul.f32 %v9708_v31, %v4266_v34  ;;  %v4267_v61 = vadd.f32 %v4209_v33, %v9756_v35 }
 0x448   : > { %v9853_v37 = vunpack.c.l.b16 %v6920_v42  ;;  %v6921_v49 = vpack.c.bf16 %v4383_v4, %v4383_v4  ;;  %v4213_v57 = vpop.f32.mrf.mxu1  ;;  %v9856_v30 = vadd.f32 %v3949_v3, %v9695_v17  ;;  %v4624_v39 = vrot.slane %v9841_v14, 5 }
 0x449   : > { %v3953_v27 = vpop.f32.mrf.mxu0  ;;  %v6922_v6 = vpack.c.bf16 %v4384_v60, %v4384_v60  ;;  %v4385_v40 = vmax.f32 %v4353_v19, 0.0  ;;  %v4354_v23 = vadd.f32 %v9711_v16, %v4310_v58  ;;  %v4311_v62 = vmul.f32 %v9713_v55, %v4267_v61 }
 0x44a   : > { %v9861_v24 = vunpack.c.l.b16 %v6921_v49  ;;  %v4268_v35 = vadd.f32 %v4213_v57, %v9763_v32  ;;  %v4215_v9 = vpop.f32.mrf.mxu1  ;;  %v9865_v45 = vadd.f32 %v3953_v27, %v9697_v41  ;;  %v4625_v26 = vsel %vm4607_vm9, %v4624_v39, %v4623_v28 }
 0x44b   : > { %v3955_v17 = vpop.f32.mrf.mxu0  ;;  %v9868_v13 = vunpack.c.l.b16 %v6922_v6  ;;  %v6923_v48 = vpack.c.bf16 %v4385_v40, %v4385_v40  ;;  %v4386_v5 = vmax.f32 %v4354_v23, 0.0  ;;  %v4355_v20 = vadd.f32 %v9717_v36, %v4311_v62 }
 0x44c   : > { %v4312_v7 = vmul.f32 %v9708_v31, %v4268_v35  ;;  %v4269_v47 = vadd.f32 %v4215_v9, %v9766_v18  ;;  %v4217_v1 = vpop.f32.mrf.mxu1  ;;  %v9874_v32 = vadd.f32 %v3955_v17, %v9726_v2  ;;  %v4626_v41 = vrot.slane %v9861_v24, 4 }
 0x44d   : > { %v3957_v34 = vpop.f32.mrf.mxu0  ;;  %v9877_v42 = vunpack.c.l.b16 %v6923_v48  ;;  %v6924_v4 = vpack.c.bf16 %v4386_v5, %v4386_v5  ;;  %v4387_v33 = vmax.f32 %v4355_v20, 0.0  ;;  %v4270_v3 = vadd.f32 %v4217_v1, %v9773_v46 }
 0x44e   : > { %v4356_v28 = vadd.f32 %v9711_v16, %v4312_v7  ;;  %v4313_v60 = vmul.f32 %v9713_v55, %v4269_v47  ;;  %v4219_v19 = vpop.f32.mrf.mxu1  ;;  %v9883_v18 = vadd.f32 %v3957_v34, %v9702_v51  ;;  %v4627_v58 = vsel %vm4610_vm10, %v4626_v41, %v4625_v26 }
 0x44f   : > { %v3959_v2 = vpop.f32.mrf.mxu0  ;;  %v9886_v61 = vunpack.c.l.b16 %v6924_v4  ;;  %v6925_v49 = vpack.c.bf16 %v4387_v33, %v4387_v33  ;;  %v4314_v57 = vmul.f32 %v9708_v31, %v4270_v3  ;;  %v4271_v27 = vadd.f32 %v4219_v19, %v9781_v53 }
 0x450   : > { %v4388_v46 = vmax.f32 %v4356_v28, 0.0  ;;  %v4357_v39 = vadd.f32 %v9717_v36, %v4313_v60  ;;  %v4223_v6 = vpop.f32.mrf.mxu1  ;;  %v9892_v40 = vadd.f32 %v3959_v2, %v9736_v52  ;;  %v4628_v51 = vrot.slane %v9877_v42, 3 }
 0x451   : > { %v9895_v23 = vunpack.c.l.b16 %v6925_v49  ;;  %v4358_v62 = vadd.f32 %v9711_v16, %v4314_v57  ;;  %v4315_v35 = vmul.f32 %v9713_v55, %v4271_v27  ;;  %v4272_v9 = vadd.f32 %v4223_v6, %v9789_v8 }
 0x452   : > { %v6926_v17 = vpack.c.bf16 %v4388_v46, %v4388_v46  ;;  %v4389_v26 = vmax.f32 %v4357_v39, 0.0  ;;  %v4225_v53 = vpop.f32.mrf.mxu1  ;;  %v4629_v48 = vsel %vm4613_vm11, %v4628_v51, %v4627_v58  ;;  %v4816_v52 = vsel %vm4598_vm6, %v4815_v54, %v9768_v22 }
 0x453   : > { %v4390_v5 = vmax.f32 %v4358_v62, 0.0  ;;  %v4359_v20 = vadd.f32 %v9717_v36, %v4315_v35  ;;  %v4316_v7 = vmul.f32 %v9708_v31, %v4272_v9  ;;  %v4273_v47 = vadd.f32 %v4225_v53, %v9801_v12 }
 0x454   : > { %v9908_v1 = vunpack.c.l.b16 %v6926_v17  ;;  %v6927_v8 = vpack.c.bf16 %v4389_v26, %v4389_v26  ;;  %v4227_v34 = vpop.f32.mrf.mxu1  ;;  %v4630_v41 = vrot.slane %v9895_v23, 2  ;;  %v4817_v4 = vrot.slane %v9807_v63, 6 }
 0x455   : > { %v6928_v33 = vpack.c.bf16 %v4390_v5, %v4390_v5  ;;  %v4391_v3 = vmax.f32 %v4359_v20, 0.0  ;;  %v4360_v28 = vadd.f32 %v9711_v16, %v4316_v7  ;;  %v4317_v54 = vmul.f32 %v9713_v55, %v4273_v47 }
 0x456   : > { %v9914_v60 = vunpack.c.l.b16 %v6927_v8  ;;  %v4274_v19 = vadd.f32 %v4227_v34, %v9811_v44  ;;  %v4229_v2 = vpop.f32.mrf.mxu1  ;;  %v9918_v12 = vsel %vm4616_vm12, %v4630_v41, %v4629_v48  ;;  %v4818_v58 = vsel %vm4601_vm7, %v4817_v4, %v4816_v52 }
 0x457   : > { %v9921_v49 = vunpack.c.l.b16 %v6928_v33  ;;  %v6929_v57 = vpack.c.bf16 %v4391_v3, %v4391_v3  ;;  %v4392_v27 = vmax.f32 %v4360_v28, 0.0  ;;  %v4361_v46 = vadd.f32 %v9717_v36, %v4317_v54 }
 0x458   : > { %v4318_v39 = vmul.f32 %v9708_v31, %v4274_v19  ;;  %v4275_v6 = vadd.f32 %v4229_v2, %v9820_v10  ;;  %v4233_v51 = vpop.f32.mrf.mxu1  ;;  %v4646_v62 = vrot.slane %v9914_v60, 1  ;;  %v4819_v44 = vrot.slane %v9823_v11, 5 }
 0x459   : > { %v9928_v35 = vunpack.c.l.b16 %v6929_v57  ;;  %v6930_v9 = vpack.c.bf16 %v4392_v27, %v4392_v27  ;;  %v4393_v17 = vmax.f32 %v4361_v46, 0.0  ;;  %v4276_v26 = vadd.f32 %v4233_v51, %v9829_v43 }
 0x45a   : > { %v4362_v53 = vadd.f32 %v9711_v16, %v4318_v39  ;;  %v4319_v48 = vmul.f32 %v9713_v55, %v4275_v6  ;;  %v4235_v52 = vpop.f32.mrf.mxu1  ;;  %v4820_v5 = vsel %vm4604_vm8, %v4819_v44, %v4818_v58  ;;  %v4821_v10 = vrot.slane %v9841_v14, 4 }
 0x45b   : > { %v9935_v20 = vunpack.c.l.b16 %v6930_v9  ;;  %v6931_v7 = vpack.c.bf16 %v4393_v17, %v4393_v17  ;;  %v4320_v47 = vmul.f32 %v9708_v31, %v4276_v26  ;;  %v4277_v8 = vadd.f32 %v4235_v52, %v9838_v0 }
 0x45c   : > { %v4394_v34 = vmax.f32 %v4362_v53, 0.0  ;;  %v4363_v41 = vadd.f32 %v9717_v36, %v4319_v48  ;;  %v4237_v43 = vpop.f32.mrf.mxu1  ;;  %v4647_v4 = vsel %vm4598_vm6, %v9928_v35, %v4646_v62  ;;  %v4822_v33 = vsel %vm4607_vm9, %v4821_v10, %v4820_v5 }
 0x45d   : > { %v9943_v3 = vunpack.c.l.b16 %v6931_v7  ;;  %v4364_v28 = vadd.f32 %v9711_v16, %v4320_v47  ;;  %v4321_v54 = vmul.f32 %v9713_v55, %v4277_v8  ;;  %v4278_v19 = vadd.f32 %v4237_v43, %v9847_v21 }
 0x45e   : > { %v6932_v2 = vpack.c.bf16 %v4394_v34, %v4394_v34  ;;  %v4395_v58 = vmax.f32 %v4363_v41, 0.0  ;;  %v4239_v0 = vpop.f32.mrf.mxu1  ;;  %v4823_v57 = vrot.slane %v9861_v24, 3  ;;  %v4825_v27 = vrot.slane %v9877_v42, 2 }
 0x45f   : > { %v4396_v46 = vmax.f32 %v4364_v28, 0.0  ;;  %v4365_v39 = vadd.f32 %v9717_v36, %v4321_v54  ;;  %v4322_v6 = vmul.f32 %v9708_v31, %v4278_v19  ;;  %v4279_v51 = vadd.f32 %v4239_v0, %v9856_v30 }
 0x460   : > { %v9953_v62 = vunpack.c.l.b16 %v6932_v2  ;;  %v6933_v44 = vpack.c.bf16 %v4395_v58, %v4395_v58  ;;  %v4243_v9 = vpop.f32.mrf.mxu1  ;;  %v4648_v21 = vrot.slane %v9943_v3, 7  ;;  %v4824_v17 = vsel %vm4610_vm10, %v4823_v57, %v4822_v33 }
 0x461   : > { %v6934_v26 = vpack.c.bf16 %v4396_v46, %v4396_v46  ;;  %v4397_v53 = vmax.f32 %v4365_v39, 0.0  ;;  %v4366_v48 = vadd.f32 %v9711_v16, %v4322_v6  ;;  %v4323_v52 = vmul.f32 %v9713_v55, %v4279_v51 }
 0x462   : > { %v9959_v5 = vunpack.c.l.b16 %v6933_v44  ;;  %v4280_v10 = vadd.f32 %v4243_v9, %v9865_v45  ;;  %v4245_v7 = vpop.f32.mrf.mxu1  ;;  %v4649_v30 = vsel %vm4601_vm7, %v4648_v21, %v4647_v4  ;;  %v4826_v47 = vsel %vm4613_vm11, %v4825_v27, %v4824_v17 }
 0x463   : > { %v9964_v8 = vunpack.c.l.b16 %v6934_v26  ;;  %v6935_v34 = vpack.c.bf16 %v4397_v53, %v4397_v53  ;;  %v4398_v41 = vmax.f32 %v4366_v48, 0.0  ;;  %v4367_v43 = vadd.f32 %v9717_v36, %v4323_v52 }
 0x464   : > { %v4324_v33 = vmul.f32 %v9708_v31, %v4280_v10  ;;  %v4281_v28 = vadd.f32 %v4245_v7, %v9874_v32  ;;  %v4247_v54 = vpop.f32.mrf.mxu1  ;;  %v4650_v19 = vrot.slane %v9959_v5, 6  ;;  %v4827_v45 = vrot.slane %v9895_v23, 1 }
 0x465   : > { %v9971_v2 = vunpack.c.l.b16 %v6935_v34  ;;  %v6936_v4 = vpack.c.bf16 %v4398_v41, %v4398_v41  ;;  %v4399_v58 = vmax.f32 %v4367_v43, 0.0  ;;  %v4282_v0 = vadd.f32 %v4247_v54, %v9883_v18 }
 0x466   : > { %v4368_v57 = vadd.f32 %v9711_v16, %v4324_v33  ;;  %v4325_v27 = vmul.f32 %v9713_v55, %v4281_v28  ;;  %v4249_v46 = vpop.f32.mrf.mxu1  ;;  %v4651_v39 = vsel %vm4604_vm8, %v4650_v19, %v4649_v30  ;;  %v9978_v32 = vsel %vm4616_vm12, %v4827_v45, %v4826_v47 }
 0x467   : > { %v9980_v6 = vunpack.c.l.b16 %v6936_v4  ;;  %v6937_v51 = vpack.c.bf16 %v4399_v58, %v4399_v58  ;;  %v4326_v44 = vmul.f32 %v9708_v31, %v4282_v0  ;;  %v4283_v9 = vadd.f32 %v4249_v46, %v9892_v40 }
 0x468   : > { %v4400_v21 = vmax.f32 %v4368_v57, 0.0  ;;  %v4369_v18 = vadd.f32 %v9717_v36, %v4325_v27  ;;  %v4652_v17 = vrot.slane %v9971_v2, 5  ;;  %v4843_v26 = vrot.slane %v9928_v35, 7 }
 0x469   : > { %v9987_v53 = vunpack.c.l.b16 %v6937_v51  ;;  %v4370_v48 = vadd.f32 %v9711_v16, %v4326_v44  ;;  %v4327_v52 = vmul.f32 %v9713_v55, %v4283_v9  ;;  %v4845_v10 = vrot.slane %v9943_v3, 6 }
 0x46a   : > { %v6938_v7 = vpack.c.bf16 %v4400_v21, %v4400_v21  ;;  %v4401_v30 = vmax.f32 %v4369_v18, 0.0  ;;  %v4653_v31 = vsel %vm4607_vm9, %v4652_v17, %v4651_v39  ;;  %v4844_v40 = vsel %vm4598_vm6, %v4843_v26, %v9914_v60 }
 0x46b   : > { %v4402_v47 = vmax.f32 %v4370_v48, 0.0  ;;  %v4371_v34 = vadd.f32 %v9717_v36, %v4327_v52  ;;  %v4654_v41 = vrot.slane %v9987_v53, 4  ;;  %v4846_v43 = vsel %vm4601_vm7, %v4845_v10, %v4844_v40 }
 0x46c   : > { %v9998_v33 = vunpack.c.l.b16 %v6938_v7  ;;  %v6939_v16 = vpack.c.bf16 %v4401_v30, %v4401_v30  ;;  %v4847_v55 = vrot.slane %v9959_v5, 5  ;;  %v4849_v28 = vrot.slane %v9971_v2, 4 }
 0x46d   : > { %v6940_v54 = vpack.c.bf16 %v4402_v47, %v4402_v47  ;;  %v4403_v19 = vmax.f32 %v4371_v34, 0.0  ;;  %v4655_v45 = vsel %vm4610_vm10, %v4654_v41, %v4653_v31  ;;  %v4851_v4 = vrot.slane %v9987_v53, 3 }
 0x46e   : > { %v10004_v58 = vunpack.c.l.b16 %v6939_v16  ;;  %v4848_v36 = vsel %vm4604_vm8, %v4847_v55, %v4846_v43  ;;  %v4600_v0 = vrot.slane %v9798_v25, 7  ;;  %v4603_v57 = vrot.slane %v9814_v15, 6 }
 0x46f   : > { %v10009_v27 = vunpack.c.l.b16 %v6940_v54  ;;  %v6941_v46 = vpack.c.bf16 %v4403_v19, %v4403_v19  ;;  %v4850_v39 = vsel %vm4607_vm9, %v4849_v28, %v4848_v36  ;;  %v4606_v51 = vrot.slane %v9832_v50, 5 }
 0x470   : > { %v4656_v44 = vrot.slane %v10004_v58, 3  ;;  %v4852_v9 = vsel %vm4610_vm10, %v4851_v4, %v4850_v39  ;;  %v4853_v21 = vrot.slane %v10004_v58, 2  ;;  %v4602_v18 = vsel %vm4601_vm7, %v4600_v0, %v9793_v56 }
 0x471   : > { %v10018_v17 = vunpack.c.l.b16 %v6941_v46  ;;  %v4605_v26 = vsel %vm4604_vm8, %v4603_v57, %v4602_v18  ;;  %v4609_v48 = vrot.slane %v9853_v37, 4  ;;  %v4612_v52 = vrot.slane %v9868_v13, 3 }
 0x472   : > { %v4657_v10 = vsel %vm4613_vm11, %v4656_v44, %v4655_v45  ;;  %v4854_v7 = vsel %vm4613_vm11, %v4853_v21, %v4852_v9  ;;  %v4608_v30 = vsel %vm4607_vm9, %v4606_v51, %v4605_v26  ;;  %v4615_v31 = vrot.slane %v9886_v61, 2 }
 0x473   : > { %v4658_v40 = vrot.slane %v10018_v17, 2  ;;  %v4855_v56 = vrot.slane %v10018_v17, 1  ;;  %v4611_v47 = vsel %vm4610_vm10, %v4609_v48, %v4608_v30  ;;  %v4632_v34 = vrot.slane %v9908_v1, 1 }
 0x474   : > { %v4614_v41 = vsel %vm4613_vm11, %v4612_v52, %v4611_v47  ;;  %v4634_v43 = vrot.slane %v9935_v20, 7  ;;  %v4636_v16 = vrot.slane %v9953_v62, 6  ;;  %v4638_v55 = vrot.slane %v9964_v8, 5 }
 0x475   : > { %v4659_v28 = vsel %vm4616_vm12, %v4658_v40, %v4657_v10  ;;  %v4856_v54 = vsel %vm4616_vm12, %v4855_v56, %v4854_v7  ;;  %v4617_v19 = vsel %vm4616_vm12, %v4615_v31, %v4614_v41  ;;  %v4633_v45 = vsel %vm4598_vm6, %v9921_v49, %v4632_v34  ;;  %v7833_v41 = vld [vmem:[#allocation11 + $0x138] sm:$0xff]  }
 0x476   : > { %v4661_v4 = vpack.c.b16 %v4659_v28, %v9918_v12  ;;  %v4858_v36 = vpack.c.b16 %v4856_v54, %v9978_v32  ;;  %v4635_v0 = vsel %vm4601_vm7, %v4634_v43, %v4633_v45  ;;  %v4640_v57 = vrot.slane %v9980_v6, 4  ;;  %v7835_v54 = vld [vmem:[#allocation11 + $0x170] sm:$0xff]  }
 0x477   : > { %v4637_v46 = vsel %vm4604_vm8, %v4636_v16, %v4635_v0  ;;  %v4642_v39 = vrot.slane %v9998_v33, 3  ;;  %v4644_v51 = vrot.slane %v10009_v27, 2  ;;  %v4801_v44 = vrot.slane %v9776_v59, 7 }
 0x478   : > { %4792 = vmatprep.mubr.bf16.mxu0 %v4661_v4  ;;  %4989 = vmatprep.mubr.bf16.mxu1 %v4858_v36  ;;  %v4639_v9 = vsel %vm4607_vm9, %v4638_v55, %v4637_v46  ;;  %v4803_v12 = vrot.slane %v9798_v25, 6  ;;  %v4805_v32 = vrot.slane %v9814_v15, 5  ;;  %v4807_v21 = vrot.slane %v9832_v50, 4 }
 0x479   : > { %v4641_v18 = vsel %vm4610_vm10, %v4640_v57, %v4639_v9  ;;  %v4802_v26 = vsel %vm4598_vm6, %v4801_v44, %v9758_v38  ;;  %v4809_v48 = vrot.slane %v9853_v37, 3  ;;  %v4811_v52 = vrot.slane %v9868_v13, 2 }
 0x47a   : > { %v4643_v10 = vsel %vm4613_vm11, %v4642_v39, %v4641_v18  ;;  %v4804_v7 = vsel %vm4601_vm7, %v4803_v12, %v4802_v26  ;;  %v4813_v30 = vrot.slane %v9886_v61, 1  ;;  %v4829_v31 = vrot.slane %v9921_v49, 7 }
 0x47b   : > { %v4645_v40 = vsel %vm4616_vm12, %v4644_v51, %v4643_v10  ;;  %v4806_v56 = vsel %vm4604_vm8, %v4805_v32, %v4804_v7  ;;  %v4831_v47 = vrot.slane %v9935_v20, 6  ;;  %v4833_v34 = vrot.slane %v9953_v62, 5  ;;  %v7837_v32 = vld [vmem:[#allocation11 + $0x130] sm:$0xff]  }
 0x47c   : > { %v4660_v43 = vpack.c.b16 %v4645_v40, %v4617_v19  ;;  %v4808_v16 = vsel %vm4607_vm9, %v4807_v21, %v4806_v56  ;;  %v4830_v55 = vsel %vm4598_vm6, %v4829_v31, %v9908_v1  ;;  %v4835_v28 = vrot.slane %v9964_v8, 4  ;;  %v7834_v56 = vld [vmem:[#allocation11 + $0x1b8] sm:$0xff]  }
 0x47d   : > { %v4810_v45 = vsel %vm4610_vm10, %v4809_v48, %v4808_v16  ;;  %v4832_v4 = vsel %vm4601_vm7, %v4831_v47, %v4830_v55  ;;  %v4837_v36 = vrot.slane %v9980_v6, 3  ;;  %v4839_v0 = vrot.slane %v9998_v33, 2 }
 0x47e   : > { %4793 = vmatmul.mubr.bf16.vlgmr.msra.gmra.mxu0 %v4660_v43  ;;  %v4812_v57 = vsel %vm4613_vm11, %v4811_v52, %v4810_v45  ;;  %v4834_v19 = vsel %vm4604_vm8, %v4833_v34, %v4832_v4  ;;  %v4841_v46 = vrot.slane %v10009_v27, 1  ;;  %v5045_v39 = vrot.slane %v9768_v22, 2  ;;  %v7839_v52 = vld [vmem:[#allocation11 + $0x168] sm:$0xff]  }
 0x47f   : > { %v4814_v51 = vsel %vm4616_vm12, %v4813_v30, %v4812_v57  ;;  %v4836_v44 = vsel %vm4607_vm9, %v4835_v28, %v4834_v19  ;;  %7124 = vmatpush3.bf16.msra.mxu0 %v7833_v41  ;;  %v5046_v9 = vrot.slane %v9784_v29, 1  ;;  %v5049_v12 = vrot.slane %v9823_v11, 7  ;;  %v7841_v45 = vld [vmem:[#allocation11 + $0x128] sm:$0xff]   ;;  %v7843_v19 = vld [vmem:[#allocation11 + $0x160] sm:$0xff]  }
 0x480   : > { %v4838_v21 = vsel %vm4610_vm10, %v4837_v36, %v4836_v44  ;;  %v5051_v18 = vrot.slane %v9841_v14, 6  ;;  %v5053_v26 = vrot.slane %v9861_v24, 5  ;;  %v5055_v48 = vrot.slane %v9877_v42, 4  ;;  %7125 = vmatprep.subr.bf16.mxu0 %v7835_v54  ;;  %v7836_v54 = vld [vmem:[#allocation11 + $0x1f0] sm:$0xff]  }
 0x481   : > { %v4840_v10 = vsel %vm4613_vm11, %v4839_v0, %v4838_v21  ;;  %v5047_v7 = vsel %vm4598_vm6, %v5046_v9, %v5045_v39  ;;  %v5057_v30 = vrot.slane %v9895_v23, 3  ;;  %v5073_v31 = vrot.slane %v9914_v60, 2 }
 0x482   : > { %v4842_v40 = vsel %vm4616_vm12, %v4841_v46, %v4840_v10  ;;  %v5048_v47 = vsel %vm4601_vm7, %v9807_v63, %v5047_v7  ;;  %v5074_v34 = vrot.slane %v9928_v35, 1  ;;  %v5077_v41 = vrot.slane %v9959_v5, 7 }
 0x483   : > { %v4857_v43 = vpack.c.b16 %v4842_v40, %v4814_v51  ;;  %v5050_v16 = vsel %vm4604_vm8, %v5049_v12, %v5048_v47  ;;  %v5079_v55 = vrot.slane %v9971_v2, 6  ;;  %v5081_v28 = vrot.slane %v9987_v53, 5  ;;  %7126 = vmatpush3.bf16.msra.mxu0 %v7837_v32  ;;  %v7845_v40 = vld [vmem:[#allocation11 + $0x120] sm:$0xff]  }
 0x484   : > { %v5052_v4 = vsel %vm4607_vm9, %v5051_v18, %v5050_v16  ;;  %v5075_v36 = vsel %vm4598_vm6, %v5074_v34, %v5073_v31  ;;  %v5083_v0 = vrot.slane %v10004_v58, 4  ;;  %v5085_v57 = vrot.slane %v10018_v17, 3  ;;  %7127 = vmatprep.subr.bf16.mxu0 %v7839_v52  ;;  %v7838_v18 = vld [vmem:[#allocation11 + $0x1b0] sm:$0xff]   ;;  %v7840_v31 = vld [vmem:[#allocation11 + $0x1e8] sm:$0xff]  }
 0x485   : > { %4990 = vmatmul.mubr.bf16.vlgmr.msra.gmra.mxu1 %v4857_v43  ;;  %v5054_v46 = vsel %vm4610_vm10, %v5053_v26, %v5052_v4  ;;  %v5076_v39 = vsel %vm4601_vm7, %v9943_v3, %v5075_v36  ;;  %v5277_v51 = vrot.slane %v9768_v22, 3  ;;  %v5278_v44 = vrot.slane %v9784_v29, 2  ;;  %v7842_v36 = vld [vmem:[#allocation11 + $0x1a8] sm:$0xff]  }
 0x486   : > { %7146 = vmatpush3.bf16.msra.mxu1 %v7834_v56  ;;  %v5056_v9 = vsel %vm4613_vm11, %v5055_v48, %v5054_v46  ;;  %v5078_v12 = vsel %vm4604_vm8, %v5077_v41, %v5076_v39  ;;  %v5280_v32 = vrot.slane %v9807_v63, 1  ;;  %v5283_v21 = vrot.slane %v9841_v14, 7 }
 0x487   : > { %v5058_v52 = vsel %vm4616_vm12, %v5057_v30, %v5056_v9  ;;  %v5080_v26 = vsel %vm4607_vm9, %v5079_v55, %v5078_v12  ;;  %v5279_v10 = vsel %vm4598_vm6, %v5278_v44, %v5277_v51  ;;  %v5285_v7 = vrot.slane %v9861_v24, 6  ;;  %7147 = vmatprep.subr.bf16.mxu1 %v7836_v54  ;;  %7128 = vmatpush3.bf16.msra.mxu0 %v7841_v45  ;;  %v7847_v30 = vld [vmem:[#allocation11 + $0x158] sm:$0xff]   ;;  %v7844_v51 = vld [vmem:[#allocation11 + $0x1e0] sm:$0xff]  }
 0x488   : > { %v5082_v48 = vsel %vm4610_vm10, %v5081_v28, %v5080_v26  ;;  %v5281_v56 = vsel %vm4601_vm7, %v5280_v32, %v5279_v10  ;;  %v5287_v47 = vrot.slane %v9877_v42, 5  ;;  %v5289_v34 = vrot.slane %v9895_v23, 4  ;;  %7129 = vmatprep.subr.bf16.mxu0 %v7843_v19  ;;  %v7849_v44 = vld [vmem:[#allocation11 + $0x118] sm:$0xff]  }
 0x489   : > { %v5084_v41 = vsel %vm4613_vm11, %v5083_v0, %v5082_v48  ;;  %v5282_v43 = vsel %vm4604_vm8, %v9823_v11, %v5281_v56  ;;  %v5305_v16 = vrot.slane %v9914_v60, 3  ;;  %v5306_v55 = vrot.slane %v9928_v35, 2 }
 0x48a   : > { %v5086_v54 = vsel %vm4616_vm12, %v5085_v57, %v5084_v41  ;;  %v5284_v28 = vsel %vm4607_vm9, %v5283_v21, %v5282_v43  ;;  %v5308_v45 = vrot.slane %v9943_v3, 1  ;;  %v5311_v4 = vrot.slane %v9971_v2, 7  ;;  %7148 = vmatpush3.bf16.msra.mxu1 %v7838_v18  ;;  %v7851_v21 = vld [vmem:[#allocation11 + $0x150] sm:$0xff]  }
 0x48b   : > { %v5088_v19 = vpack.c.b16 %v5086_v54, %v5058_v52  ;;  %v5286_v0 = vsel %vm4610_vm10, %v5285_v7, %v5284_v28  ;;  %v5307_v46 = vsel %vm4598_vm6, %v5306_v55, %v5305_v16  ;;  %v5313_v39 = vrot.slane %v9987_v53, 6  ;;  %7149 = vmatprep.subr.bf16.mxu1 %v7840_v31  ;;  %7130 = vmatpush3.bf16.msra.mxu0 %v7845_v40  ;;  %v7846_v31 = vld [vmem:[#allocation11 + $0x1a0] sm:$0xff]   ;;  %v7855_v54 = vld [vmem:[#allocation11 + $0x148] sm:$0xff]  }
 0x48c   : > { %v5288_v57 = vsel %vm4613_vm11, %v5287_v47, %v5286_v0  ;;  %v5309_v9 = vsel %vm4601_vm7, %v5308_v45, %v5307_v46  ;;  %v5315_v12 = vrot.slane %v10004_v58, 5  ;;  %v5317_v32 = vrot.slane %v10018_v17, 4  ;;  %7131 = vmatprep.subr.bf16.mxu0 %v7847_v30  ;;  %v7853_v30 = vld [vmem:[#allocation11 + $0x110] sm:$0xff]  }
 0x48d   : > { %5219 = vmatprep.mubr.bf16.mxu0 %v5088_v19  ;;  %v5290_v18 = vsel %vm4616_vm12, %v5289_v34, %v5288_v57  ;;  %v5310_v52 = vsel %vm4604_vm8, %v9959_v5, %v5309_v9  ;;  %v5031_v26 = vrot.slane %v9758_v38, 2  ;;  %v5032_v10 = vrot.slane %v9776_v59, 1  ;;  %v7848_v34 = vld [vmem:[#allocation11 + $0x1d8] sm:$0xff]  }
 0x48e   : > { %v5312_v7 = vsel %vm4607_vm9, %v5311_v4, %v5310_v52  ;;  %7150 = vmatpush3.bf16.msra.mxu1 %v7842_v36  ;;  %v5035_v40 = vrot.slane %v9814_v15, 7  ;;  %v5037_v48 = vrot.slane %v9832_v50, 6  ;;  %v5039_v56 = vrot.slane %v9853_v37, 5 }
 0x48f   : > { %v5314_v47 = vsel %vm4610_vm10, %v5313_v39, %v5312_v7  ;;  %7151 = vmatprep.subr.bf16.mxu1 %v7844_v51  ;;  %7132 = vmatpush3.bf16.msra.mxu0 %v7849_v44  ;;  %v5033_v41 = vsel %vm4598_vm6, %v5032_v10, %v5031_v26  ;;  %v5041_v43 = vrot.slane %v9868_v13, 4  ;;  %v5043_v16 = vrot.slane %v9886_v61, 3  ;;  %v7850_v51 = vld [vmem:[#allocation11 + $0x198] sm:$0xff]   ;;  %v7859_v10 = vld [vmem:[#allocation11 + $0x140] sm:$0xff]  }
 0x490   : > { %v5316_v55 = vsel %vm4613_vm11, %v5315_v12, %v5314_v47  ;;  %7133 = vmatprep.subr.bf16.mxu0 %v7851_v21  ;;  %v5034_v28 = vsel %vm4601_vm7, %v9798_v25, %v5033_v41  ;;  %v5059_v45 = vrot.slane %v9908_v1, 2  ;;  %v5060_v4 = vrot.slane %v9921_v49, 1  ;;  %v7852_v12 = vld [vmem:[#allocation11 + $0x1d0] sm:$0xff]   ;;  %v7857_v21 = vld [vmem:[#allocation11 + $0x108] sm:$0xff]  }
 0x491   : > { %v5318_v36 = vsel %vm4616_vm12, %v5317_v32, %v5316_v55  ;;  %v5036_v19 = vsel %vm4604_vm8, %v5035_v40, %v5034_v28  ;;  %v5063_v0 = vrot.slane %v9953_v62, 7  ;;  %v5065_v46 = vrot.slane %v9964_v8, 6  ;;  %v7854_v41 = vld [vmem:[#allocation11 + $0x190] sm:$0xff]  }
 0x492   : > { %v5320_v39 = vpack.c.b16 %v5318_v36, %v5290_v18  ;;  %7152 = vmatpush3.bf16.msra.mxu1 %v7846_v31  ;;  %v5038_v44 = vsel %vm4607_vm9, %v5037_v48, %v5036_v19  ;;  %v5061_v57 = vsel %vm4598_vm6, %v5060_v4, %v5059_v45  ;;  %v5067_v9 = vrot.slane %v9980_v6, 5  ;;  %v7856_v45 = vld [vmem:[#allocation11 + $0x1c8] sm:$0xff]  }
 0x493   : > { %7153 = vmatprep.subr.bf16.mxu1 %v7848_v34  ;;  %7134 = vmatpush3.bf16.msra.mxu0 %v7853_v30  ;;  %v5040_v32 = vsel %vm4610_vm10, %v5039_v56, %v5038_v44  ;;  %v5062_v52 = vsel %vm4601_vm7, %v9935_v20, %v5061_v57  ;;  %v5069_v26 = vrot.slane %v9998_v33, 4  ;;  %v5071_v18 = vrot.slane %v10009_v27, 3  ;;  %v7863_v57 = vld [vmem:[#allocation11 + $0x278] sm:$0xff]  }
 0x494   : > { %5451 = vmatprep.mubr.bf16.mxu1 %v5320_v39  ;;  %7135 = vmatprep.subr.bf16.mxu0 %v7855_v54  ;;  %v5042_v7 = vsel %vm4613_vm11, %v5041_v43, %v5040_v32  ;;  %v5064_v31 = vsel %vm4604_vm8, %v5063_v0, %v5062_v52  ;;  %v5263_v40 = vrot.slane %v9758_v38, 3  ;;  %v5264_v48 = vrot.slane %v9776_v59, 2  ;;  %v7858_v52 = vld [vmem:[#allocation11 + $0x188] sm:$0xff]  }
 0x495   : > { %v5044_v56 = vsel %vm4616_vm12, %v5043_v16, %v5042_v7  ;;  %v5066_v47 = vsel %vm4607_vm9, %v5065_v46, %v5064_v31  ;;  %v5266_v34 = vrot.slane %v9798_v25, 1  ;;  %v5269_v30 = vrot.slane %v9832_v50, 7  ;;  %v7861_v16 = vld [vmem:[#allocation11 + $0x100] sm:$0xff]  }
 0x496   : > { %7154 = vmatpush3.bf16.msra.mxu1 %v7850_v51  ;;  %v5068_v55 = vsel %vm4610_vm10, %v5067_v9, %v5066_v47  ;;  %v5265_v43 = vsel %vm4598_vm6, %v5264_v48, %v5263_v40  ;;  %v5271_v54 = vrot.slane %v9853_v37, 6  ;;  %v5273_v28 = vrot.slane %v9868_v13, 5  ;;  %v7860_v31 = vld [vmem:[#allocation11 + $0x1c0] sm:$0xff]  }
 0x497   : > { %7155 = vmatprep.subr.bf16.mxu1 %v7852_v12  ;;  %7136 = vmatpush3.bf16.msra.mxu0 %v7857_v21  ;;  %v5070_v4 = vsel %vm4613_vm11, %v5069_v26, %v5068_v55  ;;  %v5267_v36 = vsel %vm4601_vm7, %v5266_v34, %v5265_v43  ;;  %v5275_v19 = vrot.slane %v9886_v61, 4  ;;  %v5291_v0 = vrot.slane %v9908_v1, 3 }
 0x498   : > { %7137 = vmatprep.subr.bf16.mxu0 %v7859_v10  ;;  %v5072_v46 = vsel %vm4616_vm12, %v5071_v18, %v5070_v4  ;;  %v5268_v39 = vsel %vm4604_vm8, %v9814_v15, %v5267_v36  ;;  %v5292_v51 = vrot.slane %v9921_v49, 2  ;;  %v5294_v44 = vrot.slane %v9935_v20, 1  ;;  %v7862_v36 = vld [vmem:[#allocation11 + $0x180] sm:$0xff]  }
 0x499   : > { %v5087_v9 = vpack.c.b16 %v5072_v46, %v5044_v56  ;;  %v5270_v12 = vsel %vm4607_vm9, %v5269_v30, %v5268_v39  ;;  %v5297_v21 = vrot.slane %v9964_v8, 7  ;;  %v5299_v32 = vrot.slane %v9980_v6, 6  ;;  %v7865_v56 = vld [vmem:[#allocation11 + $0x238] sm:$0xff]  }
 0x49a   : > { %7156 = vmatpush3.bf16.msra.mxu1 %v7854_v41  ;;  %v5272_v26 = vsel %vm4610_vm10, %v5271_v54, %v5270_v12  ;;  %v5293_v18 = vsel %vm4598_vm6, %v5292_v51, %v5291_v0  ;;  %v5301_v10 = vrot.slane %v9998_v33, 5  ;;  %v5303_v7 = vrot.slane %v10009_v27, 4  ;;  %v7867_v54 = vld [vmem:[#allocation11 + $0x270] sm:$0xff]  }
 0x49b   : > { %7157 = vmatprep.subr.bf16.mxu1 %v7856_v45  ;;  %7138 = vmatpush3.bf16.msra.mxu0 %v7861_v16  ;;  %v5274_v40 = vsel %vm4613_vm11, %v5273_v28, %v5272_v26  ;;  %v5295_v48 = vsel %vm4601_vm7, %v5294_v44, %v5293_v18  ;;  %v5509_v47 = vrot.slane %v9768_v22, 4  ;;  %v5510_v34 = vrot.slane %v9784_v29, 3  ;;  %v7864_v44 = vld [vmem:[#allocation11 + $0x2f8] sm:$0xff]  }
 0x49c   : > { %v5276_v30 = vsel %vm4616_vm12, %v5275_v19, %v5274_v40  ;;  %v5296_v41 = vsel %vm4604_vm8, %v9953_v62, %v5295_v48  ;;  %7167 = vmatprep.subr.bf16.mxu0 %v7863_v57  ;;  %v5512_v55 = vrot.slane %v9807_v63, 2  ;;  %v5514_v43 = vrot.slane %v9823_v11, 1 }
 0x49d   : > { %v5298_v28 = vsel %vm4607_vm9, %v5297_v21, %v5296_v41  ;;  %v5511_v45 = vsel %vm4598_vm6, %v5510_v34, %v5509_v47  ;;  %v5517_v16 = vrot.slane %v9861_v24, 7  ;;  %v5519_v4 = vrot.slane %v9877_v42, 6  ;;  %v7866_v41 = vld [vmem:[#allocation11 + $0x2b8] sm:$0xff]  }
 0x49e   : > { %7158 = vmatpush3.bf16.msra.mxu1 %v7858_v52  ;;  %5220 = vmatmul.mubr.bf16.vlgmr.msra.gmra.mxu0 %v5087_v9  ;;  %v5300_v19 = vsel %vm4610_vm10, %v5299_v32, %v5298_v28  ;;  %v5513_v0 = vsel %vm4601_vm7, %v5512_v55, %v5511_v45  ;;  %v5521_v46 = vrot.slane %v9895_v23, 5  ;;  %v5537_v39 = vrot.slane %v9914_v60, 4  ;;  %v7869_v9 = vld [vmem:[#allocation11 + $0x230] sm:$0xff]  }
 0x49f   : > { %7159 = vmatprep.subr.bf16.mxu1 %v7860_v31  ;;  %v5302_v51 = vsel %vm4613_vm11, %v5301_v10, %v5300_v19  ;;  %7168 = vmatpush3.bf16.msra.mxu0 %v7865_v56  ;;  %v5515_v57 = vsel %vm4604_vm8, %v5514_v43, %v5513_v0  ;;  %v5538_v12 = vrot.slane %v9928_v35, 3  ;;  %v5540_v21 = vrot.slane %v9943_v3, 2  ;;  %v7871_v10 = vld [vmem:[#allocation11 + $0x268] sm:$0xff]   ;;  %v7868_v45 = vld [vmem:[#allocation11 + $0x2f0] sm:$0xff]  }
 0x4a0   : > { %v5304_v32 = vsel %vm4616_vm12, %v5303_v7, %v5302_v51  ;;  %v5516_v52 = vsel %vm4607_vm9, %v9841_v14, %v5515_v57  ;;  %v5542_v26 = vrot.slane %v9959_v5, 1  ;;  %v5545_v18 = vrot.slane %v9987_v53, 7  ;;  %7169 = vmatprep.subr.bf16.mxu0 %v7867_v54 }
 0x4a1   : > { %v5319_v31 = vpack.c.b16 %v5304_v32, %v5276_v30  ;;  %v5518_v40 = vsel %vm4610_vm10, %v5517_v16, %v5516_v52  ;;  %v5539_v48 = vsel %vm4598_vm6, %v5538_v12, %v5537_v39  ;;  %v5547_v56 = vrot.slane %v10004_v58, 6  ;;  %v7873_v16 = vld [vmem:[#allocation11 + $0x228] sm:$0xff]   ;;  %v7870_v52 = vld [vmem:[#allocation11 + $0x2b0] sm:$0xff]  }
 0x4a2   : > { %7160 = vmatpush3.bf16.msra.mxu1 %v7862_v36  ;;  %v5520_v47 = vsel %vm4613_vm11, %v5519_v4, %v5518_v40  ;;  %v5541_v7 = vsel %vm4601_vm7, %v5540_v21, %v5539_v48  ;;  %v5549_v34 = vrot.slane %v10018_v17, 5  ;;  %v5741_v55 = vrot.slane %v9768_v22, 5  ;;  %v7872_v40 = vld [vmem:[#allocation11 + $0x2e8] sm:$0xff]   ;;  %v7877_v48 = vld [vmem:[#allocation11 + $0x220] sm:$0xff]  }
 0x4a3   : > { %7189 = vmatprep.subr.bf16.mxu1 %v7864_v44  ;;  %v5522_v43 = vsel %vm4616_vm12, %v5521_v46, %v5520_v47  ;;  %v5543_v30 = vsel %vm4604_vm8, %v5542_v26, %v5541_v7  ;;  %v5742_v54 = vrot.slane %v9784_v29, 4  ;;  %v5744_v28 = vrot.slane %v9807_v63, 3  ;;  %7170 = vmatpush3.bf16.msra.mxu0 %v7869_v9  ;;  %v7875_v46 = vld [vmem:[#allocation11 + $0x260] sm:$0xff]  }
 0x4a4   : > { %v5544_v4 = vsel %vm4607_vm9, %v9971_v2, %v5543_v30  ;;  %v5746_v36 = vrot.slane %v9823_v11, 2  ;;  %v5748_v19 = vrot.slane %v9841_v14, 1  ;;  %v5751_v0 = vrot.slane %v9877_v42, 7  ;;  %7171 = vmatprep.subr.bf16.mxu0 %v7871_v10 }
 0x4a5   : > { %5452 = vmatmul.mubr.bf16.vlgmr.msra.gmra.mxu1 %v5319_v31  ;;  %v5546_v39 = vsel %vm4610_vm10, %v5545_v18, %v5544_v4  ;;  %v5743_v51 = vsel %vm4598_vm6, %v5742_v54, %v5741_v55  ;;  %v5753_v44 = vrot.slane %v9895_v23, 6  ;;  %v5769_v57 = vrot.slane %v9914_v60, 5  ;;  %v7879_v55 = vld [vmem:[#allocation11 + $0x258] sm:$0xff]  }
 0x4a6   : > { %v5548_v12 = vsel %vm4613_vm11, %v5547_v56, %v5546_v39  ;;  %7190 = vmatpush3.bf16.msra.mxu1 %v7866_v41  ;;  %v5745_v21 = vsel %vm4601_vm7, %v5744_v28, %v5743_v51  ;;  %v5770_v9 = vrot.slane %v9928_v35, 4  ;;  %v5772_v32 = vrot.slane %v9943_v3, 3  ;;  %v7876_v39 = vld [vmem:[#allocation11 + $0x2e0] sm:$0xff]   ;;  %v7881_v51 = vld [vmem:[#allocation11 + $0x218] sm:$0xff]  }
 0x4a7   : > { %v5550_v26 = vsel %vm4616_vm12, %v5549_v34, %v5548_v12  ;;  %v5747_v18 = vsel %vm4604_vm8, %v5746_v36, %v5745_v21  ;;  %v5774_v10 = vrot.slane %v9959_v5, 2  ;;  %v5776_v31 = vrot.slane %v9971_v2, 1  ;;  %7191 = vmatprep.subr.bf16.mxu1 %v7868_v45  ;;  %7172 = vmatpush3.bf16.msra.mxu0 %v7873_v16  ;;  %v7874_v16 = vld [vmem:[#allocation11 + $0x2a8] sm:$0xff]   ;;  %v7883_v21 = vld [vmem:[#allocation11 + $0x250] sm:$0xff]  }
 0x4a8   : > { %v5552_v56 = vpack.c.b16 %v5550_v26, %v5522_v43  ;;  %v5749_v47 = vsel %vm4607_vm9, %v5748_v19, %v5747_v18  ;;  %v5771_v7 = vsel %vm4598_vm6, %v5770_v9, %v5769_v57  ;;  %v5779_v41 = vrot.slane %v10004_v58, 7  ;;  %7173 = vmatprep.subr.bf16.mxu0 %v7875_v46 }
 0x4a9   : > { %v5750_v34 = vsel %vm4610_vm10, %v9861_v24, %v5749_v47  ;;  %v5773_v30 = vsel %vm4601_vm7, %v5772_v32, %v5771_v7  ;;  %v5781_v54 = vrot.slane %v10018_v17, 6  ;;  %v5495_v28 = vrot.slane %v9758_v38, 4 }
 0x4aa   : > { %5683 = vmatprep.mubr.bf16.mxu0 %v5552_v56  ;;  %v5752_v43 = vsel %vm4613_vm11, %v5751_v0, %v5750_v34  ;;  %v5775_v45 = vsel %vm4604_vm8, %v5774_v10, %v5773_v30  ;;  %7192 = vmatpush3.bf16.msra.mxu1 %v7870_v52  ;;  %v5496_v4 = vrot.slane %v9776_v59, 3  ;;  %v5498_v36 = vrot.slane %v9798_v25, 2 }
 0x4ab   : > { %v5754_v19 = vsel %vm4616_vm12, %v5753_v44, %v5752_v43  ;;  %v5777_v46 = vsel %vm4607_vm9, %v5776_v31, %v5775_v45  ;;  %7193 = vmatprep.subr.bf16.mxu1 %v7872_v40  ;;  %7174 = vmatpush3.bf16.msra.mxu0 %v7877_v48  ;;  %v5500_v57 = vrot.slane %v9814_v15, 1  ;;  %v5503_v0 = vrot.slane %v9853_v37, 7  ;;  %v7878_v40 = vld [vmem:[#allocation11 + $0x2a0] sm:$0xff]  }
 0x4ac   : > { %v5778_v12 = vsel %vm4610_vm10, %v9987_v53, %v5777_v46  ;;  %7175 = vmatprep.subr.bf16.mxu0 %v7879_v55  ;;  %v5497_v9 = vsel %vm4598_vm6, %v5496_v4, %v5495_v28  ;;  %v5505_v32 = vrot.slane %v9868_v13, 6  ;;  %v5507_v44 = vrot.slane %v9886_v61, 5  ;;  %v7880_v55 = vld [vmem:[#allocation11 + $0x2d8] sm:$0xff]   ;;  %v7887_v28 = vld [vmem:[#allocation11 + $0x248] sm:$0xff]  }
 0x4ad   : > { %v5780_v52 = vsel %vm4613_vm11, %v5779_v41, %v5778_v12  ;;  %v5499_v26 = vsel %vm4601_vm7, %v5498_v36, %v5497_v9  ;;  %v5523_v18 = vrot.slane %v9908_v1, 4  ;;  %v5524_v10 = vrot.slane %v9921_v49, 3  ;;  %v7885_v41 = vld [vmem:[#allocation11 + $0x210] sm:$0xff]   ;;  %v7889_v9 = vld [vmem:[#allocation11 + $0x208] sm:$0xff]  }
 0x4ae   : > { %v5782_v31 = vsel %vm4616_vm12, %v5781_v54, %v5780_v52  ;;  %7194 = vmatpush3.bf16.msra.mxu1 %v7874_v16  ;;  %v5501_v48 = vsel %vm4604_vm8, %v5500_v57, %v5499_v26  ;;  %v5526_v56 = vrot.slane %v9935_v20, 2  ;;  %v5528_v47 = vrot.slane %v9953_v62, 1 }
 0x4af   : > { %v5784_v7 = vpack.c.b16 %v5782_v31, %v5754_v19  ;;  %7195 = vmatprep.subr.bf16.mxu1 %v7876_v39  ;;  %7176 = vmatpush3.bf16.msra.mxu0 %v7881_v51  ;;  %v5502_v34 = vsel %vm4607_vm9, %v9832_v50, %v5501_v48  ;;  %v5525_v30 = vsel %vm4598_vm6, %v5524_v10, %v5523_v18  ;;  %v5531_v54 = vrot.slane %v9980_v6, 7  ;;  %v7882_v39 = vld [vmem:[#allocation11 + $0x298] sm:$0xff]   ;;  %v7891_v10 = vld [vmem:[#allocation11 + $0x240] sm:$0xff]  }
 0x4b0   : > { %7177 = vmatprep.subr.bf16.mxu0 %v7883_v21  ;;  %v5504_v43 = vsel %vm4610_vm10, %v5503_v0, %v5502_v34  ;;  %v5527_v45 = vsel %vm4601_vm7, %v5526_v56, %v5525_v30  ;;  %v5533_v16 = vrot.slane %v9998_v33, 6  ;;  %v5535_v36 = vrot.slane %v10009_v27, 5  ;;  %v7884_v21 = vld [vmem:[#allocation11 + $0x2d0] sm:$0xff]  }
 0x4b1   : > { %5915 = vmatprep.mubr.bf16.mxu1 %v5784_v7  ;;  %v5529_v4 = vsel %vm4604_vm8, %v5528_v47, %v5527_v45  ;;  %v5727_v19 = vrot.slane %v9758_v38, 5  ;;  %v5728_v46 = vrot.slane %v9776_v59, 4  ;;  %v5506_v51 = vsel %vm4613_vm11, %v5505_v32, %v5504_v43  ;;  %v7888_v43 = vld [vmem:[#allocation11 + $0x2c8] sm:$0xff]   ;;  %v7893_v45 = vld [vmem:[#allocation11 + $0x200] sm:$0xff]  }
 0x4b2   : > { %7196 = vmatpush3.bf16.msra.mxu1 %v7878_v40  ;;  %v5530_v57 = vsel %vm4607_vm9, %v9964_v8, %v5529_v4  ;;  %v5730_v0 = vrot.slane %v9798_v25, 3  ;;  %v5732_v12 = vrot.slane %v9814_v15, 2  ;;  %v10292_v52 = vsel %vm4616_vm12, %v5507_v44, %v5506_v51  ;;  %v7895_v51 = vld [vmem:[#allocation11 + $0x378] sm:$0xff]  }
 0x4b3   : > { %7197 = vmatprep.subr.bf16.mxu1 %v7880_v55  ;;  %7178 = vmatpush3.bf16.msra.mxu0 %v7885_v41  ;;  %v5532_v26 = vsel %vm4610_vm10, %v5531_v54, %v5530_v57  ;;  %v5729_v18 = vsel %vm4598_vm6, %v5728_v46, %v5727_v19  ;;  %v5734_v32 = vrot.slane %v9832_v50, 1  ;;  %v5737_v48 = vrot.slane %v9868_v13, 7  ;;  %v7886_v41 = vld [vmem:[#allocation11 + $0x290] sm:$0xff]  }
 0x4b4   : > { %7179 = vmatprep.subr.bf16.mxu0 %v7887_v28  ;;  %v5534_v31 = vsel %vm4613_vm11, %v5533_v16, %v5532_v26  ;;  %v5731_v40 = vsel %vm4601_vm7, %v5730_v0, %v5729_v18  ;;  %v5755_v56 = vrot.slane %v9908_v1, 5  ;;  %v5756_v7 = vrot.slane %v9921_v49, 4  ;;  %v7890_v26 = vld [vmem:[#allocation11 + $0x288] sm:$0xff]  }
 0x4b5   : > { %v5536_v47 = vsel %vm4616_vm12, %v5535_v36, %v5534_v31  ;;  %v5733_v44 = vsel %vm4604_vm8, %v5732_v12, %v5731_v40  ;;  %v5758_v55 = vrot.slane %v9935_v20, 3  ;;  %v5739_v30 = vrot.slane %v9886_v61, 6  ;;  %v7892_v40 = vld [vmem:[#allocation11 + $0x2c0] sm:$0xff]  }
 0x4b6   : > { %7198 = vmatpush3.bf16.msra.mxu1 %v7882_v39  ;;  %v5735_v34 = vsel %vm4607_vm9, %v5734_v32, %v5733_v44  ;;  %v5760_v54 = vrot.slane %v9953_v62, 2  ;;  %v5762_v28 = vrot.slane %v9964_v8, 1  ;;  %v5551_v16 = vpack.c.b16 %v5536_v47, %v10292_v52 }
 0x4b7   : > { %7199 = vmatprep.subr.bf16.mxu1 %v7884_v21  ;;  %7180 = vmatpush3.bf16.msra.mxu0 %v7889_v9  ;;  %v5736_v4 = vsel %vm4610_vm10, %v9853_v37, %v5735_v34  ;;  %v5757_v36 = vsel %vm4598_vm6, %v5756_v7, %v5755_v56  ;;  %v5765_v19 = vrot.slane %v9998_v33, 7  ;;  %v5767_v39 = vrot.slane %v10009_v27, 6  ;;  %v7897_v56 = vld [vmem:[#allocation11 + $0x338] sm:$0xff]  }
 0x4b8   : > { %7181 = vmatprep.subr.bf16.mxu0 %v7891_v10  ;;  %v5759_v46 = vsel %vm4601_vm7, %v5758_v55, %v5757_v36  ;;  %v5973_v57 = vrot.slane %v9768_v22, 6  ;;  %v5974_v0 = vrot.slane %v9784_v29, 5  ;;  %v5738_v12 = vsel %vm4613_vm11, %v5737_v48, %v5736_v4 }
 0x4b9   : > { %v5761_v21 = vsel %vm4604_vm8, %v5760_v54, %v5759_v46  ;;  %v5976_v9 = vrot.slane %v9807_v63, 4  ;;  %v5978_v52 = vrot.slane %v9823_v11, 3  ;;  %v5980_v10 = vrot.slane %v9841_v14, 2  ;;  %v7894_v46 = vld [vmem:[#allocation11 + $0x280] sm:$0xff]  }
 0x4ba   : > { %7200 = vmatpush3.bf16.msra.mxu1 %v7886_v41  ;;  %v5763_v18 = vsel %vm4607_vm9, %v5762_v28, %v5761_v21  ;;  %v5975_v32 = vsel %vm4598_vm6, %v5974_v0, %v5973_v57  ;;  %v5982_v31 = vrot.slane %v9861_v24, 1  ;;  %v5985_v44 = vrot.slane %v9895_v23, 7  ;;  %v7899_v28 = vld [vmem:[#allocation11 + $0x370] sm:$0xff]  }
 0x4bb   : > { %7201 = vmatprep.subr.bf16.mxu1 %v7888_v43  ;;  %7182 = vmatpush3.bf16.msra.mxu0 %v7893_v45  ;;  %v5764_v48 = vsel %vm4610_vm10, %v9980_v6, %v5763_v18  ;;  %v5977_v47 = vsel %vm4601_vm7, %v5976_v9, %v5975_v32  ;;  %v6001_v7 = vrot.slane %v9914_v60, 6  ;;  %v6002_v34 = vrot.slane %v9928_v35, 5 }
 0x4bc   : > { %v5766_v55 = vsel %vm4613_vm11, %v5765_v19, %v5764_v48  ;;  %7211 = vmatprep.subr.bf16.mxu0 %v7895_v51  ;;  %v5979_v41 = vsel %vm4604_vm8, %v5978_v52, %v5977_v47  ;;  %v6004_v54 = vrot.slane %v9943_v3, 4  ;;  %v6006_v4 = vrot.slane %v9959_v5, 3 }
 0x4bd   : > { %v5768_v43 = vsel %vm4616_vm12, %v5767_v39, %v5766_v55  ;;  %v5981_v45 = vsel %vm4607_vm9, %v5980_v10, %v5979_v41  ;;  %v6008_v36 = vrot.slane %v9971_v2, 2  ;;  %v5740_v19 = vsel %vm4616_vm12, %v5739_v30, %v5738_v12  ;;  %v7896_v39 = vld [vmem:[#allocation11 + $0x3f8] sm:$0xff]   ;;  %v7903_v10 = vld [vmem:[#allocation11 + $0x368] sm:$0xff]   ;;  %v7900_v41 = vld [vmem:[#allocation11 + $0x3f0] sm:$0xff]  }
 0x4be   : > { %7202 = vmatpush3.bf16.msra.mxu1 %v7890_v26  ;;  %5684 = vmatmul.mubr.bf16.vlgmr.msra.gmra.mxu0 %v5551_v16  ;;  %v5983_v51 = vsel %vm4610_vm10, %v5982_v31, %v5981_v45  ;;  %v6003_v57 = vsel %vm4598_vm6, %v6002_v34, %v6001_v7  ;;  %v6010_v0 = vrot.slane %v9987_v53, 1  ;;  %v5783_v21 = vpack.c.b16 %v5768_v43, %v5740_v19  ;;  %v7901_v16 = vld [vmem:[#allocation11 + $0x330] sm:$0xff]   ;;  %v7898_v7 = vld [vmem:[#allocation11 + $0x3b8] sm:$0xff]   ;;  %v7907_v45 = vld [vmem:[#allocation11 + $0x360] sm:$0xff]  }
 0x4bf   : > { %7203 = vmatprep.subr.bf16.mxu1 %v7892_v40  ;;  %7212 = vmatpush3.bf16.msra.mxu0 %v7897_v56  ;;  %v5984_v9 = vsel %vm4613_vm11, %v9877_v42, %v5983_v51  ;;  %v6005_v52 = vsel %vm4601_vm7, %v6004_v54, %v6003_v57  ;;  %v6013_v26 = vrot.slane %v10018_v17, 7  ;;  %v6205_v12 = vrot.slane %v9768_v22, 7  ;;  %v7904_v51 = vld [vmem:[#allocation11 + $0x3e8] sm:$0xff]  }
 0x4c0   : > { %v6007_v30 = vsel %vm4604_vm8, %v6006_v4, %v6005_v52  ;;  %v6206_v18 = vrot.slane %v9784_v29, 6  ;;  %v6208_v32 = vrot.slane %v9807_v63, 5  ;;  %7213 = vmatprep.subr.bf16.mxu0 %v7899_v28  ;;  %v5986_v31 = vsel %vm4616_vm12, %v5985_v44, %v5984_v9  ;;  %v7905_v28 = vld [vmem:[#allocation11 + $0x328] sm:$0xff]  }
 0x4c1   : > { %v6009_v40 = vsel %vm4607_vm9, %v6008_v36, %v6007_v30  ;;  %v6210_v48 = vrot.slane %v9823_v11, 4  ;;  %v6212_v56 = vrot.slane %v9841_v14, 3  ;;  %v6214_v29 = vrot.slane %v9861_v24, 2  ;;  %v7906_v9 = vld [vmem:[#allocation11 + $0x3a8] sm:$0xff]  }
 0x4c2   : > { %7204 = vmatpush3.bf16.msra.mxu1 %v7894_v46  ;;  %v6011_v47 = vsel %vm4610_vm10, %v6010_v0, %v6009_v40  ;;  %v6207_v22 = vsel %vm4598_vm6, %v6206_v18, %v6205_v12  ;;  %v6216_v63 = vrot.slane %v9877_v42, 1  ;;  %v6233_v55 = vrot.slane %v9914_v60, 7  ;;  %v7902_v46 = vld [vmem:[#allocation11 + $0x3b0] sm:$0xff]   ;;  %v7909_v0 = vld [vmem:[#allocation11 + $0x320] sm:$0xff]   ;;  %v7913_v12 = vld [vmem:[#allocation11 + $0x318] sm:$0xff]  }
 0x4c3   : > { %7233 = vmatprep.subr.bf16.mxu1 %v7896_v39  ;;  %v6012_v44 = vsel %vm4613_vm11, %v10004_v58, %v6011_v47  ;;  %v6234_v11 = vrot.slane %v9928_v35, 6  ;;  %v6236_v14 = vrot.slane %v9943_v3, 5  ;;  %7214 = vmatpush3.bf16.msra.mxu0 %v7901_v16  ;;  %v6209_v54 = vsel %vm4601_vm7, %v6208_v32, %v6207_v22  ;;  %v7911_v39 = vld [vmem:[#allocation11 + $0x358] sm:$0xff]   ;;  %v7908_v16 = vld [vmem:[#allocation11 + $0x3e0] sm:$0xff]   ;;  %v7915_v18 = vld [vmem:[#allocation11 + $0x350] sm:$0xff]  }
 0x4c4   : > { %v6014_v34 = vsel %vm4616_vm12, %v6013_v26, %v6012_v44  ;;  %v6238_v24 = vrot.slane %v9959_v5, 4  ;;  %v6240_v42 = vrot.slane %v9971_v2, 3  ;;  %7215 = vmatprep.subr.bf16.mxu0 %v7903_v10  ;;  %v6211_v60 = vsel %vm4604_vm8, %v6210_v48, %v6209_v54  ;;  %v7910_v32 = vld [vmem:[#allocation11 + $0x3a0] sm:$0xff]   ;;  %v7912_v40 = vld [vmem:[#allocation11 + $0x3d8] sm:$0xff]   ;;  %v7917_v48 = vld [vmem:[#allocation11 + $0x310] sm:$0xff]  }
 0x4c5   : > { %5916 = vmatmul.mubr.bf16.vlgmr.msra.gmra.mxu1 %v5783_v21  ;;  %v6016_v43 = vpack.c.b16 %v6014_v34, %v5986_v31  ;;  %v6235_v35 = vsel %vm4598_vm6, %v6234_v11, %v6233_v55  ;;  %v6242_v3 = vrot.slane %v9987_v53, 2  ;;  %v6213_v4 = vsel %vm4607_vm9, %v6212_v56, %v6211_v60  ;;  %v7914_v55 = vld [vmem:[#allocation11 + $0x398] sm:$0xff]   ;;  %v7916_v34 = vld [vmem:[#allocation11 + $0x3d0] sm:$0xff]  }
 0x4c6   : > { %7234 = vmatpush3.bf16.msra.mxu1 %v7898_v7  ;;  %v6237_v36 = vsel %vm4601_vm7, %v6236_v14, %v6235_v35  ;;  %v6244_v5 = vrot.slane %v10004_v58, 1  ;;  %v6215_v2 = vsel %vm4610_vm10, %v6214_v29, %v6213_v4  ;;  %v5960_v10 = vrot.slane %v9776_v59, 5  ;;  %v7919_v29 = vld [vmem:[#allocation11 + $0x348] sm:$0xff]  }
 0x4c7   : > { %6147 = vmatprep.mubr.bf16.mxu0 %v6016_v43  ;;  %v6239_v19 = vsel %vm4604_vm8, %v6238_v24, %v6237_v36  ;;  %7235 = vmatprep.subr.bf16.mxu1 %v7900_v41  ;;  %v6217_v57 = vsel %vm4613_vm11, %v6216_v63, %v6215_v2  ;;  %v5988_v31 = vrot.slane %v9921_v49, 5  ;;  %v5959_v56 = vrot.slane %v9758_v38, 6 }
 0x4c8   : > { %v6241_v53 = vsel %vm4607_vm9, %v6240_v42, %v6239_v19  ;;  %7216 = vmatpush3.bf16.msra.mxu0 %v7905_v28  ;;  %v6218_v52 = vsel %vm4616_vm12, %v9895_v23, %v6217_v57  ;;  %v5962_v23 = vrot.slane %v9798_v25, 4  ;;  %v5964_v47 = vrot.slane %v9814_v15, 3  ;;  %v7921_v28 = vld [vmem:[#allocation11 + $0x308] sm:$0xff]  }
 0x4c9   : > { %v6243_v21 = vsel %vm4610_vm10, %v6242_v3, %v6241_v53  ;;  %7217 = vmatprep.subr.bf16.mxu0 %v7907_v45  ;;  %v5987_v7 = vrot.slane %v9908_v1, 6  ;;  %v5992_v22 = vrot.slane %v9953_v62, 3  ;;  %v5966_v63 = vrot.slane %v9832_v50, 2  ;;  %v7923_v3 = vld [vmem:[#allocation11 + $0x340] sm:$0xff]   ;;  %v7920_v57 = vld [vmem:[#allocation11 + $0x3c8] sm:$0xff]  }
 0x4ca   : > { %v6245_v58 = vsel %vm4613_vm11, %v6244_v5, %v6243_v21  ;;  %7236 = vmatpush3.bf16.msra.mxu1 %v7902_v46  ;;  %v5994_v44 = vrot.slane %v9964_v8, 2  ;;  %v5961_v11 = vsel %vm4598_vm6, %v5960_v10, %v5959_v56  ;;  %v5996_v41 = vrot.slane %v9980_v6, 1  ;;  %v7918_v46 = vld [vmem:[#allocation11 + $0x390] sm:$0xff]  }
 0x4cb   : > { %v6246_v26 = vsel %vm4616_vm12, %v10018_v17, %v6245_v58  ;;  %7237 = vmatprep.subr.bf16.mxu1 %v7904_v51  ;;  %v5990_v17 = vrot.slane %v9935_v20, 4  ;;  %v5989_v14 = vsel %vm4598_vm6, %v5988_v31, %v5987_v7  ;;  %v5963_v54 = vsel %vm4601_vm7, %v5962_v23, %v5961_v11 }
 0x4cc   : > { %v6248_v30 = vpack.c.b16 %v6246_v26, %v6218_v52  ;;  %7218 = vmatpush3.bf16.msra.mxu0 %v7909_v0  ;;  %v5968_v24 = vrot.slane %v9853_v37, 1  ;;  %v5965_v43 = vsel %vm4604_vm8, %v5964_v47, %v5963_v54  ;;  %v6220_v35 = vrot.slane %v9921_v49, 6  ;;  %v7922_v26 = vld [vmem:[#allocation11 + $0x388] sm:$0xff]  }
 0x4cd   : > { %7219 = vmatprep.subr.bf16.mxu0 %v7911_v39  ;;  %v5991_v42 = vsel %vm4601_vm7, %v5990_v17, %v5989_v14  ;;  %v5967_v45 = vsel %vm4607_vm9, %v5966_v63, %v5965_v43  ;;  %v5999_v36 = vrot.slane %v10009_v27, 7  ;;  %v6222_v5 = vrot.slane %v9935_v20, 5  ;;  %v7925_v39 = vld [vmem:[#allocation11 + $0x300] sm:$0xff]  }
 0x4ce   : > { %6379 = vmatprep.mubr.bf16.mxu1 %v6248_v30  ;;  %7238 = vmatpush3.bf16.msra.mxu1 %v7906_v9  ;;  %v5993_v60 = vsel %vm4604_vm8, %v5992_v22, %v5991_v42  ;;  %v6192_v19 = vrot.slane %v9776_v59, 6  ;;  %v6219_v51 = vrot.slane %v9908_v1, 7  ;;  %v6224_v49 = vrot.slane %v9953_v62, 4  ;;  %v7924_v30 = vld [vmem:[#allocation11 + $0x3c0] sm:$0xff]  }
 0x4cf   : > { %7239 = vmatprep.subr.bf16.mxu1 %v7908_v16  ;;  %v5995_v4 = vsel %vm4607_vm9, %v5994_v44, %v5993_v60  ;;  %v5969_v53 = vsel %vm4610_vm10, %v5968_v24, %v5967_v45  ;;  %v5971_v0 = vrot.slane %v9886_v61, 7  ;;  %v6194_v21 = vrot.slane %v9798_v25, 5  ;;  %v7926_v17 = vld [vmem:[#allocation11 + $0x380] sm:$0xff]  }
 0x4d0   : > { %7220 = vmatpush3.bf16.msra.mxu0 %v7913_v12  ;;  %v5997_v2 = vsel %vm4610_vm10, %v5996_v41, %v5995_v4  ;;  %v6226_v20 = vrot.slane %v9964_v8, 3  ;;  %v6191_v58 = vrot.slane %v9758_v38, 7  ;;  %v6196_v59 = vrot.slane %v9814_v15, 4 }
 0x4d1   : > { %7221 = vmatprep.subr.bf16.mxu0 %v7915_v18  ;;  %v6221_v1 = vsel %vm4598_vm6, %v6220_v35, %v6219_v51  ;;  %v6228_v62 = vrot.slane %v9980_v6, 2  ;;  %v5998_v9 = vsel %vm4613_vm11, %v9998_v33, %v5997_v2  ;;  %v6198_v52 = vrot.slane %v9832_v50, 3 }
 0x4d2   : > { %7240 = vmatpush3.bf16.msra.mxu1 %v7910_v32  ;;  %v6223_v25 = vsel %vm4601_vm7, %v6222_v5, %v6221_v1  ;;  %v6230_v8 = vrot.slane %v9998_v33, 1  ;;  %v6000_v38 = vsel %vm4616_vm12, %v5999_v36, %v5998_v9  ;;  %v6193_v15 = vsel %vm4598_vm6, %v6192_v19, %v6191_v58 }
 0x4d3   : > { %7241 = vmatprep.subr.bf16.mxu1 %v7912_v40  ;;  %v6200_v16 = vrot.slane %v9853_v37, 2  ;;  %v6225_v6 = vsel %vm4604_vm8, %v6224_v49, %v6223_v25  ;;  %v5970_v12 = vsel %vm4613_vm11, %v9868_v13, %v5969_v53  ;;  %v6195_v50 = vsel %vm4601_vm7, %v6194_v21, %v6193_v15 }
 0x4d4   : > { %7222 = vmatpush3.bf16.msra.mxu0 %v7917_v48  ;;  %v6202_v18 = vrot.slane %v9868_v13, 1  ;;  %v6227_v33 = vsel %vm4607_vm9, %v6226_v20, %v6225_v6  ;;  %v5972_v32 = vsel %vm4616_vm12, %v5971_v0, %v5970_v12  ;;  %v6197_v10 = vsel %vm4604_vm8, %v6196_v59, %v6195_v50 }
 0x4d5   : > { %7223 = vmatprep.subr.bf16.mxu0 %v7919_v29  ;;  %v6229_v37 = vsel %vm4610_vm10, %v6228_v62, %v6227_v33  ;;  %v6015_v31 = vpack.c.b16 %v6000_v38, %v5972_v32  ;;  %v6199_v40 = vsel %vm4607_vm9, %v6198_v52, %v6197_v10 }
 0x4d6   : > { %7242 = vmatpush3.bf16.msra.mxu1 %v7914_v55  ;;  %v6231_v23 = vsel %vm4613_vm11, %v6230_v8, %v6229_v37  ;;  %v6201_v48 = vsel %vm4610_vm10, %v6200_v16, %v6199_v40  ;;  %v6887_v40 = vld [vmem:[%s10508_s11] ss:$0 sm:$0xff] }
 0x4d7   : > { %7243 = vmatprep.subr.bf16.mxu1 %v7916_v34  ;;  %v6203_v13 = vsel %vm4613_vm11, %v6202_v18, %v6201_v48  ;;  %v6232_v56 = vsel %vm4616_vm12, %v10009_v27, %v6231_v23 }
 0x4d8   : > { %7224 = vmatpush3.bf16.msra.mxu0 %v7921_v28  ;;  %v6204_v47 = vsel %vm4616_vm12, %v9886_v61, %v6203_v13 }
 0x4d9   : > { %7225 = vmatprep.subr.bf16.mxu0 %v7923_v3  ;;  %v6247_v7 = vpack.c.b16 %v6232_v56, %v6204_v47 }
 0x4da   : > { %7244 = vmatpush3.bf16.msra.mxu1 %v7918_v46 }
 0x4db   : > { %7245 = vmatprep.subr.bf16.mxu1 %v7920_v57 }
 0x4dc   : > { %7226 = vmatpush3.bf16.msra.mxu0 %v7925_v39 }
 0x4de   : > { %7246 = vmatpush3.bf16.msra.mxu1 %v7922_v26 }
 0x4df   : > { %7247 = vmatprep.subr.bf16.mxu1 %v7924_v30  ;;  %6148 = vmatmul.mubr.bf16.vlgmr.msra.gmra.mxu0 %v6015_v31 }
 0x4e2   : > { %7248 = vmatpush3.bf16.msra.mxu1 %v7926_v17 }
 0x4e5   : > { %6380 = vmatmul.mubr.bf16.vlgmr.msra.gmra.mxu1 %v6247_v7 }
 0x53e   : > { %v7095_v22 = vpop.f32.mrf.mxu0 }
 0x540   : > { %v7096_v29 = vpop.f32.mrf.mxu0 }
 0x541   : > { %v7097_v35 = vadd.f32 %v7096_v29, %v7095_v22 }
 0x542   : > { %v7098_v44 = vpop.f32.mrf.mxu0 }
 0x544   : > { %v7099_v11 = vpop.f32.mrf.mxu0 }
 0x545   : > { %v7117_v63 = vpop.f32.mrf.mxu1  ;;  %v7100_v46 = vadd.f32 %v7099_v11, %v7098_v44 }
 0x547   : > { %v7118_v55 = vpop.f32.mrf.mxu1 }
 0x548   : > { %v7119_v61 = vadd.f32 %v7118_v55, %v7117_v63 }
 0x549   : > { %v7120_v14 = vpop.f32.mrf.mxu1 }
 0x54a   : > { %v4992_v5 = vadd.f32 %v7119_v61, %v7097_v35 }
 0x54b   : > { %v7121_v34 = vpop.f32.mrf.mxu1 }
 0x54c   : > { %v7122_v2 = vadd.f32 %v7121_v34, %v7120_v14 }
 0x54e   : > { %v4995_v53 = vadd.f32 %v7122_v2, %v7100_v46 }
 0x55e   : > { %v7139_v41 = vpop.f32.mrf.mxu0 }
 0x560   : > { %v7140_v54 = vpop.f32.mrf.mxu0 }
 0x561   : > { %v7141_v4 = vadd.f32 %v7140_v54, %v7139_v41 }
 0x562   : > { %v7142_v42 = vpop.f32.mrf.mxu0 }
 0x563   : > { %v5228_v51 = vadd.f32 %v7141_v4, %v4992_v5 }
 0x564   : > { %v7143_v27 = vpop.f32.mrf.mxu0 }
 0x565   : > { %v7161_v24 = vpop.f32.mrf.mxu1  ;;  %v7144_v49 = vadd.f32 %v7143_v27, %v7142_v42 }
 0x567   : > { %v7162_v28 = vpop.f32.mrf.mxu1  ;;  %v5229_v58 = vadd.f32 %v7144_v49, %v4995_v53 }
 0x568   : > { %v7163_v0 = vadd.f32 %v7162_v28, %v7161_v24 }
 0x569   : > { %v7164_v43 = vpop.f32.mrf.mxu1 }
 0x56a   : > { %v5460_v39 = vadd.f32 %v7163_v0, %v5228_v51 }
 0x56b   : > { %v7165_v3 = vpop.f32.mrf.mxu1 }
 0x56c   : > { %v7166_v62 = vadd.f32 %v7165_v3, %v7164_v43 }
 0x56e   : > { %v5461_v8 = vadd.f32 %v7166_v62, %v5229_v58 }
 0x57e   : > { %v7183_v60 = vpop.f32.mrf.mxu0 }
 0x580   : > { %v7184_v45 = vpop.f32.mrf.mxu0 }
 0x581   : > { %v7185_v21 = vadd.f32 %v7184_v45, %v7183_v60 }
 0x582   : > { %v7186_v19 = vpop.f32.mrf.mxu0 }
 0x583   : > { %v5692_v9 = vadd.f32 %v7185_v21, %v5460_v39 }
 0x584   : > { %v7187_v20 = vpop.f32.mrf.mxu0 }
 0x585   : > { %v7205_v36 = vpop.f32.mrf.mxu1  ;;  %v7188_v52 = vadd.f32 %v7187_v20, %v7186_v19 }
 0x587   : > { %v7206_v57 = vpop.f32.mrf.mxu1  ;;  %v5693_v30 = vadd.f32 %v7188_v52, %v5461_v8 }
 0x588   : > { %v7207_v26 = vadd.f32 %v7206_v57, %v7205_v36 }
 0x589   : > { %v7208_v59 = vpop.f32.mrf.mxu1 }
 0x58a   : > { %v5924_v6 = vadd.f32 %v7207_v26, %v5692_v9 }
 0x58b   : > { %v7209_v15 = vpop.f32.mrf.mxu1 }
 0x58c   : > { %v7210_v18 = vadd.f32 %v7209_v15, %v7208_v59 }
 0x58e   : > { %v5925_v37 = vadd.f32 %v7210_v18, %v5693_v30 }
 0x59f   : > { %v7227_v1 = vpop.f32.mrf.mxu0 }
 0x5a1   : > { %v7228_v25 = vpop.f32.mrf.mxu0 }
 0x5a2   : > { %v7229_v38 = vadd.f32 %v7228_v25, %v7227_v1 }
 0x5a3   : > { %v7230_v16 = vpop.f32.mrf.mxu0 }
 0x5a4   : > { %v6156_v33 = vadd.f32 %v7229_v38, %v5924_v6 }
 0x5a5   : > { %v7249_v12 = vpop.f32.mrf.mxu1  ;;  %v7231_v50 = vpop.f32.mrf.mxu0 }
 0x5a6   : > { %v7232_v32 = vadd.f32 %v7231_v50, %v7230_v16 }
 0x5a7   : > { %v7250_v10 = vpop.f32.mrf.mxu1 }
 0x5a8   : > { %v7251_v31 = vadd.f32 %v7250_v10, %v7249_v12  ;;  %v6157_v48 = vadd.f32 %v7232_v32, %v5925_v37 }
 0x5a9   : > { %v7252_v23 = vpop.f32.mrf.mxu1 }
 0x5aa   : > { %v6388_v17 = vadd.f32 %v7251_v31, %v6156_v33 }
 0x5ab   : > { %v7253_v13 = vpop.f32.mrf.mxu1 }
 0x5ac   : > { %v6397_v56 = vadd.f32 %v6887_v40, %v6388_v17  ;;  %v7254_v47 = vadd.f32 %v7253_v13, %v7252_v23 }
 0x5ae   : > { %6399 = vst [vmem:[%s502_s18] sm:$0xff] %v6397_v56  ;;  %v6389_v7 = vadd.f32 %v7254_v47, %v6157_v48 }
 0x5b0   : > { %v6398_v22 = vadd.f32 %v6887_v40, %v6389_v7 }
 0x5b2   : > { %6400 = vst [vmem:[%s502_s18 + $0x8] sm:$0xff] %v6398_v22 }
 0x5b3   : > { %8098 = shalt.err (!%p8095_p3)
}
 0x5b4   : > { %s8099_s26 = scalar_lea.hbm %s10454_s28, 256  ;;  %s8103_s10 = scalar_lea.hbm %s10509_s12, 512 }
 0x5b5   : > { %p8100_p4 = scmp.ne.s32.totalorder %s10454_s28, %s8099_s26  ;;  %p8104_p5 = scmp.lt.s32.totalorder %s10454_s28, %s10509_s12 }
 0x5b6   : > { %p8105_p7 = scmp.lt.s32.totalorder %s8103_s10, %s8099_s26 }
 0x5b7   : > { %p8101_p12 = pnand %p8100_p4, %p10690_p11 }
 0x5b8   : > { %p8106_p8 = por %p8105_p7, %p8104_p5 }
 0x5b9   : > { %p8102_p6 = pneg %p8101_p12 }
 0x5bb   : > { %p8107_p10 = pnand %p8106_p8, %p8102_p6 }
 0x5bd   : > { %8110 = shalt.err (!%p8107_p10)
}
 0x5be   : > { %s8175_s1 = smov 128   ;;  %s8176_s4 = smov 8  }
 0x5bf   : > { %7549 = dma.vmem_to_hbm [thread:$0]  (%p10690_p11), %s10449_s14, 256, %s10454_s28, %s6402_s17, %s8175_s1, %s8175_s1, %s8176_s4  }
 0x5c0 PF: > { %s6430_s7 = sand.u32 1, %s8149_s21   ;;  %p10691_p13 = scmp.ne.s32.totalorder %s10569_s25, 0 }
 0x5c1   : > { %p10692_p0 = scmp.ge.s32.totalorder %s8161_s24, 2  ;;  %s6431_s15 = scalar_lea.sflag [#allocation4], %s6430_s7 }
 0x5c3   : > { %p7572_p2 = pnand %p10692_p0, %p10691_p13 }
 0x5c5   : > { %p7573_p9 = pneg %p7572_p2 }
 0x5c7   : > { %8144 = dma.done.wait (%p7573_p9), %s6431_s15, 256  }
 0x5c8   : > { %8146 = vsyncadd (%p7573_p9), %s6431_s15, 4294967040  ;;  %s10693_s27 = sld [smem:[#allocation19_spill]]  ;;  %p28_p1 = scmp.ge.s32.totalorder %s8348_s16, 4  }
 0x5c9   : > { %s10694_s23 = sld [smem:[#allocation20_spill]]  ;;  %s10695_s21 = smov %s8153_s22 }
 0x5ca   : > { %s10697_s24 = smov %s8348_s16  ;;  %30 = sbr.rel (!%p28_p1) target bundleno = 14 (0xe), region = 146 }
 0x5ce   : > { %s10696_s22 = smov %s10693_s27 }
 0x5cf   :  { %6436 = vsyncpa [#allocation3], 1 }
 0x5d0   :  { %6438 = vsyncpa [#allocation3 + $0x1], 1 }
 0x5d1   :  { %6439 = vsyncpa [#allocation6], 1 }
 0x5d2   :  { %6440 = vsyncpa [#allocation9], 1 }
 0x5d3   :  { %6441 = vsyncpa [#allocation12], 1 }
 0x5d4   :  { %6442 = vsyncpa [#allocation4], 1 }
 0x5d5   :  { %6444 = vsyncpa [#allocation4 + $0x1], 1 }

</bundles_post_ra>
